<compile_context>
chip_gen: v5e
topology: v5e:2x2
jax: 0.10.0
libtpu: 0.0.40
codegen_flags: <defaults>
</compile_context>

<pallas_src>
import functools

import jax
import jax.numpy as jnp
from jax import lax
from jax.experimental import pallas as pl
from jax.experimental.pallas import tpu as pltpu


# -----------------------------------------------------------------------------
# helpers
# -----------------------------------------------------------------------------
def _round_up(x, m):
    return (x + m - 1) // m * m


def _vmem_bytes(shape, itemsize):
    """Rough VMEM residency of an array: lane dim padded to 128, sublane to 8."""
    s = list(shape)
    if len(s) == 1:
        s = [1] + s
    s[-1] = _round_up(s[-1], 128)
    s[-2] = _round_up(s[-2], 8)
    n = 1
    for d in s:
        n *= d
    return n * itemsize


def _kernel_vmem_bytes(Bt, H, W, C, Fp, Ho, Wop):
    """Rough per-grid-step VMEM footprint (pipelined blocks + live temps)."""
    M = Bt * H * W
    est = 0
    # Pipelined operands (Pallas double-buffers every input/output block,
    # including the constant-index weights; pl.Buffered(1) would halve the
    # weight share but is left at the default for lowering robustness).
    est += 2 * _vmem_bytes((Bt, H + 2, W + 2, C), 2)      # x block (bf16)
    est += 2 * _vmem_bytes((Bt, Ho, Wop), 4)              # out block
    est += 2 * (_vmem_bytes((9, C, Fp), 2)                # w1 (bf16)
                + 2 * _vmem_bytes((1, Fp), 4)             # b1, w2 row
                + _vmem_bytes((Ho, H), 4)                 # ah
                + _vmem_bytes((W, Wop), 4))               # awt
    # Live in-body temporaries.
    est += _vmem_bytes((Bt, H + 2, W + 2, C), 2)          # loaded x value
    est += 2 * _vmem_bytes((M, C), 2)                     # tap slices in flight
    est += 3 * _vmem_bytes((M, Fp), 4)                    # acc, h, h*w2
    est += _vmem_bytes((Bt * H, W), 4)                    # y2d
    est += 2 * _vmem_bytes((Bt * Ho, W), 4)               # height-upsampled
    est += _vmem_bytes((Bt * Ho, Wop), 4)                 # width-upsampled
    return est


def _vmem_cap_bytes():
    """~85% of physical VMEM (v5e/v6e: 128 MiB, v7x: 64 MiB). Conservative
    fallback if the query is unavailable."""
    try:
        phys = int(pltpu.get_tpu_info().vmem_capacity_bytes)
    except Exception:
        phys = 64 * 2 ** 20
    return int(phys * 0.85)


def _prefer_even_grid():
    """v7x shards a 'parallel' grid axis across its 2 TensorCores, so an even
    number of grid steps keeps both busy; v5e/v6e have one TC, so fewer,
    larger steps are strictly better."""
    try:
        kind = jax.devices()[0].device_kind.lower()
        return ("v7" in kind) or ("7x" in kind)
    except Exception:
        return False


def _pick_block_batch(B, fits, prefer_even_grid, max_bt=8):
    """Images per grid step: amortize ~0.35us/step overhead under a VMEM cap."""
    if B <= 1:
        return 1
    candidates = [bt for bt in range(min(max_bt, B), 0, -1)
                  if B % bt == 0 and fits(bt)]
    if not candidates:
        return 1
    if prefer_even_grid:
        for bt in candidates:
            if (B // bt) % 2 == 0:
                return bt
    return candidates[0]


def _bilinear_matrix(out_size, in_size):
    """Row-stochastic (out_size, in_size) matrix for 1-D bilinear interp,
    align_corners=True (PyTorch semantics)."""
    if out_size == 1 or in_size == 1:
        src = jnp.zeros((out_size,), jnp.float32)
    else:
        src = jnp.arange(out_size, dtype=jnp.float32) * (in_size - 1) / (out_size - 1)
    lo = jnp.clip(jnp.floor(src), 0, in_size - 1).astype(jnp.int32)
    hi = jnp.clip(lo + 1, 0, in_size - 1)
    frac = src - lo.astype(jnp.float32)
    cols = jnp.arange(in_size)
    m_lo = (cols[None, :] == lo[:, None]).astype(jnp.float32) * (1.0 - frac)[:, None]
    m_hi = (cols[None, :] == hi[:, None]).astype(jnp.float32) * frac[:, None]
    return m_lo + m_hi


# -----------------------------------------------------------------------------
# Pallas kernel: Bt images of the Prediction head per grid step
# -----------------------------------------------------------------------------
def _prediction_kernel(x_ref, w1_ref, b1_ref, w2_ref, b2_ref, ah_ref, awt_ref,
                       out_ref, *, Bt, H, W, C, Fp, Ho, Wop):
    # x_ref   : (Bt, H+2, W+2, C)  bf16, spatially pre-padded NHWC block
    # w1_ref  : (9, C, Fp)         bf16 conv1 weights (tap-major), F zero-padded
    # b1_ref  : (1, Fp)            f32 conv1 bias (zero-padded)
    # w2_ref  : (1, Fp)            f32 conv2 (1x1) weights as a row (zero-padded)
    # b2_ref  : (1, 1)  [SMEM]     f32 conv2 bias (scalar)
    # ah_ref  : (Ho, H)            f32 bilinear row-interp matrix (align_corners)
    # awt_ref : (W, Wop)           f32 bilinear col-interp matrix, pre-transposed
    # out_ref : (Bt, Ho, Wop)      f32
    M = Bt * H * W
    x = x_ref[...]                                        # (Bt, H+2, W+2, C) bf16

    # --- conv1: 3x3, padding=1, as 9 accumulated (M, C) @ (C, Fp) matmuls.
    # No lane concatenation and no (M, 9C) im2col buffer; the MXU has ample
    # slack so 9 pushes instead of 1 is free, and peak live VMEM drops to
    # one tap + the f32 accumulator.
    acc = jnp.zeros((M, Fp), jnp.float32)
    for ky in range(3):
        x_ky = x[:, ky:ky + H]                            # leading-dim slice: free
        for kx in range(3):
            tap = x_ky[:, :, kx:kx + W, :].reshape(M, C)  # (M, C) bf16
            acc = acc + jnp.dot(tap, w1_ref[ky * 3 + kx],
                                preferred_element_type=jnp.float32)
    h = jnp.maximum(acc + b1_ref[...], 0.0)               # (M, Fp) f32

    # --- conv2: 1x1, Fp -> 1, as a broadcast-mul + lane reduce emitted
    # directly in (Bt*H, W) layout (avoids the N=1 matmul and the
    # (M,1) -> (Bt*H, W) sublane->lane relayout).
    h3 = h.reshape(Bt * H, W, Fp)
    w2 = w2_ref[...].reshape(1, 1, Fp)
    y2d = jnp.maximum(jnp.sum(h3 * w2, axis=-1) + b2_ref[0, 0], 0.0)  # (Bt*H, W)

    # --- bilinear upsample, align_corners=True: height first on the narrow
    # (H, W) maps, then ONE batched width matmul whose output is the final,
    # lane-dense (Bt*Ho, Wop) slab, stored with a single full-block vst.
    y3 = y2d.reshape(Bt, H, W)
    parts = [jnp.dot(ah_ref[...], y3[b], preferred_element_type=jnp.float32)
             for b in range(Bt)]                          # each (Ho, W)
    tmp = parts[0] if Bt == 1 else jnp.concatenate(parts, axis=0)  # (Bt*Ho, W)
    outw = jnp.dot(tmp, awt_ref[...], preferred_element_type=jnp.float32)
    out_ref[...] = outw.reshape(Bt, Ho, Wop).astype(out_ref.dtype)


# -----------------------------------------------------------------------------
# Wrapper (layout conversion, parameter prep, pallas_call)
# -----------------------------------------------------------------------------
def image_sal_pre_forward(x_nchw, params, shape_out, block_batch=None):
    """x_nchw: (B, Cin, H, W) float32.  Returns (B, 1, Ho, Wo) float32."""
    # TODO(synk): encoder (encode_model, e.g. a ResNet backbone) is an external
    # module passed into ImageSalPre; it is treated as identity here.  With a
    # real encoder, emit NHWC features directly (and ideally pre-pad the halo)
    # so the transpose+pad passes below disappear.
    feats = x_nchw

    B, C, H, W = feats.shape
    Ho, Wo = shape_out
    w1, b1, w2, b2 = params["w1"], params["b1"], params["w2"], params["b2"]
    F = w1.shape[3]

    Fp = _round_up(F, 128)            # lane-dense conv1 output / conv2 reduce width
    # Only lane-pad the output when the padding ratio is modest; for small Wo
    # (e.g. 32 -> 128) a masked store beats 4x HBM writes + a wrapper slice.
    Wop_pad = _round_up(Wo, 128)
    Wop = Wop_pad if Wop_pad <= 2 * Wo else Wo

    # NCHW -> NHWC + 1-pixel halo pad for the 3x3 conv; bf16 halves the DMA.
    # TODO(synk): for very small C (<32) a (W+2)*C-packed lane layout would be
    # denser; kept NHWC since real encoder features have C >= 128.
    x_pad = jnp.pad(jnp.transpose(feats, (0, 2, 3, 1)),
                    ((0, 0), (1, 1), (1, 1), (0, 0))).astype(jnp.bfloat16)

    # Parameter prep: tap-major w1 (9, C, Fp) in bf16, zero-padded F.
    w1_p = jnp.pad(w1.astype(jnp.float32),
                   ((0, 0), (0, 0), (0, 0), (0, Fp - F))
                   ).reshape(9, C, Fp).astype(jnp.bfloat16)
    b1_p = jnp.pad(b1.astype(jnp.float32), ((0, 0), (0, Fp - F)))        # (1, Fp)
    w2_p = jnp.pad(w2.astype(jnp.float32), ((0, Fp - F), (0, 0))).T      # (1, Fp)
    b2_p = b2.astype(jnp.float32).reshape(1, 1)

    ah = _bilinear_matrix(Ho, H)                                          # (Ho, H)
    awt = jnp.pad(_bilinear_matrix(Wo, W).T, ((0, 0), (0, Wop - Wo)))     # (W, Wop)

    cap = _vmem_cap_bytes()
    fits = lambda bt: _kernel_vmem_bytes(bt, H, W, C, Fp, Ho, Wop) <= 0.8 * cap
    if block_batch is not None:
        Bt = block_batch
    else:
        Bt = _pick_block_batch(B, fits, _prefer_even_grid())
    assert B % Bt == 0, "block_batch must divide the batch size"
    grid = (B // Bt,)

    kernel = functools.partial(_prediction_kernel, Bt=Bt, H=H, W=W, C=C,
                               Fp=Fp, Ho=Ho, Wop=Wop)

    est = _kernel_vmem_bytes(Bt, H, W, C, Fp, Ho, Wop)
    vmem_limit = int(min(max(2 * est, 32 * 2 ** 20), cap))

    out = pl.pallas_call(
        kernel,
        out_shape=jax.ShapeDtypeStruct((B, Ho, Wop), jnp.float32),
        grid_spec=pltpu.PrefetchScalarGridSpec(
            num_scalar_prefetch=0,
            grid=grid,
            in_specs=[
                pl.BlockSpec((Bt, H + 2, W + 2, C), lambda b: (b, 0, 0, 0)),
                pl.BlockSpec((9, C, Fp), lambda b: (0, 0, 0)),
                pl.BlockSpec((1, Fp), lambda b: (0, 0)),
                pl.BlockSpec((1, Fp), lambda b: (0, 0)),
                pl.BlockSpec(memory_space=pltpu.MemorySpace.SMEM),   # b2 scalar
                pl.BlockSpec((Ho, H), lambda b: (0, 0)),
                pl.BlockSpec((W, Wop), lambda b: (0, 0)),
            ],
            out_specs=pl.BlockSpec((Bt, Ho, Wop), lambda b: (b, 0, 0)),
        ),
        compiler_params=pltpu.CompilerParams(
            dimension_semantics=("parallel",),
            vmem_limit_bytes=vmem_limit),
    )(x_pad, w1_p, b1_p, w2_p, b2_p, ah, awt)

    if Wop != Wo:
        out = out[:, :, :Wo]
    return out[:, None, :, :]          # (B, 1, Ho, Wo), NCHW like the module


def init_params(key, num_in_features, num_out_features):
    """Kaiming-normal (fan_out, relu) conv weights, zero biases, as in Prediction."""
    k1, k2 = jax.random.split(key)
    fan_out1 = num_out_features * 3 * 3
    w1_t = jax.random.normal(k1, (num_out_features, num_in_features, 3, 3),
                             jnp.float32) * jnp.sqrt(2.0 / fan_out1)
    fan_out2 = 1 * 1 * 1
    w2_t = jax.random.normal(k2, (1, num_out_features, 1, 1),
                             jnp.float32) * jnp.sqrt(2.0 / fan_out2)
    return {
        "w1": jnp.transpose(w1_t, (2, 3, 1, 0)),            # (3, 3, Cin, F)
        "b1": jnp.zeros((1, num_out_features), jnp.float32),
        "w2": w2_t.reshape(1, num_out_features).T,           # (F, 1)
        "b2": jnp.zeros((1, 1), jnp.float32),
    }


# -----------------------------------------------------------------------------
# Pure-JAX f32 reference (correctness check)
# -----------------------------------------------------------------------------
def _reference(x_nchw, params, shape_out):
    w1 = jnp.transpose(params["w1"], (3, 2, 0, 1))   # (F, Cin, 3, 3) OIHW
    h = lax.conv_general_dilated(
        x_nchw, w1, window_strides=(1, 1), padding=((1, 1), (1, 1)),
        dimension_numbers=("NCHW", "OIHW", "NCHW"))
    h = jnp.maximum(h + params["b1"].reshape(1, -1, 1, 1), 0.0)
    w2 = params["w2"].T.reshape(1, -1, 1, 1)          # (1, F, 1, 1)
    y = lax.conv_general_dilated(
        h, w2, window_strides=(1, 1), padding="VALID",
        dimension_numbers=("NCHW", "OIHW", "NCHW"))
    y = jnp.maximum(y + params["b2"][0, 0], 0.0)      # (B, 1, H, W)
    H, W = y.shape[2], y.shape[3]
    ah = _bilinear_matrix(shape_out[0], H)
    aw = _bilinear_matrix(shape_out[1], W)
    return jnp.einsum("oh,bchw,pw->bcop", ah, y, aw)


if __name__ == "__main__":
    B, Cin, H, W = 2, 4, 16, 16          # small encoder feature map
    F = 8                                 # num_out_features
    shape_out = (32, 32)                  # Interpolate target size

    key = jax.random.PRNGKey(0)
    kx_, kp = jax.random.split(key)
    x = jax.random.normal(kx_, (B, Cin, H, W), jnp.float32)
    params = init_params(kp, Cin, F)

    out = jax.block_until_ready(image_sal_pre_forward(x, params, shape_out))
    ref = jax.block_until_ready(_reference(x, params, shape_out))

    assert out.shape == (B, 1, shape_out[0], shape_out[1])
    err = float(jnp.max(jnp.abs(out - ref)))
    scale = float(jnp.maximum(1.0, jnp.max(jnp.abs(ref))))
    # conv1 runs in bf16 (f32 accumulation), so compare with a relative bound.
    assert err < 5e-2 * scale, f"mismatch vs pure-JAX reference: {err} (scale {scale})"

    print("KERNEL_OK")
</pallas_src>

<mosaic_0001>
module attributes {stable_mosaic.version = 11 : i64} {
  func.func @_prediction_kernel(%arg0: i32, %arg1: memref<2x18x18x4xbf16, #tpu.memory_space<vmem>>, %arg2: memref<9x4x128xbf16, #tpu.memory_space<vmem>>, %arg3: memref<1x128xf32, #tpu.memory_space<vmem>>, %arg4: memref<1x128xf32, #tpu.memory_space<vmem>>, %arg5: memref<1x1xf32, #tpu.memory_space<smem>>, %arg6: memref<32x16xf32, #tpu.memory_space<vmem>>, %arg7: memref<16x32xf32, #tpu.memory_space<vmem>>, %arg8: memref<2x32x32xf32, #tpu.memory_space<vmem>>) attributes {dimension_semantics = [#tpu.dimension_semantics<parallel>], iteration_bounds = array<i64: 1>, scalar_prefetch = 0 : i64, scratch_operands = 0 : i64, tpu.core_type = #tpu.core_type<tc>, window_params = [{transform_indices = @transform_0, window_bounds = array<i64: 2, 18, 18, 4>}, {pipeline_mode = #tpu.pipeline_mode<synchronous>, transform_indices = @transform_1, window_bounds = array<i64: 9, 4, 128>}, {pipeline_mode = #tpu.pipeline_mode<synchronous>, transform_indices = @transform_2, window_bounds = array<i64: 1, 128>}, {pipeline_mode = #tpu.pipeline_mode<synchronous>, transform_indices = @transform_3, window_bounds = array<i64: 1, 128>}, {transform_indices = @transform_4, window_bounds = array<i64: 1, 1>}, {pipeline_mode = #tpu.pipeline_mode<synchronous>, transform_indices = @transform_5, window_bounds = array<i64: 32, 16>}, {pipeline_mode = #tpu.pipeline_mode<synchronous>, transform_indices = @transform_6, window_bounds = array<i64: 16, 32>}, {transform_indices = @transform_7, window_bounds = array<i64: 2, 32, 32>}]} {
    %c0 = arith.constant 0 : index
    %c0_0 = arith.constant 0 : index
    %c0_1 = arith.constant 0 : index
    %c0_2 = arith.constant 0 : index
    %0 = vector.load %arg1[%c0, %c0_0, %c0_1, %c0_2] : memref<2x18x18x4xbf16, #tpu.memory_space<vmem>>, vector<2x18x18x4xbf16>
    %cst = arith.constant 0.000000e+00 : f32
    %1 = vector.broadcast %cst : f32 to vector<512x128xf32>
    %2 = vector.extract_strided_slice %0 {offsets = [0, 0, 0, 0], sizes = [2, 16, 18, 4], strides = [1, 1, 1, 1]} : vector<2x18x18x4xbf16> to vector<2x16x18x4xbf16>
    %3 = vector.extract_strided_slice %2 {offsets = [0, 0, 0, 0], sizes = [2, 16, 16, 4], strides = [1, 1, 1, 1]} : vector<2x16x18x4xbf16> to vector<2x16x16x4xbf16>
    %4 = vector.shape_cast %3 : vector<2x16x16x4xbf16> to vector<512x4xbf16>
    %c0_3 = arith.constant 0 : index
    %c0_4 = arith.constant 0 : index
    %c0_5 = arith.constant 0 : index
    %5 = vector.load %arg2[%c0_3, %c0_4, %c0_5] : memref<9x4x128xbf16, #tpu.memory_space<vmem>>, vector<1x4x128xbf16>
    %6 = vector.shape_cast %5 : vector<1x4x128xbf16> to vector<4x128xbf16>
    %cst_6 = arith.constant dense<0.000000e+00> : vector<512x128xf32>
    %7 = tpu.matmul %4, %6, %cst_6 {dimension_numbers = #tpu.dot_dimension_numbers<[1], [0], [0], [1], [0, 0, 1, 1], [], []>} : vector<512x4xbf16>, vector<4x128xbf16>, vector<512x128xf32> -> vector<512x128xf32>
    %8 = arith.addf %1, %7 : vector<512x128xf32>
    %9 = vector.extract_strided_slice %2 {offsets = [0, 0, 1, 0], sizes = [2, 16, 16, 4], strides = [1, 1, 1, 1]} : vector<2x16x18x4xbf16> to vector<2x16x16x4xbf16>
    %10 = vector.shape_cast %9 : vector<2x16x16x4xbf16> to vector<512x4xbf16>
    %c1 = arith.constant 1 : index
    %c0_7 = arith.constant 0 : index
    %c0_8 = arith.constant 0 : index
    %11 = vector.load %arg2[%c1, %c0_7, %c0_8] : memref<9x4x128xbf16, #tpu.memory_space<vmem>>, vector<1x4x128xbf16>
    %12 = vector.shape_cast %11 : vector<1x4x128xbf16> to vector<4x128xbf16>
    %cst_9 = arith.constant dense<0.000000e+00> : vector<512x128xf32>
    %13 = tpu.matmul %10, %12, %cst_9 {dimension_numbers = #tpu.dot_dimension_numbers<[1], [0], [0], [1], [0, 0, 1, 1], [], []>} : vector<512x4xbf16>, vector<4x128xbf16>, vector<512x128xf32> -> vector<512x128xf32>
    %14 = arith.addf %8, %13 : vector<512x128xf32>
    %15 = vector.extract_strided_slice %2 {offsets = [0, 0, 2, 0], sizes = [2, 16, 16, 4], strides = [1, 1, 1, 1]} : vector<2x16x18x4xbf16> to vector<2x16x16x4xbf16>
    %16 = vector.shape_cast %15 : vector<2x16x16x4xbf16> to vector<512x4xbf16>
    %c2 = arith.constant 2 : index
    %c0_10 = arith.constant 0 : index
    %c0_11 = arith.constant 0 : index
    %17 = vector.load %arg2[%c2, %c0_10, %c0_11] : memref<9x4x128xbf16, #tpu.memory_space<vmem>>, vector<1x4x128xbf16>
    %18 = vector.shape_cast %17 : vector<1x4x128xbf16> to vector<4x128xbf16>
    %cst_12 = arith.constant dense<0.000000e+00> : vector<512x128xf32>
    %19 = tpu.matmul %16, %18, %cst_12 {dimension_numbers = #tpu.dot_dimension_numbers<[1], [0], [0], [1], [0, 0, 1, 1], [], []>} : vector<512x4xbf16>, vector<4x128xbf16>, vector<512x128xf32> -> vector<512x128xf32>
    %20 = arith.addf %14, %19 : vector<512x128xf32>
    %21 = vector.extract_strided_slice %0 {offsets = [0, 1, 0, 0], sizes = [2, 16, 18, 4], strides = [1, 1, 1, 1]} : vector<2x18x18x4xbf16> to vector<2x16x18x4xbf16>
    %22 = vector.extract_strided_slice %21 {offsets = [0, 0, 0, 0], sizes = [2, 16, 16, 4], strides = [1, 1, 1, 1]} : vector<2x16x18x4xbf16> to vector<2x16x16x4xbf16>
    %23 = vector.shape_cast %22 : vector<2x16x16x4xbf16> to vector<512x4xbf16>
    %c3 = arith.constant 3 : index
    %c0_13 = arith.constant 0 : index
    %c0_14 = arith.constant 0 : index
    %24 = vector.load %arg2[%c3, %c0_13, %c0_14] : memref<9x4x128xbf16, #tpu.memory_space<vmem>>, vector<1x4x128xbf16>
    %25 = vector.shape_cast %24 : vector<1x4x128xbf16> to vector<4x128xbf16>
    %cst_15 = arith.constant dense<0.000000e+00> : vector<512x128xf32>
    %26 = tpu.matmul %23, %25, %cst_15 {dimension_numbers = #tpu.dot_dimension_numbers<[1], [0], [0], [1], [0, 0, 1, 1], [], []>} : vector<512x4xbf16>, vector<4x128xbf16>, vector<512x128xf32> -> vector<512x128xf32>
    %27 = arith.addf %20, %26 : vector<512x128xf32>
    %28 = vector.extract_strided_slice %21 {offsets = [0, 0, 1, 0], sizes = [2, 16, 16, 4], strides = [1, 1, 1, 1]} : vector<2x16x18x4xbf16> to vector<2x16x16x4xbf16>
    %29 = vector.shape_cast %28 : vector<2x16x16x4xbf16> to vector<512x4xbf16>
    %c4 = arith.constant 4 : index
    %c0_16 = arith.constant 0 : index
    %c0_17 = arith.constant 0 : index
    %30 = vector.load %arg2[%c4, %c0_16, %c0_17] : memref<9x4x128xbf16, #tpu.memory_space<vmem>>, vector<1x4x128xbf16>
    %31 = vector.shape_cast %30 : vector<1x4x128xbf16> to vector<4x128xbf16>
    %cst_18 = arith.constant dense<0.000000e+00> : vector<512x128xf32>
    %32 = tpu.matmul %29, %31, %cst_18 {dimension_numbers = #tpu.dot_dimension_numbers<[1], [0], [0], [1], [0, 0, 1, 1], [], []>} : vector<512x4xbf16>, vector<4x128xbf16>, vector<512x128xf32> -> vector<512x128xf32>
    %33 = arith.addf %27, %32 : vector<512x128xf32>
    %34 = vector.extract_strided_slice %21 {offsets = [0, 0, 2, 0], sizes = [2, 16, 16, 4], strides = [1, 1, 1, 1]} : vector<2x16x18x4xbf16> to vector<2x16x16x4xbf16>
    %35 = vector.shape_cast %34 : vector<2x16x16x4xbf16> to vector<512x4xbf16>
    %c5 = arith.constant 5 : index
    %c0_19 = arith.constant 0 : index
    %c0_20 = arith.constant 0 : index
    %36 = vector.load %arg2[%c5, %c0_19, %c0_20] : memref<9x4x128xbf16, #tpu.memory_space<vmem>>, vector<1x4x128xbf16>
    %37 = vector.shape_cast %36 : vector<1x4x128xbf16> to vector<4x128xbf16>
    %cst_21 = arith.constant dense<0.000000e+00> : vector<512x128xf32>
    %38 = tpu.matmul %35, %37, %cst_21 {dimension_numbers = #tpu.dot_dimension_numbers<[1], [0], [0], [1], [0, 0, 1, 1], [], []>} : vector<512x4xbf16>, vector<4x128xbf16>, vector<512x128xf32> -> vector<512x128xf32>
    %39 = arith.addf %33, %38 : vector<512x128xf32>
    %40 = vector.extract_strided_slice %0 {offsets = [0, 2, 0, 0], sizes = [2, 16, 18, 4], strides = [1, 1, 1, 1]} : vector<2x18x18x4xbf16> to vector<2x16x18x4xbf16>
    %41 = vector.extract_strided_slice %40 {offsets = [0, 0, 0, 0], sizes = [2, 16, 16, 4], strides = [1, 1, 1, 1]} : vector<2x16x18x4xbf16> to vector<2x16x16x4xbf16>
    %42 = vector.shape_cast %41 : vector<2x16x16x4xbf16> to vector<512x4xbf16>
    %c6 = arith.constant 6 : index
    %c0_22 = arith.constant 0 : index
    %c0_23 = arith.constant 0 : index
    %43 = vector.load %arg2[%c6, %c0_22, %c0_23] : memref<9x4x128xbf16, #tpu.memory_space<vmem>>, vector<1x4x128xbf16>
    %44 = vector.shape_cast %43 : vector<1x4x128xbf16> to vector<4x128xbf16>
    %cst_24 = arith.constant dense<0.000000e+00> : vector<512x128xf32>
    %45 = tpu.matmul %42, %44, %cst_24 {dimension_numbers = #tpu.dot_dimension_numbers<[1], [0], [0], [1], [0, 0, 1, 1], [], []>} : vector<512x4xbf16>, vector<4x128xbf16>, vector<512x128xf32> -> vector<512x128xf32>
    %46 = arith.addf %39, %45 : vector<512x128xf32>
    %47 = vector.extract_strided_slice %40 {offsets = [0, 0, 1, 0], sizes = [2, 16, 16, 4], strides = [1, 1, 1, 1]} : vector<2x16x18x4xbf16> to vector<2x16x16x4xbf16>
    %48 = vector.shape_cast %47 : vector<2x16x16x4xbf16> to vector<512x4xbf16>
    %c7 = arith.constant 7 : index
    %c0_25 = arith.constant 0 : index
    %c0_26 = arith.constant 0 : index
    %49 = vector.load %arg2[%c7, %c0_25, %c0_26] : memref<9x4x128xbf16, #tpu.memory_space<vmem>>, vector<1x4x128xbf16>
    %50 = vector.shape_cast %49 : vector<1x4x128xbf16> to vector<4x128xbf16>
    %cst_27 = arith.constant dense<0.000000e+00> : vector<512x128xf32>
    %51 = tpu.matmul %48, %50, %cst_27 {dimension_numbers = #tpu.dot_dimension_numbers<[1], [0], [0], [1], [0, 0, 1, 1], [], []>} : vector<512x4xbf16>, vector<4x128xbf16>, vector<512x128xf32> -> vector<512x128xf32>
    %52 = arith.addf %46, %51 : vector<512x128xf32>
    %53 = vector.extract_strided_slice %40 {offsets = [0, 0, 2, 0], sizes = [2, 16, 16, 4], strides = [1, 1, 1, 1]} : vector<2x16x18x4xbf16> to vector<2x16x16x4xbf16>
    %54 = vector.shape_cast %53 : vector<2x16x16x4xbf16> to vector<512x4xbf16>
    %c8 = arith.constant 8 : index
    %c0_28 = arith.constant 0 : index
    %c0_29 = arith.constant 0 : index
    %55 = vector.load %arg2[%c8, %c0_28, %c0_29] : memref<9x4x128xbf16, #tpu.memory_space<vmem>>, vector<1x4x128xbf16>
    %56 = vector.shape_cast %55 : vector<1x4x128xbf16> to vector<4x128xbf16>
    %cst_30 = arith.constant dense<0.000000e+00> : vector<512x128xf32>
    %57 = tpu.matmul %54, %56, %cst_30 {dimension_numbers = #tpu.dot_dimension_numbers<[1], [0], [0], [1], [0, 0, 1, 1], [], []>} : vector<512x4xbf16>, vector<4x128xbf16>, vector<512x128xf32> -> vector<512x128xf32>
    %58 = arith.addf %52, %57 : vector<512x128xf32>
    %c0_31 = arith.constant 0 : index
    %c0_32 = arith.constant 0 : index
    %59 = vector.load %arg3[%c0_31, %c0_32] : memref<1x128xf32, #tpu.memory_space<vmem>>, vector<1x128xf32>
    %60 = vector.broadcast %59 : vector<1x128xf32> to vector<512x128xf32>
    %61 = arith.addf %58, %60 : vector<512x128xf32>
    %cst_33 = arith.constant 0.000000e+00 : f32
    %62 = vector.broadcast %cst_33 : f32 to vector<512x128xf32>
    %63 = arith.maximumf %61, %62 : vector<512x128xf32>
    %64 = vector.shape_cast %63 : vector<512x128xf32> to vector<32x16x128xf32>
    %c0_34 = arith.constant 0 : index
    %c0_35 = arith.constant 0 : index
    %65 = vector.load %arg4[%c0_34, %c0_35] : memref<1x128xf32, #tpu.memory_space<vmem>>, vector<1x128xf32>
    %66 = vector.shape_cast %65 : vector<1x128xf32> to vector<1x1x128xf32>
    %67 = vector.broadcast %66 : vector<1x1x128xf32> to vector<32x16x128xf32>
    %68 = arith.mulf %64, %67 : vector<32x16x128xf32>
    %cst_36 = arith.constant dense<0.000000e+00> : vector<32x16xf32>
    %69 = vector.multi_reduction <add>, %68, %cst_36 [2] : vector<32x16x128xf32> to vector<32x16xf32>
    %c0_37 = arith.constant 0 : index
    %c0_38 = arith.constant 0 : index
    %70 = memref.load %arg5[%c0_37, %c0_38] : memref<1x1xf32, #tpu.memory_space<smem>>
    %71 = vector.broadcast %70 : f32 to vector<32x16xf32>
    %72 = arith.addf %69, %71 : vector<32x16xf32>
    %cst_39 = arith.constant 0.000000e+00 : f32
    %73 = vector.broadcast %cst_39 : f32 to vector<32x16xf32>
    %74 = arith.maximumf %72, %73 : vector<32x16xf32>
    %75 = vector.shape_cast %74 : vector<32x16xf32> to vector<2x16x16xf32>
    %c0_40 = arith.constant 0 : index
    %c0_41 = arith.constant 0 : index
    %76 = vector.load %arg6[%c0_40, %c0_41] : memref<32x16xf32, #tpu.memory_space<vmem>>, vector<32x16xf32>
    %77 = vector.extract_strided_slice %75 {offsets = [0, 0, 0], sizes = [1, 16, 16], strides = [1, 1, 1]} : vector<2x16x16xf32> to vector<1x16x16xf32>
    %78 = vector.shape_cast %77 : vector<1x16x16xf32> to vector<16x16xf32>
    %cst_42 = arith.constant dense<0.000000e+00> : vector<32x16xf32>
    %79 = tpu.matmul %76, %78, %cst_42 {dimension_numbers = #tpu.dot_dimension_numbers<[1], [0], [0], [1], [0, 0, 1, 1], [], []>} : vector<32x16xf32>, vector<16x16xf32>, vector<32x16xf32> -> vector<32x16xf32>
    %c0_43 = arith.constant 0 : index
    %c0_44 = arith.constant 0 : index
    %80 = vector.load %arg6[%c0_43, %c0_44] : memref<32x16xf32, #tpu.memory_space<vmem>>, vector<32x16xf32>
    %81 = vector.extract_strided_slice %75 {offsets = [1, 0, 0], sizes = [1, 16, 16], strides = [1, 1, 1]} : vector<2x16x16xf32> to vector<1x16x16xf32>
    %82 = vector.shape_cast %81 : vector<1x16x16xf32> to vector<16x16xf32>
    %cst_45 = arith.constant dense<0.000000e+00> : vector<32x16xf32>
    %83 = tpu.matmul %80, %82, %cst_45 {dimension_numbers = #tpu.dot_dimension_numbers<[1], [0], [0], [1], [0, 0, 1, 1], [], []>} : vector<32x16xf32>, vector<16x16xf32>, vector<32x16xf32> -> vector<32x16xf32>
    %84 = tpu.concatenate %79, %83 in 0 : vector<32x16xf32>, vector<32x16xf32> -> vector<64x16xf32>
    %c0_46 = arith.constant 0 : index
    %c0_47 = arith.constant 0 : index
    %85 = vector.load %arg7[%c0_46, %c0_47] : memref<16x32xf32, #tpu.memory_space<vmem>>, vector<16x32xf32>
    %cst_48 = arith.constant dense<0.000000e+00> : vector<64x32xf32>
    %86 = tpu.matmul %84, %85, %cst_48 {dimension_numbers = #tpu.dot_dimension_numbers<[1], [0], [0], [1], [0, 0, 1, 1], [], []>} : vector<64x16xf32>, vector<16x32xf32>, vector<64x32xf32> -> vector<64x32xf32>
    %87 = vector.shape_cast %86 : vector<64x32xf32> to vector<2x32x32xf32>
    %c0_49 = arith.constant 0 : index
    %c0_50 = arith.constant 0 : index
    %c0_51 = arith.constant 0 : index
    %88 = vector.load %arg8[%c0_49, %c0_50, %c0_51] : memref<2x32x32xf32, #tpu.memory_space<vmem>>, vector<2x32x32xf32>
    tpu.vector_store %arg8[%c0_49, %c0_50, %c0_51], %87 {strides = array<i32>} : memref<2x32x32xf32, #tpu.memory_space<vmem>>, vector<2x32x32xf32>,
    return
  }
  func.func @transform_0(%arg0: i32) -> (i32, i32, i32, i32) {
    %c0_i32 = arith.constant 0 : i32
    %c0_i32_0 = arith.constant 0 : i32
    %c0_i32_1 = arith.constant 0 : i32
    %c0_i32_2 = arith.constant 0 : i32
    return %arg0, %c0_i32, %c0_i32_0, %c0_i32_1 : i32, i32, i32, i32
  }
  func.func @transform_1(%arg0: i32) -> (i32, i32, i32) {
    %c0_i32 = arith.constant 0 : i32
    %c0_i32_0 = arith.constant 0 : i32
    %c0_i32_1 = arith.constant 0 : i32
    %c0_i32_2 = arith.constant 0 : i32
    return %c0_i32, %c0_i32_0, %c0_i32_1 : i32, i32, i32
  }
  func.func @transform_2(%arg0: i32) -> (i32, i32) {
    %c0_i32 = arith.constant 0 : i32
    %c0_i32_0 = arith.constant 0 : i32
    %c0_i32_1 = arith.constant 0 : i32
    return %c0_i32, %c0_i32_0 : i32, i32
  }
  func.func @transform_3(%arg0: i32) -> (i32, i32) {
    %c0_i32 = arith.constant 0 : i32
    %c0_i32_0 = arith.constant 0 : i32
    %c0_i32_1 = arith.constant 0 : i32
    return %c0_i32, %c0_i32_0 : i32, i32
  }
  func.func @transform_4(%arg0: i32) -> (i32, i32) {
    %c0_i32 = arith.constant 0 : i32
    %c0_i32_0 = arith.constant 0 : i32
    %c0_i32_1 = arith.constant 0 : i32
    return %c0_i32, %c0_i32_0 : i32, i32
  }
  func.func @transform_5(%arg0: i32) -> (i32, i32) {
    %c0_i32 = arith.constant 0 : i32
    %c0_i32_0 = arith.constant 0 : i32
    %c0_i32_1 = arith.constant 0 : i32
    return %c0_i32, %c0_i32_0 : i32, i32
  }
  func.func @transform_6(%arg0: i32) -> (i32, i32) {
    %c0_i32 = arith.constant 0 : i32
    %c0_i32_0 = arith.constant 0 : i32
    %c0_i32_1 = arith.constant 0 : i32
    return %c0_i32, %c0_i32_0 : i32, i32
  }
  func.func @transform_7(%arg0: i32) -> (i32, i32, i32) {
    %c0_i32 = arith.constant 0 : i32
    %c0_i32_0 = arith.constant 0 : i32
    %c0_i32_1 = arith.constant 0 : i32
    return %arg0, %c0_i32, %c0_i32_0 : i32, i32, i32
  }
}

</mosaic_0001>

<bundles_post_ra>
// kernel: tpu_custom_call.1
= control target key start
LH: loop header
LB: loop body
LE: loop exit
PB: predicated region body
PF: predicated region fallthrough
CT: control target
= control target key end

     0   :  { %vm1104_vm0 = vcmask 1041408   ;;  %vm138_vm1 = vsmask.f32 3328  ;;  %vm139_vm2 = vsmask.f32 7440  ;;  %vm1007_vm4 = vcmask 31744   ;;  %s8354_s0 = inlined_call_operand.vmem [shape: bf16[2,18,18,4], index: 0, kind: input, shape index: {}]   ;;  %s8355_s1 = inlined_call_operand.vmem [shape: bf16[9,4,128], index: 1, kind: input, shape index: {}]   ;;  %s8356_s2 = inlined_call_operand.vmem [shape: f32[1,128], index: 2, kind: input, shape index: {}]   ;;  %s8357_s3 = inlined_call_operand.vmem [shape: f32[1,128], index: 3, kind: input, shape index: {}]   ;;  %s8358_s4 = inlined_call_operand.<no memory space> [shape: f32[1,1], index: 4, kind: input, shape index: {}]   ;;  %s8359_s5 = inlined_call_operand.vmem [shape: f32[32,16], index: 5, kind: input, shape index: {}]   ;;  %s8360_s6 = inlined_call_operand.vmem [shape: f32[16,32], index: 6, kind: input, shape index: {}]   ;;  %s8361_s7 = inlined_call_operand.hbm [shape: f32[2,32,32], index: 7, kind: output, shape index: {}]  }
   0x1   :  { %v4860_v0 = vld [vmem:[%s8355_s1 + $0x2] sm:$0x3]  ;;  %v30_v3 = vld [vmem:[%s8354_s0 + $0x4] sm:$0xf]  ;;  %v31_v4 = vld [vmem:[%s8354_s0 + $0x8] sm:$0x1] }
   0x2   :  { %v29_v1 = vld [vmem:[%s8354_s0] sm:$0xf]  ;;  %v1106_v2 = vsel %vm1104_vm0, %v4860_v0, 0  ;;  %v151_v7 = vshll.u32 %v30_v3, 16  ;;  %v155_v9 = vshrl.u32 %v30_v3, 16  ;;  %v161_v10 = vshll.u32 %v31_v4, 16  ;;  %vm5613_vm3 = vmor %vm138_vm1, %vm139_vm2 }
   0x3   :  { %v142_v5 = vshrl.u32 %v29_v1, 16  ;;  %1115 = vmatpush.bf16.msra.mxu0 %v1106_v2  ;;  %5388 = vmatpush.bf16.msra.mxu1 %v1106_v2  ;;  %v145_v6 = vshll.u32 %v29_v1, 16  ;;  %v59_v11 = vld [vmem:[%s8354_s0 + $0x78] sm:$0xf]  ;;  %v60_v14 = vld [vmem:[%s8354_s0 + $0x7c] sm:$0xf] }
   0x4   :  { %5389 = vmatpush.bf16.msra.mxu2 %v1106_v2  ;;  %5390 = vmatpush.bf16.msra.mxu3 %v1106_v2  ;;  %v153_v13 = vrot.slane %v151_v7, 5  ;;  %v61_v15 = vld [vmem:[%s8354_s0 + $0x80] sm:$0x1]  ;;  %v157_v16 = vrot.slane %v155_v9, 4  ;;  %v382_v17 = vshrl.u32 %v59_v11, 16  ;;  %v385_v18 = vshll.u32 %v59_v11, 16 }
   0x5   :  { %v144_v8 = vrot.slane %v142_v5, 4  ;;  %v147_v12 = vrot.slane %v145_v6, 5  ;;  %v391_v20 = vshll.u32 %v60_v14, 16  ;;  %v395_v21 = vshrl.u32 %v60_v14, 16  ;;  %v89_v23 = vld [vmem:[%s8354_s0 + $0xf0] sm:$0xf] }
   0x6   :  { %v401_v22 = vshll.u32 %v61_v15, 16  ;;  %v158_v25 = vor.u32 %v157_v16, %v153_v13  ;;  %v163_v26 = vrot.slane %v161_v10, 5  ;;  %v384_v27 = vrot.slane %v382_v17, 4  ;;  %v90_v29 = vld [vmem:[%s8354_s0 + $0xf4] sm:$0xf] }
   0x7   :  { %v148_v19 = vor.u32 %v147_v12, %v144_v8  ;;  %v387_v28 = vrot.slane %v385_v18, 5  ;;  %v393_v31 = vrot.slane %v391_v20, 5  ;;  %v397_v32 = vrot.slane %v395_v21, 4  ;;  %v91_v40 = vld [vmem:[%s8354_s0 + $0xf8] sm:$0x1] }
   0x8   :  { %v403_v33 = vrot.slane %v401_v22, 5  ;;  %v159_v34 = vrot.slane %v158_v25, 4  ;;  %v574_v36 = vshrl.u32 %v89_v23, 16  ;;  %v577_v37 = vshll.u32 %v89_v23, 16  ;;  %v32_v51 = vld [vmem:[%s8354_s0 + $0xc] sm:$0xf] }
   0x9   :  { %v149_v30 = vrot.slane %v148_v19, 4  ;;  %v388_v35 = vor.u32 %v387_v28, %v384_v27  ;;  %v398_v39 = vor.u32 %v397_v32, %v393_v31  ;;  %v583_v41 = vshll.u32 %v90_v29, 16  ;;  %v33_v55 = vld [vmem:[%s8354_s0 + $0x10] sm:$0xf]  ;;  %v34_v60 = vld [vmem:[%s8354_s0 + $0x14] sm:$0x1] }
   0xa   :  { %v587_v42 = vshrl.u32 %v90_v29, 16  ;;  %v164_v43 = vsel %vm5613_vm3, %v159_v34, %v163_v26  ;;  %v576_v46 = vrot.slane %v574_v36, 4  ;;  %v579_v49 = vrot.slane %v577_v37, 5  ;;  %v62_v5 = vld [vmem:[%s8354_s0 + $0x84] sm:$0xf] }
   0xb   :  { %v154_v38 = vsel %vm5613_vm3, %v149_v30, %v153_v13  ;;  %v389_v45 = vrot.slane %v388_v35, 4  ;;  %v912_v47 = vunpack.c.l.b16 %v164_v43  ;;  %v399_v48 = vrot.slane %v398_v39, 4  ;;  %v63_v10 = vld [vmem:[%s8354_s0 + $0x88] sm:$0xf]  ;;  %v64_v15 = vld [vmem:[%s8354_s0 + $0x8c] sm:$0x1] }
   0xc   :  { %v911_v44 = vunpack.c.l.b16 %v154_v38  ;;  %v585_v50 = vrot.slane %v583_v41, 5  ;;  %v589_v53 = vrot.slane %v587_v42, 4  ;;  %v593_v54 = vshll.u32 %v91_v40, 16  ;;  %v92_v25 = vld [vmem:[%s8354_s0 + $0xfc] sm:$0xf] }
   0xd   :  { %v394_v52 = vsel %vm5613_vm3, %v389_v45, %v393_v31  ;;  %v404_v57 = vsel %vm5613_vm3, %v399_v48, %v403_v33  ;;  %v580_v59 = vor.u32 %v579_v49, %v576_v46  ;;  %v166_v0 = vshrl.u32 %v32_v51, 16  ;;  %v93_v30 = vld [vmem:[%s8354_s0 + $0x100] sm:$0xf]  ;;  %v94_v41 = vld [vmem:[%s8354_s0 + $0x104] sm:$0x1] }
   0xe   :  { %v975_v56 = vpack.c.b16 %v912_v47, %v911_v44  ;;  %v931_v58 = vunpack.c.l.b16 %v394_v52  ;;  %v932_v61 = vunpack.c.l.b16 %v404_v57  ;;  %v590_v62 = vor.u32 %v589_v53, %v585_v50 }
   0xf   :  { %v595_v63 = vrot.slane %v593_v54, 5  ;;  %v581_v1 = vrot.slane %v580_v59, 4  ;;  %v169_v2 = vshll.u32 %v32_v51, 16  ;;  %v175_v3 = vshll.u32 %v33_v55, 16 }
  0x10   :  { %4861 = vmatmul.msk.bf16.vlgmr.msra.gmra.mxu0 %vm1007_vm4, %v975_v56  ;;  %v179_v4 = vshrl.u32 %v33_v55, 16  ;;  %v5644_v6 = vpack.c.b16 %v932_v61, %v931_v58  ;;  %v591_v7 = vrot.slane %v590_v62, 4  ;;  %v168_v8 = vrot.slane %v166_v0, 4 }
  0x11   :  { %v185_v9 = vshll.u32 %v34_v60, 16  ;;  %v586_v11 = vsel %vm5613_vm3, %v581_v1, %v585_v50  ;;  %v171_v12 = vrot.slane %v169_v2, 5  ;;  %v177_v13 = vrot.slane %v175_v3, 5 }
  0x12   :  { %v181_v14 = vrot.slane %v179_v4, 4  ;;  %4871 = vmatmul.msk.bf16.vlgmr.msra.gmra.mxu1 %vm1007_vm4, %v5644_v6  ;;  %v596_v16 = vsel %vm5613_vm3, %v591_v7, %v595_v63  ;;  %v947_v17 = vunpack.c.l.b16 %v586_v11  ;;  %v406_v19 = vshrl.u32 %v62_v5, 16 }
  0x13   :  { %v187_v18 = vrot.slane %v185_v9, 5  ;;  %v948_v20 = vunpack.c.l.b16 %v596_v16  ;;  %v172_v21 = vor.u32 %v171_v12, %v168_v8  ;;  %v409_v23 = vshll.u32 %v62_v5, 16 }
  0x14   :  { %v182_v22 = vor.u32 %v181_v14, %v177_v13  ;;  %v408_v26 = vrot.slane %v406_v19, 4  ;;  %v415_v27 = vshll.u32 %v63_v10, 16  ;;  %v419_v28 = vshrl.u32 %v63_v10, 16 }
  0x15   :  { %v425_v29 = vshll.u32 %v64_v15, 16  ;;  %v5664_v31 = vpack.c.b16 %v948_v20, %v947_v17  ;;  %v173_v32 = vrot.slane %v172_v21, 4  ;;  %v411_v34 = vrot.slane %v409_v23, 5 }
  0x16   :  { %v183_v33 = vrot.slane %v182_v22, 4  ;;  %v417_v35 = vrot.slane %v415_v27, 5  ;;  %v421_v36 = vrot.slane %v419_v28, 4  ;;  %v598_v42 = vshrl.u32 %v92_v25, 16 }
  0x17   :  { %v427_v37 = vrot.slane %v425_v29, 5  ;;  %4879 = vmatmul.msk.bf16.vlgmr.msra.gmra.mxu2 %vm1007_vm4, %v5664_v31  ;;  %v178_v38 = vsel %vm5613_vm3, %v173_v32, %v177_v13  ;;  %v412_v40 = vor.u32 %v411_v34, %v408_v26 }
  0x18   :  { %v188_v39 = vsel %vm5613_vm3, %v183_v33, %v187_v18 }
  0x19   :  { %13 = vsyncpa [#allocation4], 0  ;;  %v913_v43 = vunpack.c.l.b16 %v178_v38  ;;  %v914_v44 = vunpack.c.l.b16 %v188_v39  ;;  %v422_v45 = vor.u32 %v421_v36, %v417_v35  ;;  %v601_v46 = vshll.u32 %v92_v25, 16  ;;  %v35_v54 = vld [vmem:[%s8354_s0 + $0x18] sm:$0xf]  ;;  %s4848_s29 = sshll.u32 %s8361_s7, 4  ;;  %s4849_s29 = int_to_ptr.hbm [resolvable:$true] %s4848_s29 }
  0x1a   :  { %v413_v47 = vrot.slane %v412_v40, 4  ;;  %v600_v48 = vrot.slane %v598_v42, 4  ;;  %v607_v49 = vshll.u32 %v93_v30, 16  ;;  %v611_v50 = vshrl.u32 %v93_v30, 16  ;;  %v36_v59 = vld [vmem:[%s8354_s0 + $0x1c] sm:$0xf] }
  0x1b   :  { %v423_v51 = vrot.slane %v422_v45, 4  ;;  %v603_v52 = vrot.slane %v601_v46, 5  ;;  %v617_v53 = vshll.u32 %v94_v41, 16  ;;  %v5678_v55 = vpack.c.b16 %v914_v44, %v913_v43  ;;  %v37_v60 = vld [vmem:[%s8354_s0 + $0x20] sm:$0x1]  ;;  %s5544_s30 = smov 128  }
  0x1c   :  { %v418_v56 = vsel %vm5613_vm3, %v413_v47, %v417_v35  ;;  %v609_v57 = vrot.slane %v607_v49, 5  ;;  %v613_v58 = vrot.slane %v611_v50, 4  ;;  %v190_v3 = vshrl.u32 %v35_v54, 16  ;;  %v65_v10 = vld [vmem:[%s8354_s0 + $0x90] sm:$0xf]  ;;  %s5545_s8 = smov 8  }
  0x1d   :  { %v428_v61 = vsel %vm5613_vm3, %v423_v51, %v427_v37  ;;  %v933_v62 = vunpack.c.l.b16 %v418_v56  ;;  %v604_v63 = vor.u32 %v603_v52, %v600_v48  ;;  %v619_v0 = vrot.slane %v617_v53, 5  ;;  %v66_v15 = vld [vmem:[%s8354_s0 + $0x94] sm:$0xf]  ;;  %v67_v20 = vld [vmem:[%s8354_s0 + $0x98] sm:$0x1] }
  0x1e   :  { %v934_v1 = vunpack.c.l.b16 %v428_v61  ;;  %v614_v2 = vor.u32 %v613_v58, %v609_v57  ;;  %v193_v4 = vshll.u32 %v35_v54, 16  ;;  %v199_v7 = vshll.u32 %v36_v59, 16  ;;  %v95_v35 = vld [vmem:[%s8354_s0 + $0x108] sm:$0xf]  ;;  %v96_v40 = vld [vmem:[%s8354_s0 + $0x10c] sm:$0xf] }
  0x1f   :  { %v605_v5 = vrot.slane %v604_v63, 4  ;;  %v203_v8 = vshrl.u32 %v36_v59, 16  ;;  %v209_v9 = vshll.u32 %v37_v60, 16  ;;  %v192_v13 = vrot.slane %v190_v3, 4  ;;  %v97_v44 = vld [vmem:[%s8354_s0 + $0x110] sm:$0x1] }
  0x20   :  { %4862 = vmatmul.msk.bf16.gmra.mxu0 %vm1007_vm4, %v5678_v55  ;;  %v5695_v11 = vpack.c.b16 %v934_v1, %v933_v62  ;;  %v615_v12 = vrot.slane %v614_v2, 4  ;;  %v195_v14 = vrot.slane %v193_v4, 5  ;;  %v201_v17 = vrot.slane %v199_v7, 5  ;;  %v113_v58 = vld [vmem:[%s8354_s0 + $0x150] sm:$0xf] }
  0x21   :  { %v610_v16 = vsel %vm5613_vm3, %v605_v5, %v609_v57  ;;  %v205_v18 = vrot.slane %v203_v8, 4  ;;  %v211_v19 = vrot.slane %v209_v9, 5  ;;  %v430_v25 = vshrl.u32 %v65_v10, 16  ;;  %v114_v62 = vld [vmem:[%s8354_s0 + $0x154] sm:$0xf] }
  0x22   :  { %v620_v21 = vsel %vm5613_vm3, %v615_v12, %v619_v0  ;;  %v949_v22 = vunpack.c.l.b16 %v610_v16  ;;  %v196_v23 = vor.u32 %v195_v14, %v192_v13  ;;  %4872 = vmatmul.msk.bf16.gmra.mxu1 %vm1007_vm4, %v5695_v11  ;;  %v433_v28 = vshll.u32 %v65_v10, 16  ;;  %v115_v3 = vld [vmem:[%s8354_s0 + $0x158] sm:$0x1] }
  0x23   :  { %v950_v26 = vunpack.c.l.b16 %v620_v21  ;;  %v206_v27 = vor.u32 %v205_v18, %v201_v17  ;;  %v439_v29 = vshll.u32 %v66_v15, 16  ;;  %v432_v32 = vrot.slane %v430_v25, 4  ;;  %v38_v18 = vld [vmem:[%s8354_s0 + $0x24] sm:$0xf] }
  0x24   :  { %v197_v30 = vrot.slane %v196_v23, 4  ;;  %v443_v33 = vshrl.u32 %v66_v15, 16  ;;  %v449_v34 = vshll.u32 %v67_v20, 16  ;;  %v435_v38 = vrot.slane %v433_v28, 5  ;;  %v39_v23 = vld [vmem:[%s8354_s0 + $0x28] sm:$0xf] }
  0x25   :  { %v5712_v36 = vpack.c.b16 %v950_v26, %v949_v22  ;;  %v207_v37 = vrot.slane %v206_v27, 4  ;;  %v441_v39 = vrot.slane %v439_v29, 5  ;;  %v622_v48 = vshrl.u32 %v95_v35, 16  ;;  %v40_v28 = vld [vmem:[%s8354_s0 + $0x2c] sm:$0x1] }
  0x26   :  { %v202_v41 = vsel %vm5613_vm3, %v197_v30, %v201_v17  ;;  %v445_v42 = vrot.slane %v443_v33, 4  ;;  %v451_v43 = vrot.slane %v449_v34, 5  ;;  %v436_v47 = vor.u32 %v435_v38, %v432_v32 }
  0x27   :  { %v212_v45 = vsel %vm5613_vm3, %v207_v37, %v211_v19  ;;  %v915_v46 = vunpack.c.l.b16 %v202_v41  ;;  %4880 = vmatmul.msk.bf16.gmra.mxu2 %vm1007_vm4, %v5712_v36  ;;  %v625_v51 = vshll.u32 %v95_v35, 16  ;;  %v631_v52 = vshll.u32 %v96_v40, 16 }
  0x28   :  { %v916_v49 = vunpack.c.l.b16 %v212_v45  ;;  %v446_v50 = vor.u32 %v445_v42, %v441_v39  ;;  %v437_v53 = vrot.slane %v436_v47, 4  ;;  %v624_v54 = vrot.slane %v622_v48, 4  ;;  %v69_v48 = vld [vmem:[%s8354_s0 + $0xa0] sm:$0xf] }
  0x29   :  { %v635_v56 = vshrl.u32 %v96_v40, 16  ;;  %v641_v57 = vshll.u32 %v97_v44, 16  ;;  %v627_v60 = vrot.slane %v625_v51, 5  ;;  %v633_v61 = vrot.slane %v631_v52, 5  ;;  %v70_v52 = vld [vmem:[%s8354_s0 + $0xa4] sm:$0x1] }
  0x2a   :  { %v447_v59 = vrot.slane %v446_v50, 4  ;;  %v5732_v63 = vpack.c.b16 %v916_v49, %v915_v46  ;;  %v442_v0 = vsel %vm5613_vm3, %v437_v53, %v441_v39  ;;  %v766_v8 = vshrl.u32 %v113_v58, 16  ;;  %v68_v39 = vld [vmem:[%s8354_s0 + $0x9c] sm:$0xf] }
  0x2b   :  { %v637_v1 = vrot.slane %v635_v56, 4  ;;  %v643_v2 = vrot.slane %v641_v57, 5  ;;  %v935_v5 = vunpack.c.l.b16 %v442_v0  ;;  %v628_v7 = vor.u32 %v627_v60, %v624_v54 }
  0x2c   :  { %8434 = vst [vmem:[#allocation6_spill] sm:$0xff] %v5732_v63  ;;  %v452_v4 = vsel %vm5613_vm3, %v447_v59, %v451_v43  ;;  %v769_v12 = vshll.u32 %v113_v58, 16  ;;  %v775_v13 = vshll.u32 %v114_v62, 16  ;;  %v768_v15 = vrot.slane %v766_v8, 4 }
  0x2d   :  { %v936_v9 = vunpack.c.l.b16 %v452_v4  ;;  %v638_v10 = vor.u32 %v637_v1, %v633_v61  ;;  %v629_v14 = vrot.slane %v628_v7, 4  ;;  %v779_v16 = vshrl.u32 %v114_v62, 16  ;;  %v98_v4 = vld [vmem:[%s8354_s0 + $0x114] sm:$0xf] }
  0x2e   :  { %v785_v17 = vshll.u32 %v115_v3, 16  ;;  %v771_v21 = vrot.slane %v769_v12, 5  ;;  %v777_v22 = vrot.slane %v775_v13, 5  ;;  %v214_v33 = vshrl.u32 %v38_v18, 16 }
  0x2f   :  { %v5744_v19 = vpack.c.b16 %v936_v9, %v935_v5  ;;  %v639_v20 = vrot.slane %v638_v10, 4  ;;  %v634_v25 = vsel %vm5613_vm3, %v629_v14, %v633_v61  ;;  %v781_v26 = vrot.slane %v779_v16, 4  ;;  %v99_v9 = vld [vmem:[%s8354_s0 + $0x118] sm:$0xf] }
  0x30   :  { %4863 = vmatmul.msk.bf16.gmra.mxu0 %vm1007_vm4, %v5732_v63  ;;  %v787_v27 = vrot.slane %v785_v17, 5  ;;  %v951_v30 = vunpack.c.l.b16 %v634_v25  ;;  %v772_v32 = vor.u32 %v771_v21, %v768_v15  ;;  %v217_v37 = vshll.u32 %v38_v18, 16  ;;  %v100_v15 = vld [vmem:[%s8354_s0 + $0x11c] sm:$0x1] }
  0x31   :  { %v644_v29 = vsel %vm5613_vm3, %v639_v20, %v643_v2  ;;  %v782_v35 = vor.u32 %v781_v26, %v777_v22  ;;  %v223_v38 = vshll.u32 %v39_v23, 16  ;;  %v216_v41 = vrot.slane %v214_v33, 4 }
  0x32   :  { %v952_v34 = vunpack.c.l.b16 %v644_v29  ;;  %4873 = vmatmul.msk.bf16.gmra.mxu1 %vm1007_vm4, %v5744_v19  ;;  %v773_v40 = vrot.slane %v772_v32, 4  ;;  %v227_v42 = vshrl.u32 %v39_v23, 16  ;;  %v233_v43 = vshll.u32 %v40_v28, 16 }
  0x33   :  { %v783_v45 = vrot.slane %v782_v35, 4  ;;  %v219_v46 = vrot.slane %v217_v37, 5  ;;  %v225_v47 = vrot.slane %v223_v38, 5  ;;  %v454_v53 = vshrl.u32 %v68_v39, 16  ;;  %v117_v37 = vld [vmem:[%s8354_s0 + $0x160] sm:$0xf] }
  0x34   :  { %v5763_v44 = vpack.c.b16 %v952_v34, %v951_v30  ;;  %v778_v49 = vsel %vm5613_vm3, %v773_v40, %v777_v22  ;;  %v229_v50 = vrot.slane %v227_v42, 4  ;;  %v235_v51 = vrot.slane %v233_v43, 5  ;;  %v116_v30 = vld [vmem:[%s8354_s0 + $0x15c] sm:$0xf] }
  0x35   :  { %v788_v54 = vsel %vm5613_vm3, %v783_v45, %v787_v27  ;;  %v963_v56 = vunpack.c.l.b16 %v778_v49  ;;  %v220_v57 = vor.u32 %v219_v46, %v216_v41  ;;  %v457_v58 = vshll.u32 %v68_v39, 16  ;;  %v118_v41 = vld [vmem:[%s8354_s0 + $0x164] sm:$0x1] }
  0x36   :  { %v964_v59 = vunpack.c.l.b16 %v788_v54  ;;  %v230_v60 = vor.u32 %v229_v50, %v225_v47  ;;  %v456_v61 = vrot.slane %v454_v53, 4  ;;  %v463_v62 = vshll.u32 %v69_v48, 16 }
  0x37   :  { %4881 = vmatmul.msk.bf16.gmra.mxu2 %vm1007_vm4, %v5763_v44  ;;  %v221_v0 = vrot.slane %v220_v57, 4  ;;  %v459_v1 = vrot.slane %v457_v58, 5  ;;  %v467_v2 = vshrl.u32 %v69_v48, 16  ;;  %v473_v3 = vshll.u32 %v70_v52, 16 }
  0x38   :  { %v5780_v5 = vpack.c.b16 %v964_v59, %v963_v56  ;;  %v231_v7 = vrot.slane %v230_v60, 4  ;;  %v465_v8 = vrot.slane %v463_v62, 5  ;;  %v646_v18 = vshrl.u32 %v98_v4, 16  ;;  %v41_v56 = vld [vmem:[%s8354_s0 + $0x30] sm:$0xf] }
  0x39   :  { %v226_v10 = vsel %vm5613_vm3, %v221_v0, %v225_v47  ;;  %v460_v12 = vor.u32 %v459_v1, %v456_v61  ;;  %v469_v13 = vrot.slane %v467_v2, 4  ;;  %v475_v14 = vrot.slane %v473_v3, 5  ;;  %v42_v61 = vld [vmem:[%s8354_s0 + $0x34] sm:$0xf]  ;;  %v43_v2 = vld [vmem:[%s8354_s0 + $0x38] sm:$0x1] }
  0x3a   :  { %8435 = vst [vmem:[#allocation7_spill] sm:$0xff] %v5780_v5  ;;  %4887 = vmatmul.msk.bf16.vlgmr.msra.gmra.mxu3 %vm1007_vm4, %v5780_v5  ;;  %v236_v16 = vsel %vm5613_vm3, %v231_v7, %v235_v51  ;;  %v917_v17 = vunpack.c.l.b16 %v226_v10  ;;  %v649_v20 = vshll.u32 %v98_v4, 16  ;;  %v655_v25 = vshll.u32 %v99_v9, 16 }
  0x3b   :  { %v918_v21 = vunpack.c.l.b16 %v236_v16  ;;  %v461_v22 = vrot.slane %v460_v12, 4  ;;  %v470_v23 = vor.u32 %v469_v13, %v465_v8  ;;  %v648_v26 = vrot.slane %v646_v18, 4  ;;  %v71_v18 = vld [vmem:[%s8354_s0 + $0xa8] sm:$0xf] }
  0x3c   :  { %v651_v27 = vrot.slane %v649_v20, 5  ;;  %v659_v28 = vshrl.u32 %v99_v9, 16  ;;  %v665_v29 = vshll.u32 %v100_v15, 16  ;;  %v657_v35 = vrot.slane %v655_v25, 5  ;;  %v72_v25 = vld [vmem:[%s8354_s0 + $0xac] sm:$0xf] }
  0x3d   :  { %v5797_v32 = vpack.c.b16 %v918_v21, %v917_v17  ;;  %v466_v33 = vsel %vm5613_vm3, %v461_v22, %v465_v8  ;;  %v471_v34 = vrot.slane %v470_v23, 4  ;;  %v790_v45 = vshrl.u32 %v116_v30, 16 }
  0x3e   :  { %v937_v38 = vunpack.c.l.b16 %v466_v33  ;;  %v652_v39 = vor.u32 %v651_v27, %v648_v26  ;;  %v661_v40 = vrot.slane %v659_v28, 4  ;;  %v667_v43 = vrot.slane %v665_v29, 5  ;;  %v73_v29 = vld [vmem:[%s8354_s0 + $0xb0] sm:$0x1] }
  0x3f   :  { %8436 = vst [vmem:[#allocation8_spill] sm:$0xff] %v5797_v32  ;;  %v476_v42 = vsel %vm5613_vm3, %v471_v34, %v475_v14  ;;  %v793_v46 = vshll.u32 %v116_v30, 16  ;;  %v799_v50 = vshll.u32 %v117_v37, 16  ;;  %v792_v51 = vrot.slane %v790_v45, 4 }
  0x40   :  { %4864 = vmatmul.msk.bf16.gmra.mxu0 %vm1007_vm4, %v5797_v32  ;;  %v938_v47 = vunpack.c.l.b16 %v476_v42  ;;  %v653_v48 = vrot.slane %v652_v39, 4  ;;  %v662_v49 = vor.u32 %v661_v40, %v657_v35  ;;  %v803_v53 = vshrl.u32 %v117_v37, 16 }
  0x41   :  { %v795_v52 = vrot.slane %v793_v46, 5  ;;  %v809_v54 = vshll.u32 %v118_v41, 16  ;;  %v801_v60 = vrot.slane %v799_v50, 5  ;;  %v238_v7 = vshrl.u32 %v41_v56, 16  ;;  %v101_v46 = vld [vmem:[%s8354_s0 + $0x120] sm:$0xf] }
  0x42   :  { %v5814_v57 = vpack.c.b16 %v938_v47, %v937_v38  ;;  %v658_v58 = vsel %vm5613_vm3, %v653_v48, %v657_v35  ;;  %v663_v59 = vrot.slane %v662_v49, 4  ;;  %v805_v1 = vrot.slane %v803_v53, 4 }
  0x43   :  { %v953_v62 = vunpack.c.l.b16 %v658_v58  ;;  %v796_v0 = vor.u32 %v795_v52, %v792_v51  ;;  %v811_v4 = vrot.slane %v809_v54, 5  ;;  %v241_v8 = vshll.u32 %v41_v56, 16  ;;  %v102_v51 = vld [vmem:[%s8354_s0 + $0x124] sm:$0xf]  ;;  %v103_v56 = vld [vmem:[%s8354_s0 + $0x128] sm:$0x1] }
  0x44   :  { %4874 = vmatmul.msk.bf16.gmra.mxu1 %vm1007_vm4, %v5814_v57  ;;  %v668_v3 = vsel %vm5613_vm3, %v663_v59, %v667_v43  ;;  %v806_v12 = vor.u32 %v805_v1, %v801_v60  ;;  %v247_v13 = vshll.u32 %v42_v61, 16  ;;  %v240_v14 = vrot.slane %v238_v7, 4 }
  0x45   :  { %v954_v9 = vunpack.c.l.b16 %v668_v3  ;;  %v797_v10 = vrot.slane %v796_v0, 4  ;;  %v243_v15 = vrot.slane %v241_v8, 5  ;;  %v251_v16 = vshrl.u32 %v42_v61, 16 }
  0x46   :  { %v257_v17 = vshll.u32 %v43_v2, 16  ;;  %v807_v22 = vrot.slane %v806_v12, 4  ;;  %v249_v23 = vrot.slane %v247_v13, 5  ;;  %v478_v34 = vshrl.u32 %v71_v18, 16 }
  0x47   :  { %v5831_v20 = vpack.c.b16 %v954_v9, %v953_v62  ;;  %v802_v21 = vsel %vm5613_vm3, %v797_v10, %v801_v60  ;;  %v244_v27 = vor.u32 %v243_v15, %v240_v14  ;;  %v253_v28 = vrot.slane %v251_v16, 4  ;;  %v119_v9 = vld [vmem:[%s8354_s0 + $0x168] sm:$0xf]  ;;  %v120_v15 = vld [vmem:[%s8354_s0 + $0x16c] sm:$0xf] }
  0x48   :  { %v965_v26 = vunpack.c.l.b16 %v802_v21  ;;  %v812_v30 = vsel %vm5613_vm3, %v807_v22, %v811_v4  ;;  %v259_v33 = vrot.slane %v257_v17, 5  ;;  %v481_v35 = vshll.u32 %v71_v18, 16  ;;  %v121_v21 = vld [vmem:[%s8354_s0 + $0x170] sm:$0x1] }
  0x49   :  { %8437 = vst [vmem:[#allocation9_spill] sm:$0xff] %v5831_v20  ;;  %4882 = vmatmul.msk.bf16.gmra.mxu2 %vm1007_vm4, %v5831_v20  ;;  %v966_v37 = vunpack.c.l.b16 %v812_v30  ;;  %v245_v38 = vrot.slane %v244_v27, 4  ;;  %v254_v39 = vor.u32 %v253_v28, %v249_v23  ;;  %v487_v40 = vshll.u32 %v72_v25, 16 }
  0x4a   :  { %v480_v41 = vrot.slane %v478_v34, 4  ;;  %v483_v42 = vrot.slane %v481_v35, 5  ;;  %v491_v43 = vshrl.u32 %v72_v25, 16  ;;  %v497_v45 = vshll.u32 %v73_v29, 16 }
  0x4b   :  { %v5848_v47 = vpack.c.b16 %v966_v37, %v965_v26  ;;  %v250_v48 = vsel %vm5613_vm3, %v245_v38, %v249_v23  ;;  %v255_v49 = vrot.slane %v254_v39, 4  ;;  %v489_v50 = vrot.slane %v487_v40, 5  ;;  %v5882_v38 = vld [vmem:[%s8354_s0 + $0x3c] sm:$0xf] }
  0x4c   :  { %v919_v52 = vunpack.c.l.b16 %v250_v48  ;;  %v484_v53 = vor.u32 %v483_v42, %v480_v41  ;;  %v493_v54 = vrot.slane %v491_v43, 4  ;;  %v499_v59 = vrot.slane %v497_v45, 5  ;;  %v5891_v43 = vld [vmem:[%s8354_s0 + $0x40] sm:$0xf] }
  0x4d   :  { %8438 = vst [vmem:[#allocation10_spill] sm:$0xff] %v5848_v47  ;;  %4888 = vmatmul.msk.bf16.gmra.mxu3 %vm1007_vm4, %v5848_v47  ;;  %v260_v58 = vsel %vm5613_vm3, %v255_v49, %v259_v33  ;;  %v670_v60 = vshrl.u32 %v101_v46, 16  ;;  %v673_v61 = vshll.u32 %v101_v46, 16  ;;  %v679_v2 = vshll.u32 %v102_v51, 16  ;;  %v5896_v49 = vld [vmem:[%s8354_s0 + $0x44] sm:$0x1] }
  0x4e   :  { %v920_v62 = vunpack.c.l.b16 %v260_v58  ;;  %v485_v0 = vrot.slane %v484_v53, 4  ;;  %v494_v1 = vor.u32 %v493_v54, %v489_v50  ;;  %v683_v7 = vshrl.u32 %v102_v51, 16 }
  0x4f   :  { %v672_v3 = vrot.slane %v670_v60, 4  ;;  %v675_v4 = vrot.slane %v673_v61, 5  ;;  %v689_v8 = vshll.u32 %v103_v56, 16  ;;  %v681_v14 = vrot.slane %v679_v2, 5 }
  0x50   :  { %v5865_v10 = vpack.c.b16 %v920_v62, %v919_v52  ;;  %v490_v12 = vsel %vm5613_vm3, %v485_v0, %v489_v50  ;;  %v495_v13 = vrot.slane %v494_v1, 4  ;;  %v685_v18 = vrot.slane %v683_v7, 4  ;;  %v74_v1 = vld [vmem:[%s8354_s0 + $0xb4] sm:$0xf] }
  0x51   :  { %v939_v16 = vunpack.c.l.b16 %v490_v12  ;;  %v676_v17 = vor.u32 %v675_v4, %v672_v3  ;;  %v691_v23 = vrot.slane %v689_v8, 5  ;;  %v814_v25 = vshrl.u32 %v119_v9, 16  ;;  %v75_v8 = vld [vmem:[%s8354_s0 + $0xb8] sm:$0xf] }
  0x52   :  { %8439 = vst [vmem:[#allocation11_spill] sm:$0xff] %v5865_v10  ;;  %4865 = vmatmul.msk.bf16.gmra.mxu0 %vm1007_vm4, %v5865_v10  ;;  %v500_v22 = vsel %vm5613_vm3, %v495_v13, %v499_v59  ;;  %v817_v26 = vshll.u32 %v119_v9, 16  ;;  %v686_v29 = vor.u32 %v685_v18, %v681_v14  ;;  %v823_v30 = vshll.u32 %v120_v15, 16 }
  0x53   :  { %v940_v27 = vunpack.c.l.b16 %v500_v22  ;;  %v677_v28 = vrot.slane %v676_v17, 4  ;;  %v816_v33 = vrot.slane %v814_v25, 4  ;;  %v827_v35 = vshrl.u32 %v120_v15, 16 }
  0x54   :  { %v819_v34 = vrot.slane %v817_v26, 5  ;;  %v833_v37 = vshll.u32 %v121_v21, 16  ;;  %v687_v41 = vrot.slane %v686_v29, 4  ;;  %v825_v42 = vrot.slane %v823_v30, 5  ;;  %v104_v30 = vld [vmem:[%s8354_s0 + $0x12c] sm:$0xf] }
  0x55   :  { %v5884_v39 = vpack.c.b16 %v940_v27, %v939_v16  ;;  %v682_v40 = vsel %vm5613_vm3, %v677_v28, %v681_v14  ;;  %v829_v48 = vrot.slane %v827_v35, 4  ;;  %v262_v52 = vshrl.u32 %v5882_v38, 16  ;;  %v76_v14 = vld [vmem:[%s8354_s0 + $0xbc] sm:$0x1] }
  0x56   :  { %v955_v45 = vunpack.c.l.b16 %v682_v40  ;;  %v820_v46 = vor.u32 %v819_v34, %v816_v33  ;;  %v692_v50 = vsel %vm5613_vm3, %v687_v41, %v691_v23  ;;  %v835_v51 = vrot.slane %v833_v37, 5  ;;  %v105_v40 = vld [vmem:[%s8354_s0 + $0x130] sm:$0xf] }
  0x57   :  { %8440 = vst [vmem:[#allocation12_spill] sm:$0xff] %v5884_v39  ;;  %4875 = vmatmul.msk.bf16.gmra.mxu1 %vm1007_vm4, %v5884_v39  ;;  %v265_v53 = vshll.u32 %v5882_v38, 16  ;;  %v956_v54 = vunpack.c.l.b16 %v692_v50  ;;  %v830_v58 = vor.u32 %v829_v48, %v825_v42  ;;  %v271_v59 = vshll.u32 %v5891_v43, 16 }
  0x58   :  { %v821_v56 = vrot.slane %v820_v46, 4  ;;  %v264_v60 = vrot.slane %v262_v52, 4  ;;  %v275_v62 = vshrl.u32 %v5891_v43, 16  ;;  %v281_v0 = vshll.u32 %v5896_v49, 16  ;;  %v106_v46 = vld [vmem:[%s8354_s0 + $0x134] sm:$0x1] }
  0x59   :  { %v267_v61 = vrot.slane %v265_v53, 5  ;;  %v5910_v2 = vpack.c.b16 %v956_v54, %v955_v45  ;;  %v831_v4 = vrot.slane %v830_v58, 4  ;;  %v273_v7 = vrot.slane %v271_v59, 5 }
  0x5a   :  { %v826_v3 = vsel %vm5613_vm3, %v821_v56, %v825_v42  ;;  %v277_v13 = vrot.slane %v275_v62, 4  ;;  %v283_v16 = vrot.slane %v281_v0, 5  ;;  %v502_v17 = vshrl.u32 %v74_v1, 16  ;;  %v122_v0 = vld [vmem:[%s8354_s0 + $0x174] sm:$0xf] }
  0x5b   :  { %8441 = vst [vmem:[#allocation13_spill] sm:$0xff] %v5910_v2  ;;  %v967_v9 = vunpack.c.l.b16 %v826_v3  ;;  %v268_v12 = vor.u32 %v267_v61, %v264_v60  ;;  %4883 = vmatmul.msk.bf16.gmra.mxu2 %vm1007_vm4, %v5910_v2  ;;  %v836_v15 = vsel %vm5613_vm3, %v831_v4, %v835_v51  ;;  %v505_v18 = vshll.u32 %v74_v1, 16 }
  0x5c   :  { %v968_v21 = vunpack.c.l.b16 %v836_v15  ;;  %v278_v23 = vor.u32 %v277_v13, %v273_v7  ;;  %v511_v25 = vshll.u32 %v75_v8, 16  ;;  %v504_v26 = vrot.slane %v502_v17, 4 }
  0x5d   :  { %v269_v22 = vrot.slane %v268_v12, 4  ;;  %v507_v27 = vrot.slane %v505_v18, 5  ;;  %v515_v28 = vshrl.u32 %v75_v8, 16  ;;  %v521_v29 = vshll.u32 %v76_v14, 16  ;;  %v123_v8 = vld [vmem:[%s8354_s0 + $0x178] sm:$0xf] }
  0x5e   :  { %v5927_v33 = vpack.c.b16 %v968_v21, %v967_v9  ;;  %v279_v35 = vrot.slane %v278_v23, 4  ;;  %v513_v37 = vrot.slane %v511_v25, 5  ;;  %v694_v51 = vshrl.u32 %v104_v30, 16  ;;  %v124_v14 = vld [vmem:[%s8354_s0 + $0x17c] sm:$0x1] }
  0x5f   :  { %v274_v34 = vsel %vm5613_vm3, %v269_v22, %v273_v7  ;;  %v508_v42 = vor.u32 %v507_v27, %v504_v26  ;;  %v517_v45 = vrot.slane %v515_v28, 4  ;;  %v523_v50 = vrot.slane %v521_v29, 5 }
  0x60   :  { %8442 = vst [vmem:[#allocation14_spill] sm:$0xff] %v5927_v33  ;;  %v921_v41 = vunpack.c.l.b16 %v274_v34  ;;  %4889 = vmatmul.msk.bf16.gmra.mxu3 %vm1007_vm4, %v5927_v33  ;;  %v284_v48 = vsel %vm5613_vm3, %v279_v35, %v283_v16  ;;  %v697_v52 = vshll.u32 %v104_v30, 16  ;;  %v703_v58 = vshll.u32 %v105_v40, 16  ;;  %v5961_v30 = vld [vmem:[%s8354_s0 + $0x48] sm:$0xf] }
  0x61   :  { %v922_v53 = vunpack.c.l.b16 %v284_v48  ;;  %v509_v54 = vrot.slane %v508_v42, 4  ;;  %v518_v56 = vor.u32 %v517_v45, %v513_v37  ;;  %v696_v59 = vrot.slane %v694_v51, 4  ;;  %v5975_v48 = vld [vmem:[%s8354_s0 + $0x50] sm:$0x1] }
  0x62   :  { %v699_v60 = vrot.slane %v697_v52, 5  ;;  %v707_v61 = vshrl.u32 %v105_v40, 16  ;;  %v713_v62 = vshll.u32 %v106_v46, 16  ;;  %v705_v7 = vrot.slane %v703_v58, 5 }
  0x63   :  { %v5944_v1 = vpack.c.b16 %v922_v53, %v921_v41  ;;  %v514_v3 = vsel %vm5613_vm3, %v509_v54, %v513_v37  ;;  %v519_v4 = vrot.slane %v518_v56, 4  ;;  %v838_v17 = vshrl.u32 %v122_v0, 16  ;;  %v5970_v41 = vld [vmem:[%s8354_s0 + $0x4c] sm:$0xf] }
  0x64   :  { %v941_v9 = vunpack.c.l.b16 %v514_v3  ;;  %v700_v12 = vor.u32 %v699_v60, %v696_v59  ;;  %v709_v13 = vrot.slane %v707_v61, 4  ;;  %v715_v16 = vrot.slane %v713_v62, 5  ;;  %v83_v3 = vld [vmem:[%s8354_s0 + $0xd8] sm:$0xf] }
  0x65   :  { %8443 = vst [vmem:[#allocation15_spill] sm:$0xff] %v5944_v1  ;;  %4866 = vmatmul.msk.bf16.gmra.mxu0 %vm1007_vm4, %v5944_v1  ;;  %v524_v15 = vsel %vm5613_vm3, %v519_v4, %v523_v50  ;;  %v841_v18 = vshll.u32 %v122_v0, 16  ;;  %v847_v25 = vshll.u32 %v123_v8, 16  ;;  %v840_v26 = vrot.slane %v838_v17, 4 }
  0x66   :  { %v942_v21 = vunpack.c.l.b16 %v524_v15  ;;  %v701_v22 = vrot.slane %v700_v12, 4  ;;  %v710_v23 = vor.u32 %v709_v13, %v705_v7  ;;  %v851_v28 = vshrl.u32 %v123_v8, 16  ;;  %v84_v12 = vld [vmem:[%s8354_s0 + $0xdc] sm:$0xf] }
  0x67   :  { %v843_v27 = vrot.slane %v841_v18, 5  ;;  %v857_v29 = vshll.u32 %v124_v14, 16  ;;  %v849_v40 = vrot.slane %v847_v25, 5  ;;  %v286_v52 = vshrl.u32 %v5961_v30, 16 }
  0x68   :  { %v5963_v34 = vpack.c.b16 %v942_v21, %v941_v9  ;;  %v706_v35 = vsel %vm5613_vm3, %v701_v22, %v705_v7  ;;  %v711_v37 = vrot.slane %v710_v23, 4  ;;  %v853_v46 = vrot.slane %v851_v28, 4 }
  0x69   :  { %v957_v42 = vunpack.c.l.b16 %v706_v35  ;;  %v844_v45 = vor.u32 %v843_v27, %v840_v26  ;;  %v859_v51 = vrot.slane %v857_v29, 5  ;;  %v289_v53 = vshll.u32 %v5961_v30, 16 }
  0x6a   :  { %4876 = vmatmul.msk.bf16.gmra.mxu1 %vm1007_vm4, %v5963_v34  ;;  %v716_v50 = vsel %vm5613_vm3, %v711_v37, %v715_v16  ;;  %v854_v58 = vor.u32 %v853_v46, %v849_v40  ;;  %v295_v59 = vshll.u32 %v5970_v41, 16  ;;  %v288_v60 = vrot.slane %v286_v52, 4  ;;  %v85_v16 = vld [vmem:[%s8354_s0 + $0xe0] sm:$0x1] }
  0x6b   :  { %v958_v54 = vunpack.c.l.b16 %v716_v50  ;;  %v845_v56 = vrot.slane %v844_v45, 4  ;;  %v291_v61 = vrot.slane %v289_v53, 5  ;;  %v299_v62 = vshrl.u32 %v5970_v41, 16 }
  0x6c   :  { %v305_v0 = vshll.u32 %v5975_v48, 16  ;;  %v855_v8 = vrot.slane %v854_v58, 4  ;;  %v297_v9 = vrot.slane %v295_v59, 5  ;;  %v526_v21 = vshrl.u32 %v83_v3, 16 }
  0x6d   :  { %v5989_v4 = vpack.c.b16 %v958_v54, %v957_v42  ;;  %v850_v7 = vsel %vm5613_vm3, %v845_v56, %v849_v40  ;;  %v292_v14 = vor.u32 %v291_v61, %v288_v60  ;;  %v301_v15 = vrot.slane %v299_v62, 4  ;;  %v107_v40 = vld [vmem:[%s8354_s0 + $0x138] sm:$0xf]  ;;  %v109_v56 = vld [vmem:[%s8354_s0 + $0x140] sm:$0x1] }
  0x6e   :  { %v969_v13 = vunpack.c.l.b16 %v850_v7  ;;  %v860_v17 = vsel %vm5613_vm3, %v855_v8, %v859_v51  ;;  %v307_v18 = vrot.slane %v305_v0, 5  ;;  %v529_v22 = vshll.u32 %v83_v3, 16  ;;  %v108_v51 = vld [vmem:[%s8354_s0 + $0x13c] sm:$0xf] }
  0x6f   :  { %8444 = vst [vmem:[#allocation16_spill] sm:$0xff] %v5989_v4  ;;  %4884 = vmatmul.msk.bf16.gmra.mxu2 %vm1007_vm4, %v5989_v4  ;;  %v970_v23 = vunpack.c.l.b16 %v860_v17  ;;  %v293_v25 = vrot.slane %v292_v14, 4  ;;  %v302_v26 = vor.u32 %v301_v15, %v297_v9  ;;  %v535_v27 = vshll.u32 %v84_v12, 16  ;;  %v125_v14 = vld [vmem:[%s8354_s0 + $0x180] sm:$0xf] }
  0x70   :  { %v528_v28 = vrot.slane %v526_v21, 4  ;;  %v531_v29 = vrot.slane %v529_v22, 5  ;;  %v539_v35 = vshrl.u32 %v84_v12, 16  ;;  %v545_v37 = vshll.u32 %v85_v16, 16  ;;  %v126_v21 = vld [vmem:[%s8354_s0 + $0x184] sm:$0xf] }
  0x71   :  { %v6006_v42 = vpack.c.b16 %v970_v23, %v969_v13  ;;  %v298_v45 = vsel %vm5613_vm3, %v293_v25, %v297_v9  ;;  %v303_v46 = vrot.slane %v302_v26, 4  ;;  %v537_v50 = vrot.slane %v535_v27, 5  ;;  %v127_v26 = vld [vmem:[%s8354_s0 + $0x188] sm:$0x1] }
  0x72   :  { %v923_v52 = vunpack.c.l.b16 %v298_v45  ;;  %v532_v53 = vor.u32 %v531_v29, %v528_v28  ;;  %v541_v54 = vrot.slane %v539_v35, 4  ;;  %v547_v59 = vrot.slane %v545_v37, 5 }
  0x73   :  { %8445 = vst [vmem:[#allocation17_spill] sm:$0xff] %v6006_v42  ;;  %4890 = vmatmul.msk.bf16.gmra.mxu3 %vm1007_vm4, %v6006_v42  ;;  %v308_v58 = vsel %vm5613_vm3, %v303_v46, %v307_v18  ;;  %v718_v60 = vshrl.u32 %v107_v40, 16  ;;  %v721_v61 = vshll.u32 %v107_v40, 16  ;;  %v727_v7 = vshll.u32 %v108_v51, 16 }
  0x74   :  { %v924_v62 = vunpack.c.l.b16 %v308_v58  ;;  %v533_v0 = vrot.slane %v532_v53, 4  ;;  %v542_v3 = vor.u32 %v541_v54, %v537_v50  ;;  %v731_v12 = vshrl.u32 %v108_v51, 16  ;;  %v6040_v54 = vld [vmem:[%s8354_s0 + $0x54] sm:$0xf] }
  0x75   :  { %v720_v8 = vrot.slane %v718_v60, 4  ;;  %v723_v9 = vrot.slane %v721_v61, 5  ;;  %v737_v13 = vshll.u32 %v109_v56, 16  ;;  %v729_v18 = vrot.slane %v727_v7, 5  ;;  %v6047_v61 = vld [vmem:[%s8354_s0 + $0x58] sm:$0xf] }
  0x76   :  { %v6023_v15 = vpack.c.b16 %v924_v62, %v923_v52  ;;  %v538_v16 = vsel %vm5613_vm3, %v533_v0, %v537_v50  ;;  %v543_v17 = vrot.slane %v542_v3, 4  ;;  %v733_v25 = vrot.slane %v731_v12, 4  ;;  %v6052_v7 = vld [vmem:[%s8354_s0 + $0x5c] sm:$0x1] }
  0x77   :  { %v943_v22 = vunpack.c.l.b16 %v538_v16  ;;  %v724_v23 = vor.u32 %v723_v9, %v720_v8  ;;  %v739_v28 = vrot.slane %v737_v13, 5  ;;  %v862_v29 = vshrl.u32 %v125_v14, 16 }
  0x78   :  { %8446 = vst [vmem:[#allocation18_spill] sm:$0xff] %v6023_v15  ;;  %4867 = vmatmul.msk.bf16.gmra.mxu0 %vm1007_vm4, %v6023_v15  ;;  %v548_v27 = vsel %vm5613_vm3, %v543_v17, %v547_v59  ;;  %v865_v35 = vshll.u32 %v125_v14, 16  ;;  %v734_v45 = vor.u32 %v733_v25, %v729_v18  ;;  %v871_v46 = vshll.u32 %v126_v21, 16 }
  0x79   :  { %v944_v37 = vunpack.c.l.b16 %v548_v27  ;;  %v725_v40 = vrot.slane %v724_v23, 4  ;;  %v864_v50 = vrot.slane %v862_v29, 4  ;;  %v875_v52 = vshrl.u32 %v126_v21, 16 }
  0x7a   :  { %v867_v51 = vrot.slane %v865_v35, 5  ;;  %v881_v53 = vshll.u32 %v127_v26, 16  ;;  %v735_v59 = vrot.slane %v734_v45, 4  ;;  %v873_v60 = vrot.slane %v871_v46, 5  ;;  %v86_v26 = vld [vmem:[%s8354_s0 + $0xe4] sm:$0xf] }
  0x7b   :  { %v991_v56 = vpack.c.b16 %v944_v37, %v943_v22  ;;  %v730_v58 = vsel %vm5613_vm3, %v725_v40, %v729_v18  ;;  %v877_v3 = vrot.slane %v875_v52, 4  ;;  %v310_v12 = vshrl.u32 %v6040_v54, 16  ;;  %v87_v37 = vld [vmem:[%s8354_s0 + $0xe8] sm:$0xf] }
  0x7c   :  { %v959_v62 = vunpack.c.l.b16 %v730_v58  ;;  %v868_v0 = vor.u32 %v867_v51, %v864_v50  ;;  %v740_v8 = vsel %vm5613_vm3, %v735_v59, %v739_v28  ;;  %v883_v9 = vrot.slane %v881_v53, 5  ;;  %v88_v50 = vld [vmem:[%s8354_s0 + $0xec] sm:$0x1] }
  0x7d   :  { %4877 = vmatmul.msk.bf16.gmra.mxu1 %vm1007_vm4, %v991_v56  ;;  %v313_v13 = vshll.u32 %v6040_v54, 16  ;;  %v960_v14 = vunpack.c.l.b16 %v740_v8  ;;  %v878_v17 = vor.u32 %v877_v3, %v873_v60  ;;  %v319_v18 = vshll.u32 %v6047_v61, 16 }
  0x7e   :  { %v869_v16 = vrot.slane %v868_v0, 4  ;;  %v312_v21 = vrot.slane %v310_v12, 4  ;;  %v323_v23 = vshrl.u32 %v6047_v61, 16  ;;  %v329_v25 = vshll.u32 %v6052_v7, 16 }
  0x7f   :  { %v315_v22 = vrot.slane %v313_v13, 5  ;;  %v6065_v27 = vpack.c.b16 %v960_v14, %v959_v62  ;;  %v879_v29 = vrot.slane %v878_v17, 4  ;;  %v321_v35 = vrot.slane %v319_v18, 5  ;;  %v110_v13 = vld [vmem:[%s8354_s0 + $0x144] sm:$0xf] }
  0x80   :  { %v874_v28 = vsel %vm5613_vm3, %v869_v16, %v873_v60  ;;  %v325_v46 = vrot.slane %v323_v23, 4  ;;  %v331_v52 = vrot.slane %v329_v25, 5  ;;  %v550_v53 = vshrl.u32 %v86_v26, 16  ;;  %v111_v18 = vld [vmem:[%s8354_s0 + $0x148] sm:$0xf] }
  0x81   :  { %8447 = vst [vmem:[#allocation19_spill] sm:$0xff] %v6065_v27  ;;  %v971_v40 = vunpack.c.l.b16 %v874_v28  ;;  %v316_v45 = vor.u32 %v315_v22, %v312_v21  ;;  %4885 = vmatmul.msk.bf16.gmra.mxu2 %vm1007_vm4, %v6065_v27  ;;  %v884_v51 = vsel %vm5613_vm3, %v879_v29, %v883_v9  ;;  %v553_v56 = vshll.u32 %v86_v26, 16  ;;  %v112_v25 = vld [vmem:[%s8354_s0 + $0x14c] sm:$0x1] }
  0x82   :  { %v972_v58 = vunpack.c.l.b16 %v884_v51  ;;  %v326_v60 = vor.u32 %v325_v46, %v321_v35  ;;  %v559_v62 = vshll.u32 %v87_v37, 16  ;;  %v552_v0 = vrot.slane %v550_v53, 4 }
  0x83   :  { %v317_v59 = vrot.slane %v316_v45, 4  ;;  %v555_v3 = vrot.slane %v553_v56, 5  ;;  %v563_v8 = vshrl.u32 %v87_v37, 16  ;;  %v569_v12 = vshll.u32 %v88_v50, 16 }
  0x84   :  { %v6082_v14 = vpack.c.b16 %v972_v58, %v971_v40  ;;  %v327_v16 = vrot.slane %v326_v60, 4  ;;  %v561_v17 = vrot.slane %v559_v62, 5  ;;  %v742_v29 = vshrl.u32 %v110_v13, 16  ;;  %v128_v58 = vld [vmem:[%s8354_s0 + $0x18c] sm:$0xf] }
  0x85   :  { %v322_v9 = vsel %vm5613_vm3, %v317_v59, %v321_v35  ;;  %v556_v22 = vor.u32 %v555_v3, %v552_v0  ;;  %v565_v23 = vrot.slane %v563_v8, 4  ;;  %v571_v28 = vrot.slane %v569_v12, 5  ;;  %v129_v3 = vld [vmem:[%s8354_s0 + $0x190] sm:$0xf] }
  0x86   :  { %8448 = vst [vmem:[#allocation20_spill] sm:$0xff] %v6082_v14  ;;  %v925_v21 = vunpack.c.l.b16 %v322_v9  ;;  %4891 = vmatmul.msk.bf16.gmra.mxu3 %vm1007_vm4, %v6082_v14  ;;  %v332_v26 = vsel %vm5613_vm3, %v327_v16, %v331_v52  ;;  %v745_v35 = vshll.u32 %v110_v13, 16  ;;  %v751_v46 = vshll.u32 %v111_v18, 16  ;;  %v130_v9 = vld [vmem:[%s8354_s0 + $0x194] sm:$0x1] }
  0x87   :  { %v926_v37 = vunpack.c.l.b16 %v332_v26  ;;  %v557_v40 = vrot.slane %v556_v22, 4  ;;  %v566_v45 = vor.u32 %v565_v23, %v561_v17  ;;  %v744_v50 = vrot.slane %v742_v29, 4 }
  0x88   :  { %v747_v51 = vrot.slane %v745_v35, 5  ;;  %v755_v53 = vshrl.u32 %v111_v18, 16  ;;  %v761_v56 = vshll.u32 %v112_v25, 16  ;;  %v753_v0 = vrot.slane %v751_v46, 5  ;;  %v137_v35 = vld [vmem:[%s8355_s1] sm:$0x3] }
  0x89   :  { %v6101_v60 = vpack.c.b16 %v926_v37, %v925_v21  ;;  %v562_v52 = vsel %vm5613_vm3, %v557_v40, %v561_v17  ;;  %v567_v62 = vrot.slane %v566_v45, 4  ;;  %v886_v18 = vshrl.u32 %v128_v58, 16 }
  0x8a   :  { %v945_v8 = vunpack.c.l.b16 %v562_v52  ;;  %v748_v12 = vor.u32 %v747_v51, %v744_v50  ;;  %v757_v13 = vrot.slane %v755_v53, 4  ;;  %v763_v17 = vrot.slane %v761_v56, 5 }
  0x8b   :  { %8449 = vst [vmem:[#allocation21_spill] sm:$0xff] %v6101_v60  ;;  %4868 = vmatmul.msk.bf16.gmra.mxu0 %vm1007_vm4, %v6101_v60  ;;  %v572_v16 = vsel %vm5613_vm3, %v567_v62, %v571_v28  ;;  %v889_v21 = vshll.u32 %v128_v58, 16  ;;  %v895_v29 = vshll.u32 %v129_v3, 16  ;;  %v888_v37 = vrot.slane %v886_v18, 4  ;;  %v5085_v28 = vld [vmem:[%s8355_s1 + $0x4] sm:$0x3] }
  0x8c   :  { %v946_v23 = vunpack.c.l.b16 %v572_v16  ;;  %v749_v25 = vrot.slane %v748_v12, 4  ;;  %v758_v26 = vor.u32 %v757_v13, %v753_v0  ;;  %v899_v45 = vshrl.u32 %v129_v3, 16  ;;  %v5118_v58 = vld [vmem:[%s8355_s1 + $0x6] sm:$0x3]  ;;  %v6133_v3 = vld [vmem:[%s8354_s0 + $0x60] sm:$0xf] }
  0x8d   :  { %v6099_v59 = vpop.f32.mrf.mxu0  ;;  %v891_v40 = vrot.slane %v889_v21, 5  ;;  %v905_v46 = vshll.u32 %v130_v9, 16  ;;  %v897_v56 = vrot.slane %v895_v29, 5  ;;  %v1534_v9 = vsel %vm1104_vm0, %v137_v35, 0  ;;  %v6149_v18 = vld [vmem:[%s8354_s0 + $0x68] sm:$0x1] }
  0x8e   :  { %v6123_v50 = vpack.c.b16 %v946_v23, %v945_v8  ;;  %v754_v51 = vsel %vm5613_vm3, %v749_v25, %v753_v0  ;;  %v759_v53 = vrot.slane %v758_v26, 4  ;;  %v901_v12 = vrot.slane %v899_v45, 4  ;;  %v6138_v8 = vld [vmem:[%s8354_s0 + $0x64] sm:$0xf]  ;;  %1543 = vmatpush.bf16.msrb.mxu1 %v1534_v9  ;;  %v6168_v9 = vld [vmem:[%s8354_s0 + $0x6c] sm:$0xf] }
  0x8f   :  { %v6115_v22 = vpop.f32.mrf.mxu1  ;;  %v961_v52 = vunpack.c.l.b16 %v754_v51  ;;  %v892_v62 = vor.u32 %v891_v40, %v888_v37  ;;  %v907_v13 = vrot.slane %v905_v46, 5  ;;  %v2159_v16 = vsel %vm1104_vm0, %v5085_v28, 0 }
  0x90   :  { %4878 = vmatmul.msk.bf16.gmra.mxu1 %vm1007_vm4, %v6123_v50  ;;  %v764_v0 = vsel %vm5613_vm3, %v759_v53, %v763_v17  ;;  %v902_v26 = vor.u32 %v901_v12, %v897_v56  ;;  %2168 = vmatpush.bf16.msrb.mxu2 %v2159_v16  ;;  %v2413_v29 = vsel %vm1104_vm0, %v5118_v58, 0  ;;  %v334_v17 = vshrl.u32 %v6133_v3, 16 }
  0x91   :  { %v962_v23 = vunpack.c.l.b16 %v764_v0  ;;  %v893_v25 = vrot.slane %v892_v62, 4  ;;  %2422 = vmatpush.bf16.msrb.mxu3 %v2413_v29  ;;  %v337_v35 = vshll.u32 %v6133_v3, 16  ;;  %v343_v37 = vshll.u32 %v6138_v8, 16 }
  0x92   :  { %v347_v40 = vshrl.u32 %v6138_v8, 16  ;;  %v903_v28 = vrot.slane %v902_v26, 4  ;;  %v353_v51 = vshll.u32 %v6149_v18, 16  ;;  %v336_v62 = vrot.slane %v334_v17, 4  ;;  %v6180_v26 = vld [vmem:[%s8354_s0 + $0x70] sm:$0xf] }
  0x93   :  { %v6158_v45 = vpack.c.b16 %v962_v23, %v961_v52  ;;  %v898_v46 = vsel %vm5613_vm3, %v893_v25, %v897_v56  ;;  %v339_v12 = vrot.slane %v337_v35, 5  ;;  %v345_v0 = vrot.slane %v343_v37, 5  ;;  %v5396_v52 = vld [vmem:[%s8354_s0 + $0x8] sm:$0x1] }
  0x94   :  { %v973_v58 = vunpack.c.l.b16 %v898_v46  ;;  %v1745_v16 = vrot.slane %v5396_v52, 5  ;;  %v908_v56 = vsel %vm5613_vm3, %v903_v28, %v907_v13  ;;  %v349_v23 = vrot.slane %v347_v40, 4  ;;  %v5397_v13 = vld [vmem:[%s8354_s0] sm:$0xf]  ;;  %v5398_v28 = vld [vmem:[%s8354_s0 + $0x4] sm:$0xf] }
  0x95   :  { %v6151_v21 = vpop.f32.mrf.mxu0  ;;  %8450 = vst [vmem:[#allocation22_spill] sm:$0xff] %v6158_v45  ;;  %4886 = vmatmul.msk.bf16.gmra.mxu2 %vm1007_vm4, %v6158_v45  ;;  %v355_v25 = vrot.slane %v353_v51, 5  ;;  %v974_v29 = vunpack.c.l.b16 %v908_v56  ;;  %v340_v17 = vor.u32 %v339_v12, %v336_v62  ;;  %vm1737_vm5 = vcmask 1042432  }
  0x96   :  { %vm1738_vm6 = vcmask 1046532   ;;  %v350_v37 = vor.u32 %v349_v23, %v345_v0  ;;  %v5053_v40 = vrot.slane %v5397_v13, 9  ;;  %v1742_v51 = vrot.slane %v5398_v28, 5 }
  0x97   :  { %v6163_v53 = vpop.f32.mrf.mxu1  ;;  %vm6184_vm7 = vmor %vm1737_vm5, %vm1738_vm6  ;;  %v358_v62 = vshrl.u32 %v6168_v9, 16  ;;  %v6195_v12 = vpack.c.b16 %v974_v29, %v973_v58  ;;  %v341_v52 = vrot.slane %v340_v17, 4  ;;  %v361_v23 = vshll.u32 %v6168_v9, 16  ;;  %v6210_v29 = vld [vmem:[%s8354_s0 + $0x74] sm:$0x1] }
  0x98   :  { %v367_v14 = vshll.u32 %v6180_v26, 16  ;;  %v351_v42 = vrot.slane %v350_v37, 4  ;;  %v1743_v13 = vsel %vm6184_vm7, %v5053_v40, %v1742_v51  ;;  %v1744_v33 = vrot.slane %v1742_v51, 4 }
  0x99   :  { %8454 = vst [vmem:[#allocation24_spill] sm:$0xff] %v6195_v12  ;;  %v360_v47 = vrot.slane %v358_v62, 4  ;;  %4892 = vmatmul.msk.bf16.gmra.mxu3 %vm1007_vm4, %v6195_v12  ;;  %v346_v58 = vsel %vm5613_vm3, %v341_v52, %v345_v0  ;;  %v363_v17 = vrot.slane %v361_v23, 5  ;;  %v371_v62 = vshrl.u32 %v6180_v26, 16  ;;  %v5352_v0 = vld [vmem:[%s8354_s0] sm:$0xff] }
  0x9a   :  { %v6182_v35 = vpop.f32.mrf.mxu2  ;;  %v369_v28 = vrot.slane %v367_v14, 5  ;;  %v356_v37 = vsel %vm5613_vm3, %v351_v42, %v355_v25  ;;  %v927_v5 = vunpack.c.l.b16 %v346_v58  ;;  %v1746_v40 = vsel %vm6184_vm7, %v1744_v33, %v1745_v16  ;;  %v5159_v42 = vld [vmem:[%s8355_s1 + $0x8] sm:$0x3] }
  0x9b   :  { %8451 = vst [vmem:[#allocation23_spill] sm:$0xff] %v6182_v35  ;;  %v928_v12 = vunpack.c.l.b16 %v356_v37  ;;  %v1966_v52 = vunpack.c.l.b16 %v1743_v13  ;;  %v1967_v35 = vunpack.c.l.b16 %v1746_v40  ;;  %v364_v23 = vor.u32 %v363_v17, %v360_v47 }
  0x9c   :  { %v373_v14 = vrot.slane %v371_v62, 4  ;;  %v377_v45 = vshll.u32 %v6210_v29, 16  ;;  %v2711_v47 = vsel %vm1104_vm0, %v5159_v42, 0  ;;  %v5401_v42 = vld [vmem:[%s8354_s0 + $0x14] sm:$0x1]  ;;  %vm4529_vm8 = vcmask 130112  }
  0x9d   :  { %v6197_v56 = vpop.f32.mrf.mxu0  ;;  %v6226_v33 = vpack.c.b16 %v928_v12, %v927_v5  ;;  %v2030_v58 = vpack.c.b16 %v1967_v35, %v1966_v52  ;;  %v365_v17 = vrot.slane %v364_v23, 4  ;;  %2720 = vmatpush.bf16.msrb.mxu0 %v2711_v47  ;;  %v5399_v5 = vld [vmem:[%s8354_s0 + $0x10] sm:$0xf]  ;;  %v5400_v35 = vld [vmem:[%s8354_s0 + $0xc] sm:$0xf]  ;;  %vm4576_vm9 = vcmask 1041409  }
  0x9e   :  { %v374_v25 = vor.u32 %v373_v14, %v369_v28  ;;  %v379_v40 = vrot.slane %v377_v45, 5  ;;  %v1749_v12 = vrot.slane %v5399_v5, 5  ;;  %v5353_v45 = vld [vmem:[%s8354_s0 + $0xc] sm:$0xff]  ;;  %v5054_v52 = vrot.slane %v5400_v35, 9 }
  0x9f   :  { %v6216_v51 = vpop.f32.mrf.mxu1  ;;  %8455 = vst [vmem:[#allocation25_spill] sm:$0xff] %v6226_v33  ;;  %4869 = vmatmul.msk.bf16.gmra.mxu0 %vm1007_vm4, %v6226_v33  ;;  %vm4578_vm10 = vcmask 1042434   ;;  %vm4580_vm11 = vcmask 1043459   ;;  %vm4582_vm12 = vcmask 1044484   ;;  %vm4584_vm13 = vcmask 1045509  }
  0xa0   :  { %5021 = vmatmul.msk.bf16.vlgmr.msrb.gmra.mxu1 %vm1007_vm4, %v5352_v0  ;;  %v375_v37 = vrot.slane %v374_v25, 4  ;;  %v370_v0 = vsel %vm5613_vm3, %v365_v17, %v369_v28  ;;  %v1751_v23 = vrot.slane %v1749_v12, 4  ;;  %v1752_v25 = vrot.slane %v5401_v42, 5 }
  0xa1   :  { %v929_v28 = vunpack.c.l.b16 %v370_v0  ;;  %vm4586_vm14 = vcmask 1046534   ;;  %vm4588_vm15 = vcmask 1047559   ;;  %vm4833_vm1 = vcmask 261120  }
  0xa2   :  { %v6228_v16 = vpop.f32.mrf.mxu2  ;;  %v380_v14 = vsel %vm5613_vm3, %v375_v37, %v379_v40  ;;  %v1750_v37 = vsel %vm6184_vm7, %v5054_v52, %v1749_v12  ;;  %v1753_v40 = vsel %vm6184_vm7, %v1751_v23, %v1752_v25  ;;  %v5402_v12 = vld [vmem:[%s8354_s0 + $0x1c] sm:$0xf] }
  0xa3   :  { %8456 = vst [vmem:[#allocation26_spill] sm:$0xff] %v6228_v16  ;;  %v1968_v16 = vunpack.c.l.b16 %v1750_v37  ;;  %v1969_v42 = vunpack.c.l.b16 %v1753_v40  ;;  %v1756_v52 = vrot.slane %v5402_v12, 5  ;;  %v5354_v25 = vld [vmem:[%s8354_s0 + $0x18] sm:$0xff] }
  0xa5   :  { %v6233_v13 = vpop.f32.mrf.mxu0  ;;  %5086 = vmatmul.msk.bf16.vlgmr.msrb.gmra.mxu2 %vm1007_vm4, %v2030_v58  ;;  %v930_v58 = vunpack.c.l.b16 %v380_v14  ;;  %v6275_v14 = vpack.c.b16 %v1969_v42, %v1968_v16 }
  0xa7   :  { %v6239_v62 = vpop.f32.mrf.mxu1  ;;  %v6266_v35 = vpack.c.b16 %v930_v58, %v929_v28  ;;  %8459 = vst [vmem:[#allocation29_spill] sm:$0xff] %v6275_v14  ;;  %v1758_v28 = vrot.slane %v1756_v52, 4  ;;  %v5404_v58 = vld [vmem:[%s8354_s0 + $0x20] sm:$0x1] }
  0xa8   :  { %v1759_v37 = vrot.slane %v5404_v58, 5 }
  0xa9   :  { %5127 = vmatmul.msk.bf16.vlgmr.msrb.gmra.mxu3 %vm1007_vm4, %v5353_v45 }
  0xaa   :  { %v6255_v47 = vpop.f32.mrf.mxu2 }
  0xab   :  { %8457 = vst [vmem:[#allocation27_spill] sm:$0xff] %v6255_v47 }
  0xad   :  { %v6257_v17 = vpop.f32.mrf.mxu0 }
  0xaf   :  { %v6264_v5 = vpop.f32.mrf.mxu1  ;;  %4870 = vmatmul.msk.bf16.gmra.mxu0 %vm1007_vm4, %v6266_v35 }
  0xb0   :  { %5022 = vmatmul.msk.bf16.gmra.mxu1 %vm1007_vm4, %v5353_v45  ;;  %v5403_v45 = vld [vmem:[%s8354_s0 + $0x18] sm:$0xf] }
  0xb1   :  { %v5055_v16 = vrot.slane %v5403_v45, 9  ;;  %v1760_v45 = vsel %vm6184_vm7, %v1758_v28, %v1759_v37  ;;  %v5407_v28 = vld [vmem:[%s8354_s0 + $0x2c] sm:$0x1] }
  0xb2   :  { %v6268_v27 = vpop.f32.mrf.mxu2  ;;  %v1971_v47 = vunpack.c.l.b16 %v1760_v45  ;;  %v1766_v37 = vrot.slane %v5407_v28, 5 }
  0xb3   :  { %8458 = vst [vmem:[#allocation28_spill] sm:$0xff] %v6268_v27 }
  0xb5   :  { %v6273_v0 = vpop.f32.mrf.mxu0  ;;  %5087 = vmatmul.msk.bf16.gmra.mxu2 %vm1007_vm4, %v6275_v14  ;;  %v1757_v14 = vsel %vm6184_vm7, %v5055_v16, %v1756_v52  ;;  %v5405_v52 = vld [vmem:[%s8354_s0 + $0x28] sm:$0xf] }
  0xb6   :  { %v1970_v27 = vunpack.c.l.b16 %v1757_v14  ;;  %v1763_v16 = vrot.slane %v5405_v52, 5 }
  0xb7   :  { %v6280_v23 = vpop.f32.mrf.mxu1 }
  0xb8   :  { %v6311_v58 = vpack.c.b16 %v1971_v47, %v1970_v27  ;;  %v1765_v47 = vrot.slane %v1763_v16, 4 }
  0xb9   :  { %5128 = vmatmul.msk.bf16.gmra.mxu3 %vm1007_vm4, %v5354_v25 }
  0xba   :  { %v6293_v40 = vpop.f32.mrf.mxu2  ;;  %8464 = vst [vmem:[#allocation34_spill] sm:$0xff] %v6311_v58 }
  0xbb   :  { %8460 = vst [vmem:[#allocation30_spill] sm:$0xff] %v6293_v40 }
  0xbd   :  { %v6295_v42 = vpop.f32.mrf.mxu3  ;;  %v6297_v12 = vpop.f32.mrf.mxu0 }
  0xbe   :  { %8461 = vst [vmem:[#allocation31_spill] sm:$0xff] %v6295_v42 }
  0xbf   :  { %5160 = vmatmul.msk.bf16.vlgmr.msrb.gmra.mxu0 %vm1007_vm4, %v5678_v55  ;;  %v5406_v55 = vld [vmem:[%s8354_s0 + $0x24] sm:$0xf] }
  0xc0   :  { %5023 = vmatmul.msk.bf16.gmra.mxu1 %vm1007_vm4, %v5354_v25  ;;  %v5355_v25 = vld [vmem:[%s8354_s0 + $0x24] sm:$0xff]  ;;  %v5056_v27 = vrot.slane %v5406_v55, 9 }
  0xc1   :  { %v6304_v4 = vpop.f32.mrf.mxu1 }
  0xc2   :  { %8462 = vst [vmem:[#allocation32_spill] sm:$0xff] %v6304_v4  ;;  %v6306_v2 = vpop.f32.mrf.mxu2 }
  0xc3   :  { %8463 = vst [vmem:[#allocation33_spill] sm:$0xff] %v6306_v2 }
  0xc5   :  { %v6316_v42 = vpop.f32.mrf.mxu3  ;;  %v6318_v14 = vpop.f32.mrf.mxu0  ;;  %5088 = vmatmul.msk.bf16.gmra.mxu2 %vm1007_vm4, %v6311_v58  ;;  %v1767_v58 = vsel %vm6184_vm7, %v1765_v47, %v1766_v37 }
  0xc6   :  { %8465 = vst [vmem:[#allocation35_spill] sm:$0xff] %v6316_v42  ;;  %v1764_v42 = vsel %vm6184_vm7, %v5056_v27, %v1763_v16  ;;  %v1973_v55 = vunpack.c.l.b16 %v1767_v58  ;;  %v5409_v16 = vld [vmem:[%s8354_s0 + $0x38] sm:$0x1]  ;;  %v5410_v27 = vld [vmem:[%s8354_s0 + $0x30] sm:$0xf] }
  0xc7   :  { %v1972_v2 = vunpack.c.l.b16 %v1764_v42  ;;  %v5408_v42 = vld [vmem:[%s8354_s0 + $0x34] sm:$0xf]  ;;  %v5057_v47 = vrot.slane %v5410_v27, 9 }
  0xc8   :  { %v1770_v58 = vrot.slane %v5408_v42, 5 }
  0xc9   :  { %v6331_v45 = vpop.f32.mrf.mxu1  ;;  %5129 = vmatmul.msk.bf16.gmra.mxu3 %vm1007_vm4, %v5355_v25  ;;  %v6347_v28 = vpack.c.b16 %v1973_v55, %v1972_v2  ;;  %v5356_v2 = vld [vmem:[%s8354_s0 + $0x30] sm:$0xff] }
  0xca   :  { %8466 = vst [vmem:[#allocation36_spill] sm:$0xff] %v6331_v45  ;;  %v1772_v37 = vrot.slane %v1770_v58, 4 }
  0xcb   :  { %8469 = vst [vmem:[#allocation39_spill] sm:$0xff] %v6347_v28 }
  0xcc   :  { %v6333_v52 = vpop.f32.mrf.mxu2 }
  0xcd   :  { %8467 = vst [vmem:[#allocation37_spill] sm:$0xff] %v6333_v52 }
  0xcf   :  { %v6342_v20 = vpop.f32.mrf.mxu0  ;;  %5161 = vmatmul.msk.bf16.gmra.mxu0 %vm1007_vm4, %v5732_v63 }
  0xd0   :  { %v6340_v40 = vpop.f32.mrf.mxu3  ;;  %5024 = vmatmul.msk.bf16.gmra.mxu1 %vm1007_vm4, %v5355_v25  ;;  %v1773_v25 = vrot.slane %v5409_v16, 5 }
  0xd1   :  { %8468 = vst [vmem:[#allocation38_spill] sm:$0xff] %v6340_v40  ;;  %v1771_v40 = vsel %vm6184_vm7, %v5057_v47, %v1770_v58  ;;  %v1777_v58 = vrot.slane %v5891_v43, 5 }
  0xd2   :  { %v1774_v16 = vsel %vm6184_vm7, %v1772_v37, %v1773_v25 }
  0xd4   :  { %v6349_v52 = vpop.f32.mrf.mxu1  ;;  %v6351_v45 = vpop.f32.mrf.mxu2 }
  0xd5   :  { %8470 = vst [vmem:[#allocation40_spill] sm:$0xff] %v6349_v52  ;;  %5089 = vmatmul.msk.bf16.gmra.mxu2 %vm1007_vm4, %v6347_v28  ;;  %v1975_v52 = vunpack.c.l.b16 %v1774_v16 }
  0xd6   :  { %8471 = vst [vmem:[#allocation41_spill] sm:$0xff] %v6351_v45  ;;  %v1974_v45 = vunpack.c.l.b16 %v1771_v40  ;;  %v1780_v40 = vrot.slane %v5896_v49, 5 }
  0xd7   :  { %v6369_v42 = vpop.f32.mrf.mxu0 }
  0xd8   :  { %v6367_v55 = vpop.f32.mrf.mxu3  ;;  %v6383_v27 = vpack.c.b16 %v1975_v52, %v1974_v45  ;;  %v5058_v45 = vrot.slane %v5882_v38, 9  ;;  %v1779_v52 = vrot.slane %v1777_v58, 4 }
  0xd9   :  { %8472 = vst [vmem:[#allocation42_spill] sm:$0xff] %v6367_v55  ;;  %5130 = vmatmul.msk.bf16.gmra.mxu3 %vm1007_vm4, %v5356_v2 }
  0xda   :  { %8474 = vst [vmem:[#allocation44_spill] sm:$0xff] %v6383_v27  ;;  %v1778_v43 = vsel %vm6184_vm7, %v5058_v45, %v1777_v58  ;;  %v1781_v37 = vsel %vm6184_vm7, %v1779_v52, %v1780_v40  ;;  %v1784_v58 = vrot.slane %v5970_v41, 5  ;;  %v1787_v52 = vrot.slane %v5975_v48, 5 }
  0xdc   :  { %v6376_v28 = vpop.f32.mrf.mxu1 }
  0xde   :  { %v6378_v63 = vpop.f32.mrf.mxu2 }
  0xdf   :  { %8473 = vst [vmem:[#allocation43_spill] sm:$0xff] %v6378_v63  ;;  %5162 = vmatmul.msk.bf16.gmra.mxu0 %vm1007_vm4, %v5797_v32 }
  0xe0   :  { %5025 = vmatmul.msk.bf16.gmra.mxu1 %vm1007_vm4, %v5356_v2  ;;  %v5357_v2 = vld [vmem:[%s8354_s0 + $0x3c] sm:$0xff] }
  0xe2   :  { %v6387_v4 = vpop.f32.mrf.mxu0 }
  0xe3   :  { %v6385_v55 = vpop.f32.mrf.mxu3 }
  0xe4   :  { %8475 = vst [vmem:[#allocation45_spill] sm:$0xff] %v6385_v55  ;;  %v1976_v55 = vunpack.c.l.b16 %v1778_v43  ;;  %v5059_v43 = vrot.slane %v5961_v30, 9 }
  0xe5   :  { %5090 = vmatmul.msk.bf16.gmra.mxu2 %vm1007_vm4, %v6383_v27  ;;  %v1977_v27 = vunpack.c.l.b16 %v1781_v37  ;;  %v1786_v37 = vrot.slane %v1784_v58, 4 }
  0xe6   :  { %v6398_v47 = vpop.f32.mrf.mxu2 }
  0xe7   :  { %v6392_v25 = vpop.f32.mrf.mxu1  ;;  %8476 = vst [vmem:[#allocation46_spill] sm:$0xff] %v6398_v47  ;;  %v6417_v47 = vpack.c.b16 %v1977_v27, %v1976_v55  ;;  %v1785_v27 = vsel %vm6184_vm7, %v5059_v43, %v1784_v58 }
  0xe8   :  { %v1978_v48 = vunpack.c.l.b16 %v1785_v27 }
  0xe9   :  { %5131 = vmatmul.msk.bf16.gmra.mxu3 %vm1007_vm4, %v5357_v2  ;;  %8479 = vst [vmem:[#allocation49_spill] sm:$0xff] %v6417_v47 }
  0xea   :  { %v6408_v49 = vpop.f32.mrf.mxu0 }
  0xeb   :  { %v6406_v16 = vpop.f32.mrf.mxu3 }
  0xec   :  { %8477 = vst [vmem:[#allocation47_spill] sm:$0xff] %v6406_v16 }
  0xef   :  { %v6410_v32 = vpop.f32.mrf.mxu1  ;;  %5163 = vmatmul.msk.bf16.gmra.mxu0 %vm1007_vm4, %v5865_v10 }
  0xf0   :  { %5026 = vmatmul.msk.bf16.gmra.mxu1 %vm1007_vm4, %v5357_v2  ;;  %v5358_v2 = vld [vmem:[%s8354_s0 + $0x48] sm:$0xff] }
  0xf2   :  { %v6415_v38 = vpop.f32.mrf.mxu2 }
  0xf3   :  { %8478 = vst [vmem:[#allocation48_spill] sm:$0xff] %v6415_v38 }
  0xf5   :  { %5091 = vmatmul.msk.bf16.gmra.mxu2 %vm1007_vm4, %v6417_v47  ;;  %v6424_v45 = vpop.f32.mrf.mxu0 }
  0xf6   :  { %v6422_v40 = vpop.f32.mrf.mxu3 }
  0xf7   :  { %8480 = vst [vmem:[#allocation50_spill] sm:$0xff] %v6422_v40  ;;  %v1788_v40 = vsel %vm6184_vm7, %v1786_v37, %v1787_v52  ;;  %v5359_v52 = vld [vmem:[%s8354_s0 + $0x54] sm:$0xff] }
  0xf8   :  { %v1979_v16 = vunpack.c.l.b16 %v1788_v40  ;;  %v1794_v40 = vrot.slane %v6052_v7, 5 }
  0xf9   :  { %5132 = vmatmul.msk.bf16.gmra.mxu3 %vm1007_vm4, %v5358_v2 }
  0xfa   :  { %v6431_v55 = vpop.f32.mrf.mxu1  ;;  %v6434_v41 = vpop.f32.mrf.mxu2  ;;  %v6447_v30 = vpack.c.b16 %v1979_v16, %v1978_v48 }
  0xfb   :  { %8481 = vst [vmem:[#allocation51_spill] sm:$0xff] %v6434_v41  ;;  %v1791_v41 = vrot.slane %v6047_v61, 5 }
  0xfc   :  { %8483 = vst [vmem:[#allocation53_spill] sm:$0xff] %v6447_v30 }
  0xfd   :  { %v6442_v10 = vpop.f32.mrf.mxu0  ;;  %v1793_v43 = vrot.slane %v1791_v41, 4 }
  0xfe   :  { %v6440_v47 = vpop.f32.mrf.mxu3 }
  0xff   :  { %8482 = vst [vmem:[#allocation52_spill] sm:$0xff] %v6440_v47  ;;  %5164 = vmatmul.msk.bf16.gmra.mxu0 %vm1007_vm4, %v5944_v1  ;;  %v1795_v27 = vsel %vm6184_vm7, %v1793_v43, %v1794_v40 }
 0x100   :  { %5027 = vmatmul.msk.bf16.gmra.mxu1 %vm1007_vm4, %v5358_v2  ;;  %v5060_v2 = vrot.slane %v6040_v54, 9  ;;  %v1981_v47 = vunpack.c.l.b16 %v1795_v27 }
 0x102   :  { %v6450_v38 = vpop.f32.mrf.mxu1  ;;  %v1792_v61 = vsel %vm6184_vm7, %v5060_v2, %v1791_v41  ;;  %v1801_v2 = vrot.slane %v6149_v18, 5 }
 0x103   :  { %v1980_v48 = vunpack.c.l.b16 %v1792_v61 }
 0x104   :  { %v6452_v58 = vpop.f32.mrf.mxu2 }
 0x105   :  { %8484 = vst [vmem:[#allocation54_spill] sm:$0xff] %v6452_v58  ;;  %5092 = vmatmul.msk.bf16.gmra.mxu2 %vm1007_vm4, %v6447_v30  ;;  %v6477_v54 = vpack.c.b16 %v1981_v47, %v1980_v48  ;;  %v5061_v47 = vrot.slane %v6133_v3, 9 }
 0x107   :  { %8487 = vst [vmem:[#allocation57_spill] sm:$0xff] %v6477_v54 }
 0x108   :  { %v6463_v37 = vpop.f32.mrf.mxu0 }
 0x109   :  { %v6461_v16 = vpop.f32.mrf.mxu3  ;;  %5133 = vmatmul.msk.bf16.gmra.mxu3 %vm1007_vm4, %v5359_v52 }
 0x10a   :  { %8485 = vst [vmem:[#allocation55_spill] sm:$0xff] %v6461_v16  ;;  %v1798_v16 = vrot.slane %v6138_v8, 5 }
 0x10c   :  { %v6472_v30 = vpop.f32.mrf.mxu2  ;;  %v1800_v43 = vrot.slane %v1798_v16, 4  ;;  %v1799_v8 = vsel %vm6184_vm7, %v5061_v47, %v1798_v16  ;;  %v1805_v16 = vrot.slane %v6180_v26, 5 }
 0x10d   :  { %v6470_v7 = vpop.f32.mrf.mxu1  ;;  %8486 = vst [vmem:[#allocation56_spill] sm:$0xff] %v6472_v30 }
 0x10e   :  { %v1802_v27 = vsel %vm6184_vm7, %v1800_v43, %v1801_v2  ;;  %v1808_v43 = vrot.slane %v6210_v29, 5 }
 0x10f   :  { %5165 = vmatmul.msk.bf16.gmra.mxu0 %vm1007_vm4, %v6023_v15 }
 0x110   :  { %5028 = vmatmul.msk.bf16.gmra.mxu1 %vm1007_vm4, %v5359_v52  ;;  %v6482_v41 = vpop.f32.mrf.mxu0  ;;  %v5360_v52 = vld [vmem:[%s8354_s0 + $0x60] sm:$0xff] }
 0x111   :  { %v6480_v1 = vpop.f32.mrf.mxu3 }
 0x112   :  { %8488 = vst [vmem:[#allocation58_spill] sm:$0xff] %v6480_v1  ;;  %v1982_v1 = vunpack.c.l.b16 %v1799_v8 }
 0x115   :  { %5093 = vmatmul.msk.bf16.gmra.mxu2 %vm1007_vm4, %v6477_v54  ;;  %v6486_v40 = vpop.f32.mrf.mxu1  ;;  %v1983_v54 = vunpack.c.l.b16 %v1802_v27  ;;  %v5062_v27 = vrot.slane %v6168_v9, 9 }
 0x116   :  { %8489 = vst [vmem:[#allocation59_spill] sm:$0xff] %v6486_v40 }
 0x117   :  { %v6509_v3 = vpack.c.b16 %v1983_v54, %v1982_v1  ;;  %v1807_v1 = vrot.slane %v1805_v16, 4 }
 0x118   :  { %v6493_v61 = vpop.f32.mrf.mxu2 }
 0x119   :  { %8490 = vst [vmem:[#allocation60_spill] sm:$0xff] %v6493_v61  ;;  %5134 = vmatmul.msk.bf16.gmra.mxu3 %vm1007_vm4, %v5360_v52  ;;  %v1809_v29 = vsel %vm6184_vm7, %v1807_v1, %v1808_v43  ;;  %v5411_v43 = vld [vmem:[%s8354_s0 + $0x7c] sm:$0xf] }
 0x11a   :  { %8493 = vst [vmem:[#allocation63_spill] sm:$0xff] %v6509_v3  ;;  %v1985_v61 = vunpack.c.l.b16 %v1809_v29 }
 0x11c   :  { %v6500_v48 = vpop.f32.mrf.mxu3  ;;  %v6502_v18 = vpop.f32.mrf.mxu0 }
 0x11d   :  { %8491 = vst [vmem:[#allocation61_spill] sm:$0xff] %v6500_v48  ;;  %v1545_v15 = vpop.f32.mrf.mxu1 }
 0x11e   :  { %v1546_v54 = vadd.f32 %v1545_v15, %v6099_v59 }
 0x11f   :  { %5166 = vmatmul.msk.bf16.gmra.mxu0 %vm1007_vm4, %v6101_v60 }
 0x120   :  { %v6504_v30 = vpop.f32.mrf.mxu2  ;;  %5029 = vmatmul.msk.bf16.gmra.mxu1 %vm1007_vm4, %v5360_v52  ;;  %v5361_v52 = vld [vmem:[%s8354_s0 + $0x6c] sm:$0xff] }
 0x121   :  { %8492 = vst [vmem:[#allocation62_spill] sm:$0xff] %v6504_v30 }
 0x124   :  { %v6512_v47 = vpop.f32.mrf.mxu3  ;;  %v6516_v2 = vpop.f32.mrf.mxu0 }
 0x125   :  { %8494 = vst [vmem:[#allocation64_spill] sm:$0xff] %v6512_v47  ;;  %5094 = vmatmul.msk.bf16.gmra.mxu2 %vm1007_vm4, %v6509_v3  ;;  %v1547_v8 = vpop.f32.mrf.mxu1  ;;  %v1806_v47 = vsel %vm6184_vm7, %v5062_v27, %v1805_v16  ;;  %v1812_v27 = vrot.slane %v5411_v43, 5 }
 0x126   :  { %v1984_v30 = vunpack.c.l.b16 %v1806_v47  ;;  %v1548_v63 = vadd.f32 %v1547_v8, %v6151_v21  ;;  %v5412_v21 = vld [vmem:[%s8354_s0 + $0x80] sm:$0x1] }
 0x127   :  { %v1814_v1 = vrot.slane %v1812_v27, 4 }
 0x128   :  { %v2170_v26 = vpop.f32.mrf.mxu2  ;;  %v6535_v16 = vpack.c.b16 %v1985_v61, %v1984_v30  ;;  %v5413_v61 = vld [vmem:[%s8354_s0 + $0x78] sm:$0xf] }
 0x129   :  { %v2330_v48 = vadd.f32 %v2170_v26, %v1546_v54  ;;  %5135 = vmatmul.msk.bf16.gmra.mxu3 %vm1007_vm4, %v5361_v52  ;;  %v5063_v8 = vrot.slane %v5413_v61, 9 }
 0x12a   :  { %8495 = vst [vmem:[#allocation65_spill] sm:$0xff] %v6535_v16 }
 0x12c   :  { %v2424_v3 = vpop.f32.mrf.mxu3  ;;  %v6529_v60 = vpop.f32.mrf.mxu0 }
 0x12d   :  { %v2584_v58 = vadd.f32 %v2424_v3, %v2330_v48  ;;  %v1550_v9 = vpop.f32.mrf.mxu1  ;;  %v1815_v3 = vrot.slane %v5412_v21, 5 }
 0x12e   :  { %v1551_v54 = vadd.f32 %v1550_v9, %v6197_v56 }
 0x12f   :  { %5167 = vmatmul.msk.bf16.gmra.mxu0 %vm1007_vm4, %v6226_v33 }
 0x130   :  { %v2172_v15 = vpop.f32.mrf.mxu2  ;;  %5030 = vmatmul.msk.bf16.gmra.mxu1 %vm1007_vm4, %v5361_v52 }
 0x131   :  { %v2331_v59 = vadd.f32 %v2172_v15, %v1548_v63  ;;  %v5362_v63 = vld [vmem:[%s8354_s0 + $0x78] sm:$0xff]  ;;  %v1813_v15 = vsel %vm6184_vm7, %v5063_v8, %v1812_v27 }
 0x132   :  { %v1986_v21 = vunpack.c.l.b16 %v1813_v15  ;;  %v5416_v15 = vld [vmem:[%s8354_s0 + $0x84] sm:$0xf] }
 0x134   :  { %v2426_v47 = vpop.f32.mrf.mxu3  ;;  %v6542_v48 = vpop.f32.mrf.mxu0 }
 0x135   :  { %5095 = vmatmul.msk.bf16.gmra.mxu2 %vm1007_vm4, %v6535_v16  ;;  %v2585_v52 = vadd.f32 %v2426_v47, %v2331_v59  ;;  %v1552_v30 = vpop.f32.mrf.mxu1  ;;  %v1816_v59 = vsel %vm6184_vm7, %v1814_v1, %v1815_v3  ;;  %v5414_v3 = vld [vmem:[%s8354_s0 + $0x88] sm:$0xf] }
 0x136   :  { %v1987_v16 = vunpack.c.l.b16 %v1816_v59  ;;  %v1553_v56 = vadd.f32 %v1552_v30, %v6233_v13  ;;  %v1819_v1 = vrot.slane %v5414_v3, 5  ;;  %v5064_v59 = vrot.slane %v5416_v15, 9 }
 0x138   :  { %v2175_v26 = vpop.f32.mrf.mxu2  ;;  %v6565_v8 = vpack.c.b16 %v1987_v16, %v1986_v21  ;;  %v5363_v16 = vld [vmem:[%s8354_s0 + $0x84] sm:$0xff] }
 0x139   :  { %v2332_v29 = vadd.f32 %v2175_v26, %v1551_v54  ;;  %5136 = vmatmul.msk.bf16.gmra.mxu3 %vm1007_vm4, %v5362_v63 }
 0x13c   :  { %v2429_v43 = vpop.f32.mrf.mxu3  ;;  %v2722_v47 = vpop.f32.mrf.mxu0 }
 0x13d   :  { %v2586_v33 = vadd.f32 %v2429_v43, %v2332_v29  ;;  %v1555_v40 = vpop.f32.mrf.mxu1  ;;  %v6559_v61 = vadd.f32 %v2722_v47, %v2584_v58  ;;  %v5415_v58 = vld [vmem:[%s8354_s0 + $0x8c] sm:$0x1]  ;;  %v1821_v43 = vrot.slane %v1819_v1, 4 }
 0x13e   :  { %v1822_v54 = vrot.slane %v5415_v58, 5  ;;  %v1556_v47 = vadd.f32 %v1555_v40, %v6257_v17 }
 0x13f   :  { %5168 = vmatmul.msk.bf16.gmra.mxu0 %vm1007_vm4, %v6266_v35 }
 0x140   :  { %v2177_v9 = vpop.f32.mrf.mxu2  ;;  %5031 = vmatmul.msk.bf16.gmra.mxu1 %vm1007_vm4, %v5362_v63 }
 0x141   :  { %v2333_v27 = vadd.f32 %v2177_v9, %v1553_v56  ;;  %v1820_v9 = vsel %vm6184_vm7, %v5064_v59, %v1819_v1 }
 0x142   :  { %v1988_v58 = vunpack.c.l.b16 %v1820_v9 }
 0x144   :  { %v2431_v13 = vpop.f32.mrf.mxu3  ;;  %v2724_v63 = vpop.f32.mrf.mxu0 }
 0x145   :  { %5096 = vmatmul.msk.bf16.gmra.mxu2 %vm1007_vm4, %v6565_v8  ;;  %v2587_v30 = vadd.f32 %v2431_v13, %v2333_v27  ;;  %v1557_v26 = vpop.f32.mrf.mxu1  ;;  %v6578_v29 = vadd.f32 %v2724_v63, %v2585_v52  ;;  %v1823_v27 = vsel %vm6184_vm7, %v1821_v43, %v1822_v54  ;;  %v5417_v54 = vld [vmem:[%s8354_s0 + $0x94] sm:$0xf] }
 0x146   :  { %v1989_v13 = vunpack.c.l.b16 %v1823_v27  ;;  %v1558_v17 = vadd.f32 %v1557_v26, %v6273_v0  ;;  %v1826_v43 = vrot.slane %v5417_v54, 5  ;;  %v5419_v27 = vld [vmem:[%s8354_s0 + $0x90] sm:$0xf] }
 0x147   :  { %8496 = vst [vmem:[#allocation66_spill] sm:$0xff] %v6578_v29 }
 0x148   :  { %v2180_v21 = vpop.f32.mrf.mxu2  ;;  %v6595_v59 = vpack.c.b16 %v1989_v13, %v1988_v58 }
 0x149   :  { %v2334_v56 = vadd.f32 %v2180_v21, %v1556_v47  ;;  %5137 = vmatmul.msk.bf16.gmra.mxu3 %vm1007_vm4, %v5363_v16  ;;  %v5364_v21 = vld [vmem:[%s8354_s0 + $0x90] sm:$0xff] }
 0x14c   :  { %v2434_v52 = vpop.f32.mrf.mxu3  ;;  %v2727_v3 = vpop.f32.mrf.mxu0 }
 0x14d   :  { %v2588_v63 = vadd.f32 %v2434_v52, %v2334_v56  ;;  %v1560_v29 = vpop.f32.mrf.mxu1  ;;  %v6589_v15 = vadd.f32 %v2727_v3, %v2586_v33  ;;  %v5418_v33 = vld [vmem:[%s8354_s0 + $0x98] sm:$0x1]  ;;  %v5065_v52 = vrot.slane %v5419_v27, 9  ;;  %v1828_v3 = vrot.slane %v1826_v43, 4 }
 0x14e   :  { %v1829_v47 = vrot.slane %v5418_v33, 5  ;;  %v1561_v58 = vadd.f32 %v1560_v29, %v6297_v12 }
 0x14f   :  { %5169 = vmatmul.msk.bf16.gmra.mxu0 %vm1007_vm4, %v5644_v6 }
 0x150   :  { %v2182_v40 = vpop.f32.mrf.mxu2  ;;  %5032 = vmatmul.msk.bf16.gmra.mxu1 %vm1007_vm4, %v5363_v16 }
 0x151   :  { %v2335_v1 = vadd.f32 %v2182_v40, %v1558_v17  ;;  %v1827_v40 = vsel %vm6184_vm7, %v5065_v52, %v1826_v43 }
 0x152   :  { %v1990_v33 = vunpack.c.l.b16 %v1827_v40 }
 0x154   :  { %v2436_v0 = vpop.f32.mrf.mxu3  ;;  %v2729_v16 = vpop.f32.mrf.mxu0 }
 0x155   :  { %5097 = vmatmul.msk.bf16.gmra.mxu2 %vm1007_vm4, %v6595_v59  ;;  %v2589_v26 = vadd.f32 %v2436_v0, %v2335_v1  ;;  %v1562_v56 = vpop.f32.mrf.mxu1  ;;  %v6608_v9 = vadd.f32 %v2729_v16, %v2587_v30  ;;  %v1830_v1 = vsel %vm6184_vm7, %v1828_v3, %v1829_v47  ;;  %v5420_v47 = vld [vmem:[%s8354_s0 + $0xa0] sm:$0xf] }
 0x156   :  { %v1991_v0 = vunpack.c.l.b16 %v1830_v1  ;;  %v1563_v12 = vadd.f32 %v1562_v56, %v6318_v14  ;;  %v1833_v3 = vrot.slane %v5420_v47, 5  ;;  %v5422_v1 = vld [vmem:[%s8354_s0 + $0x9c] sm:$0xf] }
 0x157   :  { %8497 = vst [vmem:[#allocation67_spill] sm:$0xff] %v6608_v9 }
 0x158   :  { %v2185_v13 = vpop.f32.mrf.mxu2  ;;  %v6625_v52 = vpack.c.b16 %v1991_v0, %v1990_v33 }
 0x159   :  { %v2336_v17 = vadd.f32 %v2185_v13, %v1561_v58  ;;  %5138 = vmatmul.msk.bf16.gmra.mxu3 %vm1007_vm4, %v5364_v21  ;;  %v5365_v13 = vld [vmem:[%s8354_s0 + $0x9c] sm:$0xff] }
 0x15c   :  { %v2439_v30 = vpop.f32.mrf.mxu3  ;;  %v2732_v54 = vpop.f32.mrf.mxu0 }
 0x15d   :  { %v2590_v16 = vadd.f32 %v2439_v30, %v2336_v17  ;;  %v1565_v9 = vpop.f32.mrf.mxu1  ;;  %v6619_v27 = vadd.f32 %v2732_v54, %v2588_v63  ;;  %v5421_v63 = vld [vmem:[%s8354_s0 + $0xa4] sm:$0x1]  ;;  %v5066_v30 = vrot.slane %v5422_v1, 9  ;;  %v1835_v54 = vrot.slane %v1833_v3, 4 }
 0x15e   :  { %v1836_v58 = vrot.slane %v5421_v63, 5  ;;  %v1566_v33 = vadd.f32 %v1565_v9, %v6342_v20 }
 0x15f   :  { %5170 = vmatmul.msk.bf16.gmra.mxu0 %vm1007_vm4, %v5695_v11 }
 0x160   :  { %v2187_v29 = vpop.f32.mrf.mxu2  ;;  %5033 = vmatmul.msk.bf16.gmra.mxu1 %vm1007_vm4, %v5364_v21 }
 0x161   :  { %v2337_v43 = vadd.f32 %v2187_v29, %v1563_v12  ;;  %v1834_v29 = vsel %vm6184_vm7, %v5066_v30, %v1833_v3 }
 0x162   :  { %v1992_v63 = vunpack.c.l.b16 %v1834_v29 }
 0x164   :  { %v2441_v14 = vpop.f32.mrf.mxu3  ;;  %v2734_v21 = vpop.f32.mrf.mxu0 }
 0x165   :  { %5098 = vmatmul.msk.bf16.gmra.mxu2 %vm1007_vm4, %v6625_v52  ;;  %v2591_v56 = vadd.f32 %v2441_v14, %v2337_v43  ;;  %v1567_v17 = vpop.f32.mrf.mxu1  ;;  %v6638_v40 = vadd.f32 %v2734_v21, %v2589_v26  ;;  %v1837_v43 = vsel %vm6184_vm7, %v1835_v54, %v1836_v58  ;;  %v5423_v58 = vld [vmem:[%s8354_s0 + $0xac] sm:$0xf] }
 0x166   :  { %v1993_v14 = vunpack.c.l.b16 %v1837_v43  ;;  %v1568_v20 = vadd.f32 %v1567_v17, %v6369_v42  ;;  %v1840_v54 = vrot.slane %v5423_v58, 5  ;;  %v5425_v43 = vld [vmem:[%s8354_s0 + $0xa8] sm:$0xf] }
 0x167   :  { %8498 = vst [vmem:[#allocation68_spill] sm:$0xff] %v6638_v40 }
 0x168   :  { %v2190_v0 = vpop.f32.mrf.mxu2  ;;  %v6655_v30 = vpack.c.b16 %v1993_v14, %v1992_v63 }
 0x169   :  { %v2338_v12 = vadd.f32 %v2190_v0, %v1566_v33  ;;  %5139 = vmatmul.msk.bf16.gmra.mxu3 %vm1007_vm4, %v5365_v13  ;;  %v5366_v0 = vld [vmem:[%s8354_s0 + $0xa8] sm:$0xff] }
 0x16c   :  { %v2444_v26 = vpop.f32.mrf.mxu3  ;;  %v2737_v47 = vpop.f32.mrf.mxu0 }
 0x16d   :  { %v2592_v21 = vadd.f32 %v2444_v26, %v2338_v12  ;;  %v1570_v40 = vpop.f32.mrf.mxu1  ;;  %v6649_v1 = vadd.f32 %v2737_v47, %v2590_v16  ;;  %v5424_v16 = vld [vmem:[%s8354_s0 + $0xb0] sm:$0x1]  ;;  %v5067_v26 = vrot.slane %v5425_v43, 9  ;;  %v1842_v47 = vrot.slane %v1840_v54, 4 }
 0x16e   :  { %v1843_v33 = vrot.slane %v5424_v16, 5  ;;  %v1571_v63 = vadd.f32 %v1570_v40, %v6387_v4 }
 0x16f   :  { %5171 = vmatmul.msk.bf16.gmra.mxu0 %vm1007_vm4, %v5744_v19 }
 0x170   :  { %v2192_v9 = vpop.f32.mrf.mxu2  ;;  %5034 = vmatmul.msk.bf16.gmra.mxu1 %vm1007_vm4, %v5365_v13 }
 0x171   :  { %v2339_v3 = vadd.f32 %v2192_v9, %v1568_v20  ;;  %v1841_v9 = vsel %vm6184_vm7, %v5067_v26, %v1840_v54 }
 0x172   :  { %v1994_v16 = vunpack.c.l.b16 %v1841_v9 }
 0x174   :  { %v2446_v42 = vpop.f32.mrf.mxu3  ;;  %v2739_v13 = vpop.f32.mrf.mxu0 }
 0x175   :  { %5099 = vmatmul.msk.bf16.gmra.mxu2 %vm1007_vm4, %v6655_v30  ;;  %v2593_v17 = vadd.f32 %v2446_v42, %v2339_v3  ;;  %v1572_v12 = vpop.f32.mrf.mxu1  ;;  %v6668_v29 = vadd.f32 %v2739_v13, %v2591_v56  ;;  %v1844_v3 = vsel %vm6184_vm7, %v1842_v47, %v1843_v33  ;;  %v5426_v33 = vld [vmem:[%s8354_s0 + $0xb8] sm:$0xf] }
 0x176   :  { %v1995_v42 = vunpack.c.l.b16 %v1844_v3  ;;  %v1573_v4 = vadd.f32 %v1572_v12, %v6408_v49  ;;  %v1847_v47 = vrot.slane %v5426_v33, 5  ;;  %v5428_v3 = vld [vmem:[%s8354_s0 + $0xb4] sm:$0xf] }
 0x177   :  { %8499 = vst [vmem:[#allocation69_spill] sm:$0xff] %v6668_v29 }
 0x178   :  { %v2195_v14 = vpop.f32.mrf.mxu2  ;;  %v6685_v26 = vpack.c.b16 %v1995_v42, %v1994_v16 }
 0x179   :  { %v2340_v20 = vadd.f32 %v2195_v14, %v1571_v63  ;;  %5140 = vmatmul.msk.bf16.gmra.mxu3 %vm1007_vm4, %v5366_v0  ;;  %v5367_v14 = vld [vmem:[%s8354_s0 + $0xb4] sm:$0xff] }
 0x17a   :  { %8501 = vst [vmem:[#allocation71_spill] sm:$0xff] %v6685_v26 }
 0x17c   :  { %v2449_v56 = vpop.f32.mrf.mxu3  ;;  %v2742_v58 = vpop.f32.mrf.mxu0 }
 0x17d   :  { %v2594_v13 = vadd.f32 %v2449_v56, %v2340_v20  ;;  %v1575_v29 = vpop.f32.mrf.mxu1  ;;  %v6679_v43 = vadd.f32 %v2742_v58, %v2592_v21  ;;  %v5427_v21 = vld [vmem:[%s8354_s0 + $0xbc] sm:$0x1]  ;;  %v5068_v56 = vrot.slane %v5428_v3, 9  ;;  %v1849_v58 = vrot.slane %v1847_v47, 4 }
 0x17e   :  { %v1850_v63 = vrot.slane %v5427_v21, 5  ;;  %v1576_v16 = vadd.f32 %v1575_v29, %v6424_v45 }
 0x17f   :  { %8500 = vst [vmem:[#allocation70_spill] sm:$0xff] %v6679_v43  ;;  %5172 = vmatmul.msk.bf16.gmra.mxu0 %vm1007_vm4, %v5814_v57 }
 0x180   :  { %v2197_v40 = vpop.f32.mrf.mxu2  ;;  %5035 = vmatmul.msk.bf16.gmra.mxu1 %vm1007_vm4, %v5366_v0 }
 0x181   :  { %v2341_v54 = vadd.f32 %v2197_v40, %v1573_v4  ;;  %v1848_v40 = vsel %vm6184_vm7, %v5068_v56, %v1847_v47  ;;  %v5429_v47 = vld [vmem:[%s8354_s0 + $0xdc] sm:$0xf] }
 0x182   :  { %v1996_v21 = vunpack.c.l.b16 %v1848_v40 }
 0x184   :  { %v2451_v49 = vpop.f32.mrf.mxu3  ;;  %v2744_v0 = vpop.f32.mrf.mxu0 }
 0x185   :  { %5100 = vmatmul.msk.bf16.gmra.mxu2 %vm1007_vm4, %v6685_v26  ;;  %v2595_v12 = vadd.f32 %v2451_v49, %v2341_v54  ;;  %v1577_v20 = vpop.f32.mrf.mxu1  ;;  %v6698_v9 = vadd.f32 %v2744_v0, %v2593_v17  ;;  %v1851_v54 = vsel %vm6184_vm7, %v1849_v58, %v1850_v63  ;;  %v1854_v63 = vrot.slane %v5429_v47, 5 }
 0x186   :  { %v1997_v49 = vunpack.c.l.b16 %v1851_v54  ;;  %v1578_v45 = vadd.f32 %v1577_v20, %v6442_v10  ;;  %v78_v10 = vld [vmem:[%s8354_s0 + $0xc4] sm:$0xf] }
 0x187   :  { %8502 = vst [vmem:[#allocation72_spill] sm:$0xff] %v6698_v9 }
 0x188   :  { %v2200_v42 = vpop.f32.mrf.mxu2  ;;  %v6718_v58 = vpack.c.b16 %v1997_v49, %v1996_v21  ;;  %v2658_v21 = vshll.u32 %v78_v10, 16  ;;  %v2662_v49 = vshrl.u32 %v78_v10, 16 }
 0x189   :  { %v2342_v4 = vadd.f32 %v2200_v42, %v1576_v16  ;;  %5141 = vmatmul.msk.bf16.gmra.mxu3 %vm1007_vm4, %v5367_v14  ;;  %v5431_v16 = vld [vmem:[%s8354_s0 + $0xd8] sm:$0xf] }
 0x18a   :  { %8504 = vst [vmem:[#allocation74_spill] sm:$0xff] %v6718_v58  ;;  %v5069_v42 = vrot.slane %v5431_v16, 9 }
 0x18c   :  { %v2454_v17 = vpop.f32.mrf.mxu3  ;;  %v2747_v33 = vpop.f32.mrf.mxu0  ;;  %v1855_v43 = vsel %vm6184_vm7, %v5069_v42, %v1854_v63 }
 0x18d   :  { %v2596_v0 = vadd.f32 %v2454_v17, %v2342_v4  ;;  %v1580_v9 = vpop.f32.mrf.mxu1  ;;  %v6709_v3 = vadd.f32 %v2747_v33, %v2594_v13  ;;  %v77_v13 = vld [vmem:[%s8354_s0 + $0xc0] sm:$0xf]  ;;  %v1856_v4 = vrot.slane %v1854_v63, 4 }
 0x18e   :  { %v2649_v40 = vshrl.u32 %v77_v13, 16  ;;  %v2652_v33 = vshll.u32 %v77_v13, 16  ;;  %v1581_v16 = vadd.f32 %v1580_v9, %v6463_v37  ;;  %v5370_v37 = vld [vmem:[%s8354_s0 + $0xd8] sm:$0xff]  ;;  %v1998_v9 = vunpack.c.l.b16 %v1855_v43 }
 0x18f   :  { %8503 = vst [vmem:[#allocation73_spill] sm:$0xff] %v6709_v3  ;;  %5173 = vmatmul.msk.bf16.gmra.mxu0 %vm1007_vm4, %v5884_v39 }
 0x190   :  { %v2202_v29 = vpop.f32.mrf.mxu2  ;;  %5036 = vmatmul.msk.bf16.gmra.mxu1 %vm1007_vm4, %v5367_v14  ;;  %v5430_v14 = vld [vmem:[%s8354_s0 + $0xe0] sm:$0x1]  ;;  %v2651_v13 = vrot.slane %v2649_v40, 4  ;;  %v2654_v10 = vrot.slane %v2652_v33, 5 }
 0x191   :  { %v2343_v56 = vadd.f32 %v2202_v29, %v1578_v45  ;;  %v1857_v20 = vrot.slane %v5430_v14, 5  ;;  %v5368_v29 = vld [vmem:[%s8354_s0 + $0xc0] sm:$0xff] }
 0x194   :  { %v2456_v54 = vpop.f32.mrf.mxu3  ;;  %v2749_v17 = vpop.f32.mrf.mxu0 }
 0x195   :  { %5101 = vmatmul.msk.bf16.gmra.mxu2 %vm1007_vm4, %v6718_v58  ;;  %v2597_v45 = vadd.f32 %v2456_v54, %v2343_v56  ;;  %v1582_v47 = vpop.f32.mrf.mxu1  ;;  %v6737_v14 = vadd.f32 %v2749_v17, %v2595_v12  ;;  %v1858_v58 = vsel %vm6184_vm7, %v1856_v4, %v1857_v20  ;;  %v2660_v56 = vrot.slane %v2658_v21, 5  ;;  %v79_v12 = vld [vmem:[%s8354_s0 + $0xc8] sm:$0x1] }
 0x196   :  { %v2664_v54 = vrot.slane %v2662_v49, 4  ;;  %v1999_v63 = vunpack.c.l.b16 %v1858_v58  ;;  %v2655_v20 = vor.u32 %v2654_v10, %v2651_v13  ;;  %v1583_v49 = vadd.f32 %v1582_v47, %v6482_v41  ;;  %v5433_v41 = vld [vmem:[%s8354_s0 + $0xec] sm:$0x1] }
 0x197   :  { %8505 = vst [vmem:[#allocation75_spill] sm:$0xff] %v6737_v14 }
 0x198   :  { %v2205_v3 = vpop.f32.mrf.mxu2  ;;  %v2665_v4 = vor.u32 %v2664_v54, %v2660_v56  ;;  %v2656_v58 = vrot.slane %v2655_v20, 4 }
 0x199   :  { %v2344_v26 = vadd.f32 %v2205_v3, %v1581_v16  ;;  %5142 = vmatmul.msk.bf16.gmra.mxu3 %vm1007_vm4, %v5368_v29  ;;  %v2668_v3 = vshll.u32 %v79_v12, 16  ;;  %v2046_v16 = vpack.c.b16 %v1999_v63, %v1998_v9  ;;  %v5371_v9 = vld [vmem:[%s8354_s0 + $0xe4] sm:$0xff] }
 0x19a   :  { %v2666_v14 = vrot.slane %v2665_v4, 4  ;;  %v2661_v54 = vsel %vm5613_vm3, %v2656_v58, %v2660_v56 }
 0x19b   :  { %v2670_v39 = vrot.slane %v2668_v3, 5 }
 0x19c   :  { %v2459_v42 = vpop.f32.mrf.mxu3  ;;  %v2752_v17 = vpop.f32.mrf.mxu0 }
 0x19d   :  { %v2598_v40 = vadd.f32 %v2459_v42, %v2344_v26  ;;  %v1585_v33 = vpop.f32.mrf.mxu1  ;;  %v6751_v21 = vadd.f32 %v2752_v17, %v2596_v0  ;;  %v5432_v26 = vld [vmem:[%s8354_s0 + $0xe8] sm:$0xf]  ;;  %v1864_v0 = vrot.slane %v5433_v41, 5  ;;  %v2671_v12 = vsel %vm5613_vm3, %v2666_v14, %v2670_v39  ;;  %v5434_v17 = vld [vmem:[%s8354_s0 + $0xe4] sm:$0xf] }
 0x19e   :  { %v1861_v13 = vrot.slane %v5432_v26, 5  ;;  %v5070_v20 = vrot.slane %v5434_v17, 9  ;;  %v1586_v3 = vadd.f32 %v1585_v33, %v6502_v18 }
 0x19f   :  { %5174 = vmatmul.msk.bf16.gmra.mxu0 %vm1007_vm4, %v5963_v34 }
 0x1a0   :  { %v2207_v29 = vpop.f32.mrf.mxu2  ;;  %5037 = vmatmul.msk.bf16.gmra.mxu1 %vm1007_vm4, %v5370_v37  ;;  %v1863_v4 = vrot.slane %v1861_v13, 4  ;;  %v1862_v14 = vsel %vm6184_vm7, %v5070_v20, %v1861_v13 }
 0x1a1   :  { %v2345_v43 = vadd.f32 %v2207_v29, %v1583_v49  ;;  %v2698_v49 = vunpack.c.l.b16 %v2661_v54  ;;  %v2699_v29 = vunpack.c.l.b16 %v2671_v12  ;;  %v2000_v26 = vunpack.c.l.b16 %v1862_v14  ;;  %v5435_v12 = vld [vmem:[%s8354_s0 + $0xf4] sm:$0xf] }
 0x1a2   :  { %v1868_v17 = vrot.slane %v5435_v12, 5 }
 0x1a4   :  { %v2461_v47 = vpop.f32.mrf.mxu3  ;;  %v2754_v10 = vpop.f32.mrf.mxu0 }
 0x1a5   :  { %5102 = vmatmul.msk.bf16.gmra.mxu2 %vm1007_vm4, %v2046_v16  ;;  %v2599_v37 = vadd.f32 %v2461_v47, %v2345_v43  ;;  %v1587_v63 = vpop.f32.mrf.mxu1  ;;  %v6771_v42 = vadd.f32 %v2754_v10, %v2597_v45  ;;  %v1865_v45 = vsel %vm6184_vm7, %v1863_v4, %v1864_v0  ;;  %v6782_v16 = vpack.c.b16 %v2699_v29, %v2698_v49  ;;  %v5372_v4 = vld [vmem:[%s8354_s0 + $0xf0] sm:$0xff] }
 0x1a6   :  { %v2001_v41 = vunpack.c.l.b16 %v1865_v45  ;;  %v1588_v10 = vadd.f32 %v1587_v63, %v6516_v2  ;;  %v5437_v49 = vld [vmem:[%s8354_s0 + $0xf0] sm:$0xf] }
 0x1a7   :  { %v5071_v29 = vrot.slane %v5437_v49, 9 }
 0x1a8   :  { %v2210_v56 = vpop.f32.mrf.mxu2  ;;  %v6790_v0 = vpack.c.b16 %v2001_v41, %v2000_v26 }
 0x1a9   :  { %v2346_v39 = vadd.f32 %v2210_v56, %v1586_v3  ;;  %5143 = vmatmul.msk.bf16.gmra.mxu3 %vm1007_vm4, %v5371_v9 }
 0x1ac   :  { %v2464_v43 = vpop.f32.mrf.mxu3  ;;  %v2757_v58 = vpop.f32.mrf.mxu0 }
 0x1ad   :  { %v2600_v47 = vadd.f32 %v2464_v43, %v2346_v39  ;;  %v1590_v18 = vpop.f32.mrf.mxu1  ;;  %v6784_v33 = vadd.f32 %v2757_v58, %v2598_v40  ;;  %v5436_v40 = vld [vmem:[%s8354_s0 + $0xf8] sm:$0x1]  ;;  %v1870_v39 = vrot.slane %v1868_v17, 4  ;;  %v1869_v58 = vsel %vm6184_vm7, %v5071_v29, %v1868_v17 }
 0x1ae   :  { %v1871_v20 = vrot.slane %v5436_v40, 5  ;;  %v1591_v14 = vadd.f32 %v1590_v18, %v6529_v60 }
 0x1af   :  { %5175 = vmatmul.msk.bf16.gmra.mxu0 %vm1007_vm4, %v6782_v16 }
 0x1b0   :  { %v2212_v54 = vpop.f32.mrf.mxu2  ;;  %5038 = vmatmul.msk.bf16.gmra.mxu1 %vm1007_vm4, %v5371_v9  ;;  %v1872_v26 = vsel %vm6184_vm7, %v1870_v39, %v1871_v20  ;;  %v5438_v20 = vld [vmem:[%s8354_s0 + $0x100] sm:$0xf] }
 0x1b1   :  { %v2347_v13 = vadd.f32 %v2212_v54, %v1588_v10  ;;  %v2002_v10 = vunpack.c.l.b16 %v1869_v58  ;;  %v2003_v54 = vunpack.c.l.b16 %v1872_v26 }
 0x1b4   :  { %v2466_v2 = vpop.f32.mrf.mxu3  ;;  %v2759_v9 = vpop.f32.mrf.mxu0 }
 0x1b5   :  { %5103 = vmatmul.msk.bf16.gmra.mxu2 %vm1007_vm4, %v6790_v0  ;;  %v2601_v63 = vadd.f32 %v2466_v2, %v2347_v13  ;;  %v1592_v3 = vpop.f32.mrf.mxu1  ;;  %v6803_v56 = vadd.f32 %v2759_v9, %v2599_v37  ;;  %v6820_v2 = vpack.c.b16 %v2003_v54, %v2002_v10  ;;  %v1875_v9 = vrot.slane %v5438_v20, 5 }
 0x1b6   :  { %v1593_v60 = vadd.f32 %v1592_v3, %v6542_v48 }
 0x1b8   :  { %v2215_v45 = vpop.f32.mrf.mxu2 }
 0x1b9   :  { %v2348_v43 = vadd.f32 %v2215_v45, %v1591_v14  ;;  %5144 = vmatmul.msk.bf16.gmra.mxu3 %vm1007_vm4, %v5372_v4  ;;  %v5440_v14 = vld [vmem:[%s8354_s0 + $0xfc] sm:$0xf] }
 0x1ba   :  { %v5072_v45 = vrot.slane %v5440_v14, 9 }
 0x1bc   :  { %v2469_v37 = vpop.f32.mrf.mxu3  ;;  %v2762_v41 = vpop.f32.mrf.mxu0 }
 0x1bd   :  { %v2602_v13 = vadd.f32 %v2469_v37, %v2348_v43  ;;  %v1595_v12 = vpop.f32.mrf.mxu1  ;;  %v6814_v40 = vadd.f32 %v2762_v41, %v2600_v47  ;;  %v5439_v47 = vld [vmem:[%s8354_s0 + $0x104] sm:$0x1]  ;;  %v1877_v43 = vrot.slane %v1875_v9, 4  ;;  %v1876_v41 = vsel %vm6184_vm7, %v5072_v45, %v1875_v9  ;;  %v5374_v45 = vld [vmem:[%s8354_s0 + $0x108] sm:$0xff] }
 0x1be   :  { %v1878_v49 = vrot.slane %v5439_v47, 5  ;;  %v1596_v58 = vadd.f32 %v1595_v12, %v6115_v22 }
 0x1bf   :  { %5176 = vmatmul.msk.bf16.gmra.mxu0 %vm1007_vm4, %v6123_v50  ;;  %v5373_v50 = vld [vmem:[%s8354_s0 + $0xfc] sm:$0xff] }
 0x1c0   :  { %v2217_v18 = vpop.f32.mrf.mxu2  ;;  %5039 = vmatmul.msk.bf16.gmra.mxu1 %vm1007_vm4, %v5372_v4  ;;  %v1879_v10 = vsel %vm6184_vm7, %v1877_v43, %v1878_v49  ;;  %v5441_v49 = vld [vmem:[%s8354_s0 + $0x10c] sm:$0xf] }
 0x1c1   :  { %v2349_v17 = vadd.f32 %v2217_v18, %v1593_v60  ;;  %v2004_v60 = vunpack.c.l.b16 %v1876_v41  ;;  %v2005_v18 = vunpack.c.l.b16 %v1879_v10 }
 0x1c4   :  { %v2471_v48 = vpop.f32.mrf.mxu3  ;;  %v2764_v4 = vpop.f32.mrf.mxu0 }
 0x1c5   :  { %5104 = vmatmul.msk.bf16.gmra.mxu2 %vm1007_vm4, %v6820_v2  ;;  %v2603_v3 = vadd.f32 %v2471_v48, %v2349_v17  ;;  %v1597_v29 = vpop.f32.mrf.mxu1  ;;  %v6833_v39 = vadd.f32 %v2764_v4, %v2601_v63  ;;  %v6850_v48 = vpack.c.b16 %v2005_v18, %v2004_v60  ;;  %v1882_v4 = vrot.slane %v5441_v49, 5 }
 0x1c6   :  { %v1598_v22 = vadd.f32 %v1597_v29, %v6163_v53 }
 0x1c7   :  { %v1884_v41 = vrot.slane %v1882_v4, 4 }
 0x1c8   :  { %v2220_v26 = vpop.f32.mrf.mxu2 }
 0x1c9   :  { %v2350_v37 = vadd.f32 %v2220_v26, %v1596_v58  ;;  %5145 = vmatmul.msk.bf16.gmra.mxu3 %vm1007_vm4, %v5373_v50  ;;  %v5443_v26 = vld [vmem:[%s8354_s0 + $0x108] sm:$0xf] }
 0x1cc   :  { %v2474_v63 = vpop.f32.mrf.mxu3  ;;  %v2767_v54 = vpop.f32.mrf.mxu0 }
 0x1cd   :  { %v2604_v17 = vadd.f32 %v2474_v63, %v2350_v37  ;;  %v1600_v20 = vpop.f32.mrf.mxu1  ;;  %v6844_v47 = vadd.f32 %v2767_v54, %v2602_v13  ;;  %v5442_v13 = vld [vmem:[%s8354_s0 + $0x110] sm:$0x1]  ;;  %v5073_v37 = vrot.slane %v5443_v26, 9 }
 0x1ce   :  { %v1885_v14 = vrot.slane %v5442_v13, 5  ;;  %v1601_v10 = vadd.f32 %v1600_v20, %v6216_v51 }
 0x1cf   :  { %5177 = vmatmul.msk.bf16.gmra.mxu0 %vm1007_vm4, %v5664_v31  ;;  %v1883_v60 = vsel %vm6184_vm7, %v5073_v37, %v1882_v4 }
 0x1d0   :  { %v2222_v12 = vpop.f32.mrf.mxu2  ;;  %5040 = vmatmul.msk.bf16.gmra.mxu1 %vm1007_vm4, %v5373_v50  ;;  %v1886_v18 = vsel %vm6184_vm7, %v1884_v41, %v1885_v14  ;;  %v5444_v14 = vld [vmem:[%s8354_s0 + $0x118] sm:$0xf] }
 0x1d1   :  { %v2351_v9 = vadd.f32 %v2222_v12, %v1598_v22  ;;  %v2006_v12 = vunpack.c.l.b16 %v1883_v60  ;;  %v1889_v26 = vrot.slane %v5444_v14, 5  ;;  %v5375_v41 = vld [vmem:[%s8354_s0 + $0x114] sm:$0xff] }
 0x1d4   :  { %v2476_v53 = vpop.f32.mrf.mxu3  ;;  %v2769_v50 = vpop.f32.mrf.mxu0 }
 0x1d5   :  { %5105 = vmatmul.msk.bf16.gmra.mxu2 %vm1007_vm4, %v6850_v48  ;;  %v2605_v29 = vadd.f32 %v2476_v53, %v2351_v9  ;;  %v1602_v43 = vpop.f32.mrf.mxu1  ;;  %v6863_v58 = vadd.f32 %v2769_v50, %v2603_v3  ;;  %v2007_v9 = vunpack.c.l.b16 %v1886_v18  ;;  %v1891_v18 = vrot.slane %v1889_v26, 4 }
 0x1d6   :  { %v1603_v51 = vadd.f32 %v1602_v43, %v6239_v62 }
 0x1d7   :  { %v6880_v50 = vpack.c.b16 %v2007_v9, %v2006_v12 }
 0x1d8   :  { %v2225_v63 = vpop.f32.mrf.mxu2 }
 0x1d9   :  { %v2352_v54 = vadd.f32 %v2225_v63, %v1601_v10  ;;  %5146 = vmatmul.msk.bf16.gmra.mxu3 %vm1007_vm4, %v5374_v45 }
 0x1dc   :  { %v2479_v3 = vpop.f32.mrf.mxu3  ;;  %v2772_v22 = vpop.f32.mrf.mxu0 }
 0x1dd   :  { %v2606_v49 = vadd.f32 %v2479_v3, %v2352_v54  ;;  %v1605_v13 = vpop.f32.mrf.mxu1  ;;  %v6874_v53 = vadd.f32 %v2772_v22, %v2604_v17  ;;  %v5445_v17 = vld [vmem:[%s8354_s0 + $0x11c] sm:$0x1]  ;;  %v5446_v54 = vld [vmem:[%s8354_s0 + $0x114] sm:$0xf] }
 0x1de   :  { %v1892_v37 = vrot.slane %v5445_v17, 5  ;;  %v5074_v60 = vrot.slane %v5446_v54, 9  ;;  %v1606_v3 = vadd.f32 %v1605_v13, %v6264_v5 }
 0x1df   :  { %5178 = vmatmul.msk.bf16.gmra.mxu0 %vm1007_vm4, %v5712_v36 }
 0x1e0   :  { %v2227_v20 = vpop.f32.mrf.mxu2  ;;  %5041 = vmatmul.msk.bf16.gmra.mxu1 %vm1007_vm4, %v5374_v45  ;;  %v1890_v9 = vsel %vm6184_vm7, %v5074_v60, %v1889_v26 }
 0x1e1   :  { %v2353_v4 = vadd.f32 %v2227_v20, %v1603_v51  ;;  %v1893_v51 = vsel %vm6184_vm7, %v1891_v18, %v1892_v37  ;;  %v5447_v37 = vld [vmem:[%s8354_s0 + $0x124] sm:$0xf] }
 0x1e2   :  { %v2009_v14 = vunpack.c.l.b16 %v1893_v51  ;;  %v1896_v60 = vrot.slane %v5447_v37, 5 }
 0x1e4   :  { %v2481_v62 = vpop.f32.mrf.mxu3  ;;  %v2774_v45 = vpop.f32.mrf.mxu0 }
 0x1e5   :  { %5106 = vmatmul.msk.bf16.gmra.mxu2 %vm1007_vm4, %v6880_v50  ;;  %v2607_v43 = vadd.f32 %v2481_v62, %v2353_v4  ;;  %v1607_v10 = vpop.f32.mrf.mxu1  ;;  %v6893_v63 = vadd.f32 %v2774_v45, %v2605_v29  ;;  %v2008_v4 = vunpack.c.l.b16 %v1890_v9  ;;  %v5449_v9 = vld [vmem:[%s8354_s0 + $0x120] sm:$0xf] }
 0x1e6   :  { %v1608_v5 = vadd.f32 %v1607_v10, %v6280_v23  ;;  %v5075_v51 = vrot.slane %v5449_v9, 9 }
 0x1e7   :  { %v6910_v54 = vpack.c.b16 %v2009_v14, %v2008_v4 }
 0x1e8   :  { %v2230_v22 = vpop.f32.mrf.mxu2 }
 0x1e9   :  { %v2354_v12 = vadd.f32 %v2230_v22, %v1606_v3  ;;  %5147 = vmatmul.msk.bf16.gmra.mxu3 %vm1007_vm4, %v5375_v41  ;;  %v5376_v3 = vld [vmem:[%s8354_s0 + $0x120] sm:$0xff] }
 0x1ec   :  { %v2484_v29 = vpop.f32.mrf.mxu3  ;;  %v2777_v20 = vpop.f32.mrf.mxu0 }
 0x1ed   :  { %v2608_v17 = vadd.f32 %v2484_v29, %v2354_v12  ;;  %v1610_v62 = vpop.f32.mrf.mxu1  ;;  %v6904_v45 = vadd.f32 %v2777_v20, %v2606_v49  ;;  %v5448_v49 = vld [vmem:[%s8354_s0 + $0x128] sm:$0x1]  ;;  %v1898_v29 = vrot.slane %v1896_v60, 4  ;;  %v8508_v20 = vld [vmem:[#allocation32_spill] sm:$0xff] }
 0x1ee   :  { %v1899_v18 = vrot.slane %v5448_v49, 5  ;;  %v1611_v4 = vadd.f32 %v1610_v62, %v8508_v20 }
 0x1ef   :  { %8506 = vst [vmem:[#allocation76_spill] sm:$0xff] %v6904_v45  ;;  %5179 = vmatmul.msk.bf16.gmra.mxu0 %vm1007_vm4, %v5763_v44  ;;  %v8510_v45 = vld [vmem:[#allocation36_spill] sm:$0xff] }
 0x1f0   :  { %v2232_v13 = vpop.f32.mrf.mxu2  ;;  %5042 = vmatmul.msk.bf16.gmra.mxu1 %vm1007_vm4, %v5375_v41 }
 0x1f1   :  { %v2355_v26 = vadd.f32 %v2232_v13, %v1608_v5  ;;  %v1897_v13 = vsel %vm6184_vm7, %v5075_v51, %v1896_v60 }
 0x1f2   :  { %v2010_v49 = vunpack.c.l.b16 %v1897_v13 }
 0x1f4   :  { %v2486_v23 = vpop.f32.mrf.mxu3  ;;  %v2779_v41 = vpop.f32.mrf.mxu0 }
 0x1f5   :  { %5107 = vmatmul.msk.bf16.gmra.mxu2 %vm1007_vm4, %v6910_v54  ;;  %v2609_v10 = vadd.f32 %v2486_v23, %v2355_v26  ;;  %v1612_v22 = vpop.f32.mrf.mxu1  ;;  %v6923_v12 = vadd.f32 %v2779_v41, %v2607_v43  ;;  %v1900_v26 = vsel %vm6184_vm7, %v1898_v29, %v1899_v18  ;;  %v5450_v18 = vld [vmem:[%s8354_s0 + $0x130] sm:$0xf] }
 0x1f6   :  { %v2011_v23 = vunpack.c.l.b16 %v1900_v26  ;;  %v1613_v62 = vadd.f32 %v1612_v22, %v8510_v45  ;;  %v1903_v29 = vrot.slane %v5450_v18, 5 }
 0x1f7   :  { %8507 = vst [vmem:[#allocation77_spill] sm:$0xff] %v6923_v12 }
 0x1f8   :  { %v2235_v14 = vpop.f32.mrf.mxu2  ;;  %v6940_v51 = vpack.c.b16 %v2011_v23, %v2010_v49  ;;  %v1905_v49 = vrot.slane %v1903_v29, 4  ;;  %v8514_v23 = vld [vmem:[#allocation40_spill] sm:$0xff] }
 0x1f9   :  { %v2356_v5 = vadd.f32 %v2235_v14, %v1611_v4  ;;  %5148 = vmatmul.msk.bf16.gmra.mxu3 %vm1007_vm4, %v5376_v3  ;;  %v8511_v4 = vld [vmem:[#allocation9_spill] sm:$0xff] }
 0x1fa   :  { %8512 = vst [vmem:[#allocation36_spill] sm:$0xff] %v6940_v51 }
 0x1fc   :  { %v2489_v43 = vpop.f32.mrf.mxu3  ;;  %v2782_v37 = vpop.f32.mrf.mxu0 }
 0x1fd   :  { %v2610_v41 = vadd.f32 %v2489_v43, %v2356_v5  ;;  %v1615_v12 = vpop.f32.mrf.mxu1  ;;  %v6934_v9 = vadd.f32 %v2782_v37, %v2608_v17  ;;  %v5451_v17 = vld [vmem:[%s8354_s0 + $0x134] sm:$0x1]  ;;  %v5377_v5 = vld [vmem:[%s8354_s0 + $0x12c] sm:$0xff] }
 0x1fe   :  { %v1906_v14 = vrot.slane %v5451_v17, 5  ;;  %v5452_v43 = vld [vmem:[%s8354_s0 + $0x12c] sm:$0xf] }
 0x1ff   :  { %8509 = vst [vmem:[#allocation32_spill] sm:$0xff] %v6934_v9  ;;  %5180 = vmatmul.msk.bf16.gmra.mxu0 %vm1007_vm4, %v8511_v4  ;;  %v5076_v37 = vrot.slane %v5452_v43, 9 }
 0x200   :  { %v2237_v20 = vpop.f32.mrf.mxu2  ;;  %5043 = vmatmul.msk.bf16.gmra.mxu1 %vm1007_vm4, %v5376_v3  ;;  %v1907_v17 = vsel %vm6184_vm7, %v1905_v49, %v1906_v14  ;;  %v5453_v14 = vld [vmem:[%s8354_s0 + $0x13c] sm:$0xf] }
 0x201   :  { %v2357_v60 = vadd.f32 %v2237_v20, %v1613_v62  ;;  %v1616_v62 = vadd.f32 %v1615_v12, %v8514_v23  ;;  %v1910_v49 = vrot.slane %v5453_v14, 5 }
 0x204   :  { %v2491_v45 = vpop.f32.mrf.mxu3  ;;  %v2784_v3 = vpop.f32.mrf.mxu0 }
 0x205   :  { %5108 = vmatmul.msk.bf16.gmra.mxu2 %vm1007_vm4, %v6940_v51  ;;  %v2611_v22 = vadd.f32 %v2491_v45, %v2357_v60  ;;  %v1617_v13 = vpop.f32.mrf.mxu1  ;;  %v6953_v26 = vadd.f32 %v2784_v3, %v2609_v10  ;;  %v1904_v60 = vsel %vm6184_vm7, %v5076_v37, %v1903_v29 }
 0x206   :  { %v2012_v3 = vunpack.c.l.b16 %v1904_v60  ;;  %v1618_v12 = vadd.f32 %v1617_v13, %v6376_v28 }
 0x207   :  { %8513 = vst [vmem:[#allocation9_spill] sm:$0xff] %v6953_v26  ;;  %v2013_v26 = vunpack.c.l.b16 %v1907_v17  ;;  %v5455_v17 = vld [vmem:[%s8354_s0 + $0x138] sm:$0xf] }
 0x208   :  { %v2240_v20 = vpop.f32.mrf.mxu2 }
 0x209   :  { %v2358_v18 = vadd.f32 %v2240_v20, %v1616_v62  ;;  %5149 = vmatmul.msk.bf16.gmra.mxu3 %vm1007_vm4, %v5377_v5  ;;  %v8516_v62 = vld [vmem:[#allocation13_spill] sm:$0xff]  ;;  %v6970_v37 = vpack.c.b16 %v2013_v26, %v2012_v3 }
 0x20a   :  { %v5378_v26 = vld [vmem:[%s8354_s0 + $0x138] sm:$0xff] }
 0x20c   :  { %v2494_v10 = vpop.f32.mrf.mxu3  ;;  %v2787_v45 = vpop.f32.mrf.mxu0 }
 0x20d   :  { %v2612_v9 = vadd.f32 %v2494_v10, %v2358_v18  ;;  %v1620_v51 = vpop.f32.mrf.mxu1  ;;  %v6964_v43 = vadd.f32 %v2787_v45, %v2610_v41  ;;  %v5454_v41 = vld [vmem:[%s8354_s0 + $0x140] sm:$0x1]  ;;  %v5077_v10 = vrot.slane %v5455_v17, 9  ;;  %v1912_v45 = vrot.slane %v1910_v49, 4 }
 0x20e   :  { %v1913_v20 = vrot.slane %v5454_v41, 5  ;;  %v1621_v3 = vadd.f32 %v1620_v51, %v6392_v25 }
 0x20f   :  { %8515 = vst [vmem:[#allocation40_spill] sm:$0xff] %v6964_v43  ;;  %5181 = vmatmul.msk.bf16.gmra.mxu0 %vm1007_vm4, %v8516_v62 }
 0x210   :  { %v2242_v23 = vpop.f32.mrf.mxu2  ;;  %5044 = vmatmul.msk.bf16.gmra.mxu1 %vm1007_vm4, %v5377_v5  ;;  %v1914_v14 = vsel %vm6184_vm7, %v1912_v45, %v1913_v20  ;;  %v5456_v20 = vld [vmem:[%s8354_s0 + $0x148] sm:$0xf] }
 0x211   :  { %v2359_v29 = vadd.f32 %v2242_v23, %v1618_v12  ;;  %v1917_v45 = vrot.slane %v5456_v20, 5 }
 0x214   :  { %v2496_v28 = vpop.f32.mrf.mxu3  ;;  %v2789_v5 = vpop.f32.mrf.mxu0 }
 0x215   :  { %5109 = vmatmul.msk.bf16.gmra.mxu2 %vm1007_vm4, %v6970_v37  ;;  %v2613_v13 = vadd.f32 %v2496_v28, %v2359_v29  ;;  %v1622_v18 = vpop.f32.mrf.mxu1  ;;  %v6983_v60 = vadd.f32 %v2789_v5, %v2611_v22  ;;  %v1911_v29 = vsel %vm6184_vm7, %v5077_v10, %v1910_v49  ;;  %v2015_v5 = vunpack.c.l.b16 %v1914_v14 }
 0x216   :  { %v2014_v28 = vunpack.c.l.b16 %v1911_v29  ;;  %v1623_v25 = vadd.f32 %v1622_v18, %v6410_v32 }
 0x217   :  { %8517 = vst [vmem:[#allocation13_spill] sm:$0xff] %v6983_v60 }
 0x218   :  { %v2245_v12 = vpop.f32.mrf.mxu2  ;;  %v7000_v10 = vpack.c.b16 %v2015_v5, %v2014_v28  ;;  %v1919_v28 = vrot.slane %v1917_v45, 4 }
 0x219   :  { %v2360_v23 = vadd.f32 %v2245_v12, %v1621_v3  ;;  %5150 = vmatmul.msk.bf16.gmra.mxu3 %vm1007_vm4, %v5378_v26  ;;  %v8519_v3 = vld [vmem:[#allocation16_spill] sm:$0xff] }
 0x21a   :  { %8520 = vst [vmem:[#allocation16_spill] sm:$0xff] %v7000_v10 }
 0x21c   :  { %v2499_v22 = vpop.f32.mrf.mxu3  ;;  %v2792_v41 = vpop.f32.mrf.mxu0 }
 0x21d   :  { %v2614_v60 = vadd.f32 %v2499_v22, %v2360_v23  ;;  %v1625_v43 = vpop.f32.mrf.mxu1  ;;  %v6994_v17 = vadd.f32 %v2792_v41, %v2612_v9  ;;  %v5457_v9 = vld [vmem:[%s8354_s0 + $0x14c] sm:$0x1]  ;;  %v5379_v23 = vld [vmem:[%s8354_s0 + $0x144] sm:$0xff] }
 0x21e   :  { %v1920_v12 = vrot.slane %v5457_v9, 5  ;;  %v5458_v22 = vld [vmem:[%s8354_s0 + $0x144] sm:$0xf]  ;;  %v1626_v5 = vadd.f32 %v1625_v43, %v6431_v55 }
 0x21f   :  { %8518 = vst [vmem:[#allocation78_spill] sm:$0xff] %v6994_v17  ;;  %5182 = vmatmul.msk.bf16.gmra.mxu0 %vm1007_vm4, %v8519_v3  ;;  %v5078_v41 = vrot.slane %v5458_v22, 9 }
 0x220   :  { %v2247_v51 = vpop.f32.mrf.mxu2  ;;  %5045 = vmatmul.msk.bf16.gmra.mxu1 %vm1007_vm4, %v5378_v26  ;;  %v1921_v20 = vsel %vm6184_vm7, %v1919_v28, %v1920_v12  ;;  %v5459_v12 = vld [vmem:[%s8354_s0 + $0x154] sm:$0xf] }
 0x221   :  { %v2361_v49 = vadd.f32 %v2247_v51, %v1623_v25  ;;  %v1924_v28 = vrot.slane %v5459_v12, 5 }
 0x224   :  { %v2501_v32 = vpop.f32.mrf.mxu3  ;;  %v2794_v26 = vpop.f32.mrf.mxu0 }
 0x225   :  { %5110 = vmatmul.msk.bf16.gmra.mxu2 %vm1007_vm4, %v7000_v10  ;;  %v2615_v18 = vadd.f32 %v2501_v32, %v2361_v49  ;;  %v1627_v29 = vpop.f32.mrf.mxu1  ;;  %v7013_v14 = vadd.f32 %v2794_v26, %v2613_v13  ;;  %v1918_v49 = vsel %vm6184_vm7, %v5078_v41, %v1917_v45  ;;  %v2017_v26 = vunpack.c.l.b16 %v1921_v20 }
 0x226   :  { %v2016_v32 = vunpack.c.l.b16 %v1918_v49  ;;  %v1628_v55 = vadd.f32 %v1627_v29, %v6450_v38 }
 0x227   :  { %8521 = vst [vmem:[#allocation79_spill] sm:$0xff] %v7013_v14 }
 0x228   :  { %v2250_v25 = vpop.f32.mrf.mxu2  ;;  %v7030_v41 = vpack.c.b16 %v2017_v26, %v2016_v32  ;;  %v1926_v32 = vrot.slane %v1924_v28, 4 }
 0x229   :  { %v2362_v51 = vadd.f32 %v2250_v25, %v1626_v5  ;;  %5151 = vmatmul.msk.bf16.gmra.mxu3 %vm1007_vm4, %v5379_v23  ;;  %v8523_v5 = vld [vmem:[#allocation19_spill] sm:$0xff] }
 0x22a   :  { %8524 = vst [vmem:[#allocation81_spill] sm:$0xff] %v7030_v41 }
 0x22c   :  { %v2504_v13 = vpop.f32.mrf.mxu3  ;;  %v2797_v9 = vpop.f32.mrf.mxu0 }
 0x22d   :  { %v2616_v14 = vadd.f32 %v2504_v13, %v2362_v51  ;;  %v1630_v17 = vpop.f32.mrf.mxu1  ;;  %v7024_v22 = vadd.f32 %v2797_v9, %v2614_v60  ;;  %v5460_v60 = vld [vmem:[%s8354_s0 + $0x158] sm:$0x1]  ;;  %v5380_v51 = vld [vmem:[%s8354_s0 + $0x150] sm:$0xff] }
 0x22e   :  { %v1927_v25 = vrot.slane %v5460_v60, 5  ;;  %v5461_v13 = vld [vmem:[%s8354_s0 + $0x150] sm:$0xf]  ;;  %v1631_v26 = vadd.f32 %v1630_v17, %v6470_v7 }
 0x22f   :  { %8522 = vst [vmem:[#allocation80_spill] sm:$0xff] %v7024_v22  ;;  %5183 = vmatmul.msk.bf16.gmra.mxu0 %vm1007_vm4, %v8523_v5  ;;  %v5079_v9 = vrot.slane %v5461_v13, 9 }
 0x230   :  { %v2252_v43 = vpop.f32.mrf.mxu2  ;;  %5046 = vmatmul.msk.bf16.gmra.mxu1 %vm1007_vm4, %v5379_v23  ;;  %v1928_v12 = vsel %vm6184_vm7, %v1926_v32, %v1927_v25  ;;  %v5462_v25 = vld [vmem:[%s8354_s0 + $0x160] sm:$0xf] }
 0x231   :  { %v2363_v45 = vadd.f32 %v2252_v43, %v1628_v55  ;;  %v1931_v32 = vrot.slane %v5462_v25, 5 }
 0x234   :  { %v2506_v38 = vpop.f32.mrf.mxu3  ;;  %v2799_v23 = vpop.f32.mrf.mxu0 }
 0x235   :  { %5111 = vmatmul.msk.bf16.gmra.mxu2 %vm1007_vm4, %v7030_v41  ;;  %v2617_v29 = vadd.f32 %v2506_v38, %v2363_v45  ;;  %v1632_v49 = vpop.f32.mrf.mxu1  ;;  %v7043_v20 = vadd.f32 %v2799_v23, %v2615_v18  ;;  %v1925_v45 = vsel %vm6184_vm7, %v5079_v9, %v1924_v28  ;;  %v2019_v23 = vunpack.c.l.b16 %v1928_v12  ;;  %v8527_v41 = vld [vmem:[#allocation59_spill] sm:$0xff] }
 0x236   :  { %v2018_v38 = vunpack.c.l.b16 %v1925_v45  ;;  %v1633_v7 = vadd.f32 %v1632_v49, %v8527_v41 }
 0x237   :  { %8525 = vst [vmem:[#allocation82_spill] sm:$0xff] %v7043_v20 }
 0x238   :  { %v2255_v55 = vpop.f32.mrf.mxu2  ;;  %v7060_v9 = vpack.c.b16 %v2019_v23, %v2018_v38  ;;  %v1933_v38 = vrot.slane %v1931_v32, 4  ;;  %v8531_v23 = vld [vmem:[#allocation23_spill] sm:$0xff] }
 0x239   :  { %v2364_v43 = vadd.f32 %v2255_v55, %v1631_v26  ;;  %5152 = vmatmul.msk.bf16.gmra.mxu3 %vm1007_vm4, %v5380_v51  ;;  %v8528_v26 = vld [vmem:[#allocation22_spill] sm:$0xff] }
 0x23a   :  { %8529 = vst [vmem:[#allocation59_spill] sm:$0xff] %v7060_v9 }
 0x23c   :  { %v2509_v18 = vpop.f32.mrf.mxu3  ;;  %v2802_v60 = vpop.f32.mrf.mxu0 }
 0x23d   :  { %v2618_v20 = vadd.f32 %v2509_v18, %v2364_v43  ;;  %v1635_v22 = vpop.f32.mrf.mxu1  ;;  %v7054_v13 = vadd.f32 %v2802_v60, %v2616_v14  ;;  %v5463_v14 = vld [vmem:[%s8354_s0 + $0x164] sm:$0x1]  ;;  %v5381_v43 = vld [vmem:[%s8354_s0 + $0x15c] sm:$0xff] }
 0x23e   :  { %v1934_v55 = vrot.slane %v5463_v14, 5  ;;  %v5464_v18 = vld [vmem:[%s8354_s0 + $0x15c] sm:$0xf] }
 0x23f   :  { %8526 = vst [vmem:[#allocation83_spill] sm:$0xff] %v7054_v13  ;;  %5184 = vmatmul.msk.bf16.gmra.mxu0 %vm1007_vm4, %v8528_v26  ;;  %v5080_v60 = vrot.slane %v5464_v18, 9  ;;  %v8533_v26 = vld [vmem:[#allocation26_spill] sm:$0xff] }
 0x240   :  { %v2257_v17 = vpop.f32.mrf.mxu2  ;;  %5047 = vmatmul.msk.bf16.gmra.mxu1 %vm1007_vm4, %v5380_v51  ;;  %v1935_v14 = vsel %vm6184_vm7, %v1933_v38, %v1934_v55  ;;  %v5465_v55 = vld [vmem:[%s8354_s0 + $0x16c] sm:$0xf] }
 0x241   :  { %v2365_v28 = vadd.f32 %v2257_v17, %v1633_v7  ;;  %v1636_v7 = vadd.f32 %v1635_v22, %v8531_v23  ;;  %v1938_v38 = vrot.slane %v5465_v55, 5 }
 0x244   :  { %v2511_v41 = vpop.f32.mrf.mxu3  ;;  %v2804_v51 = vpop.f32.mrf.mxu0 }
 0x245   :  { %5112 = vmatmul.msk.bf16.gmra.mxu2 %vm1007_vm4, %v7060_v9  ;;  %v2619_v49 = vadd.f32 %v2511_v41, %v2365_v28  ;;  %v1637_v45 = vpop.f32.mrf.mxu1  ;;  %v7073_v12 = vadd.f32 %v2804_v51, %v2617_v29  ;;  %v1932_v28 = vsel %vm6184_vm7, %v5080_v60, %v1931_v32 }
 0x246   :  { %v2020_v51 = vunpack.c.l.b16 %v1932_v28  ;;  %v1638_v22 = vadd.f32 %v1637_v45, %v8533_v26 }
 0x247   :  { %8530 = vst [vmem:[#allocation84_spill] sm:$0xff] %v7073_v12  ;;  %v2021_v12 = vunpack.c.l.b16 %v1935_v14  ;;  %v5467_v14 = vld [vmem:[%s8354_s0 + $0x168] sm:$0xf] }
 0x248   :  { %v2260_v17 = vpop.f32.mrf.mxu2 }
 0x249   :  { %v2366_v25 = vadd.f32 %v2260_v17, %v1636_v7  ;;  %5153 = vmatmul.msk.bf16.gmra.mxu3 %vm1007_vm4, %v5381_v43  ;;  %v8534_v7 = vld [vmem:[#allocation7_spill] sm:$0xff]  ;;  %v7090_v60 = vpack.c.b16 %v2021_v12, %v2020_v51 }
 0x24a   :  { %v5382_v12 = vld [vmem:[%s8354_s0 + $0x168] sm:$0xff] }
 0x24b   :  { %8535 = vst [vmem:[#allocation26_spill] sm:$0xff] %v7090_v60  ;;  %v8537_v51 = vld [vmem:[#allocation27_spill] sm:$0xff] }
 0x24c   :  { %v2514_v29 = vpop.f32.mrf.mxu3  ;;  %v2807_v41 = vpop.f32.mrf.mxu0 }
 0x24d   :  { %v2620_v13 = vadd.f32 %v2514_v29, %v2366_v25  ;;  %v1640_v9 = vpop.f32.mrf.mxu1  ;;  %v7084_v18 = vadd.f32 %v2807_v41, %v2618_v20  ;;  %v5466_v20 = vld [vmem:[%s8354_s0 + $0x170] sm:$0x1]  ;;  %v5081_v29 = vrot.slane %v5467_v14, 9  ;;  %v1940_v41 = vrot.slane %v1938_v38, 4 }
 0x24e   :  { %v1941_v17 = vrot.slane %v5466_v20, 5 }
 0x24f   :  { %8532 = vst [vmem:[#allocation23_spill] sm:$0xff] %v7084_v18  ;;  %5185 = vmatmul.msk.bf16.gmra.mxu0 %vm1007_vm4, %v8534_v7  ;;  %v8539_v7 = vld [vmem:[#allocation28_spill] sm:$0xff] }
 0x250   :  { %v2262_v23 = vpop.f32.mrf.mxu2  ;;  %5048 = vmatmul.msk.bf16.gmra.mxu1 %vm1007_vm4, %v5381_v43  ;;  %v1942_v20 = vsel %vm6184_vm7, %v1940_v41, %v1941_v17  ;;  %v5468_v17 = vld [vmem:[%s8354_s0 + $0x178] sm:$0xf] }
 0x251   :  { %v2367_v32 = vadd.f32 %v2262_v23, %v1638_v22  ;;  %v1641_v22 = vadd.f32 %v1640_v9, %v8537_v51  ;;  %v1945_v41 = vrot.slane %v5468_v17, 5 }
 0x254   :  { %v2516_v26 = vpop.f32.mrf.mxu3  ;;  %v2809_v43 = vpop.f32.mrf.mxu0 }
 0x255   :  { %5113 = vmatmul.msk.bf16.gmra.mxu2 %vm1007_vm4, %v7090_v60  ;;  %v2621_v45 = vadd.f32 %v2516_v26, %v2367_v32  ;;  %v1642_v25 = vpop.f32.mrf.mxu1  ;;  %v7103_v28 = vadd.f32 %v2809_v43, %v2619_v49  ;;  %v1939_v32 = vsel %vm6184_vm7, %v5081_v29, %v1938_v38 }
 0x256   :  { %v2022_v43 = vunpack.c.l.b16 %v1939_v32  ;;  %v1643_v9 = vadd.f32 %v1642_v25, %v8539_v7 }
 0x257   :  { %8536 = vst [vmem:[#allocation85_spill] sm:$0xff] %v7103_v28  ;;  %v2023_v28 = vunpack.c.l.b16 %v1942_v20  ;;  %v5470_v20 = vld [vmem:[%s8354_s0 + $0x174] sm:$0xf] }
 0x258   :  { %v2265_v23 = vpop.f32.mrf.mxu2 }
 0x259   :  { %v2368_v55 = vadd.f32 %v2265_v23, %v1641_v22  ;;  %5154 = vmatmul.msk.bf16.gmra.mxu3 %vm1007_vm4, %v5382_v12  ;;  %v8540_v22 = vld [vmem:[#allocation10_spill] sm:$0xff]  ;;  %v7120_v29 = vpack.c.b16 %v2023_v28, %v2022_v43  ;;  %v5383_v28 = vld [vmem:[%s8354_s0 + $0x174] sm:$0xff] }
 0x25a   :  { %v8543_v43 = vld [vmem:[#allocation30_spill] sm:$0xff] }
 0x25b   :  { %8541 = vst [vmem:[#allocation28_spill] sm:$0xff] %v7120_v29 }
 0x25c   :  { %v2519_v49 = vpop.f32.mrf.mxu3  ;;  %v2812_v26 = vpop.f32.mrf.mxu0 }
 0x25d   :  { %v2622_v18 = vadd.f32 %v2519_v49, %v2368_v55  ;;  %v1645_v60 = vpop.f32.mrf.mxu1  ;;  %v7114_v14 = vadd.f32 %v2812_v26, %v2620_v13  ;;  %v5469_v13 = vld [vmem:[%s8354_s0 + $0x17c] sm:$0x1]  ;;  %v5082_v49 = vrot.slane %v5470_v20, 9  ;;  %v1947_v26 = vrot.slane %v1945_v41, 4 }
 0x25e   :  { %v1948_v23 = vrot.slane %v5469_v13, 5 }
 0x25f   :  { %8538 = vst [vmem:[#allocation27_spill] sm:$0xff] %v7114_v14  ;;  %5186 = vmatmul.msk.bf16.gmra.mxu0 %vm1007_vm4, %v8540_v22  ;;  %v8545_v22 = vld [vmem:[#allocation33_spill] sm:$0xff] }
 0x260   :  { %v2267_v51 = vpop.f32.mrf.mxu2  ;;  %5049 = vmatmul.msk.bf16.gmra.mxu1 %vm1007_vm4, %v5382_v12  ;;  %v1949_v13 = vsel %vm6184_vm7, %v1947_v26, %v1948_v23  ;;  %v5471_v23 = vld [vmem:[%s8354_s0 + $0x184] sm:$0xf] }
 0x261   :  { %v2369_v38 = vadd.f32 %v2267_v51, %v1643_v9  ;;  %v1646_v9 = vadd.f32 %v1645_v60, %v8543_v43  ;;  %v1952_v26 = vrot.slane %v5471_v23, 5 }
 0x264   :  { %v2521_v7 = vpop.f32.mrf.mxu3  ;;  %v2814_v12 = vpop.f32.mrf.mxu0 }
 0x265   :  { %5114 = vmatmul.msk.bf16.gmra.mxu2 %vm1007_vm4, %v7120_v29  ;;  %v2623_v25 = vadd.f32 %v2521_v7, %v2369_v38  ;;  %v1647_v55 = vpop.f32.mrf.mxu1  ;;  %v7133_v32 = vadd.f32 %v2814_v12, %v2621_v45  ;;  %v1946_v38 = vsel %vm6184_vm7, %v5082_v49, %v1945_v41 }
 0x266   :  { %v2024_v12 = vunpack.c.l.b16 %v1946_v38  ;;  %v1648_v60 = vadd.f32 %v1647_v55, %v8545_v22 }
 0x267   :  { %8542 = vst [vmem:[#allocation86_spill] sm:$0xff] %v7133_v32  ;;  %v2025_v32 = vunpack.c.l.b16 %v1949_v13  ;;  %v5473_v13 = vld [vmem:[%s8354_s0 + $0x180] sm:$0xf] }
 0x268   :  { %v2270_v51 = vpop.f32.mrf.mxu2 }
 0x269   :  { %v2370_v17 = vadd.f32 %v2270_v51, %v1646_v9  ;;  %5155 = vmatmul.msk.bf16.gmra.mxu3 %vm1007_vm4, %v5383_v28  ;;  %v8546_v9 = vld [vmem:[#allocation14_spill] sm:$0xff]  ;;  %v7150_v49 = vpack.c.b16 %v2025_v32, %v2024_v12  ;;  %v8549_v12 = vld [vmem:[#allocation37_spill] sm:$0xff] }
 0x26a   :  { %v5384_v32 = vld [vmem:[%s8354_s0 + $0x180] sm:$0xff] }
 0x26b   :  { %8547 = vst [vmem:[#allocation33_spill] sm:$0xff] %v7150_v49 }
 0x26c   :  { %v2524_v45 = vpop.f32.mrf.mxu3  ;;  %v2817_v7 = vpop.f32.mrf.mxu0 }
 0x26d   :  { %v2624_v14 = vadd.f32 %v2524_v45, %v2370_v17  ;;  %v1650_v29 = vpop.f32.mrf.mxu1  ;;  %v7144_v20 = vadd.f32 %v2817_v7, %v2622_v18  ;;  %v5472_v18 = vld [vmem:[%s8354_s0 + $0x188] sm:$0x1]  ;;  %v5083_v45 = vrot.slane %v5473_v13, 9  ;;  %v1954_v7 = vrot.slane %v1952_v26, 4 }
 0x26e   :  { %v1955_v51 = vrot.slane %v5472_v18, 5 }
 0x26f   :  { %8544 = vst [vmem:[#allocation30_spill] sm:$0xff] %v7144_v20  ;;  %5187 = vmatmul.msk.bf16.gmra.mxu0 %vm1007_vm4, %v8546_v9  ;;  %v8551_v9 = vld [vmem:[#allocation41_spill] sm:$0xff] }
 0x270   :  { %v2272_v43 = vpop.f32.mrf.mxu2  ;;  %5050 = vmatmul.msk.bf16.gmra.mxu1 %vm1007_vm4, %v5383_v28  ;;  %v1956_v18 = vsel %vm6184_vm7, %v1954_v7, %v1955_v51  ;;  %v5474_v51 = vld [vmem:[%s8354_s0 + $0x190] sm:$0xf] }
 0x271   :  { %v2371_v41 = vadd.f32 %v2272_v43, %v1648_v60  ;;  %v1651_v60 = vadd.f32 %v1650_v29, %v8549_v12  ;;  %v1959_v7 = vrot.slane %v5474_v51, 5 }
 0x274   :  { %v2526_v22 = vpop.f32.mrf.mxu3  ;;  %v2819_v28 = vpop.f32.mrf.mxu0 }
 0x275   :  { %5115 = vmatmul.msk.bf16.gmra.mxu2 %vm1007_vm4, %v7150_v49  ;;  %v2625_v55 = vadd.f32 %v2526_v22, %v2371_v41  ;;  %v1652_v17 = vpop.f32.mrf.mxu1  ;;  %v7163_v38 = vadd.f32 %v2819_v28, %v2623_v25  ;;  %v1953_v41 = vsel %vm6184_vm7, %v5083_v45, %v1952_v26 }
 0x276   :  { %v2026_v28 = vunpack.c.l.b16 %v1953_v41  ;;  %v1653_v29 = vadd.f32 %v1652_v17, %v8551_v9  ;;  %v5227_v9 = vld [vmem:[%s8355_s1 + $0xc] sm:$0x3] }
 0x277   :  { %8548 = vst [vmem:[#allocation87_spill] sm:$0xff] %v7163_v38  ;;  %v2027_v38 = vunpack.c.l.b16 %v1956_v18  ;;  %v3231_v17 = vsel %vm1104_vm0, %v5227_v9, 0  ;;  %v5476_v18 = vld [vmem:[%s8354_s0 + $0x18c] sm:$0xf] }
 0x278   :  { %v2275_v43 = vpop.f32.mrf.mxu2  ;;  %3240 = vmatpush.bf16.msra.mxu2 %v3231_v17 }
 0x279   :  { %v2372_v23 = vadd.f32 %v2275_v43, %v1651_v60  ;;  %5156 = vmatmul.msk.bf16.gmra.mxu3 %vm1007_vm4, %v5384_v32  ;;  %v8552_v60 = vld [vmem:[#allocation17_spill] sm:$0xff]  ;;  %v7180_v45 = vpack.c.b16 %v2027_v38, %v2026_v28  ;;  %v5475_v38 = vld [vmem:[%s8354_s0 + $0x194] sm:$0x1] }
 0x27a   :  { %v1962_v43 = vrot.slane %v5475_v38, 5  ;;  %v8555_v38 = vld [vmem:[#allocation43_spill] sm:$0xff] }
 0x27b   :  { %8553 = vst [vmem:[#allocation41_spill] sm:$0xff] %v7180_v45 }
 0x27c   :  { %v2529_v25 = vpop.f32.mrf.mxu3  ;;  %v2822_v22 = vpop.f32.mrf.mxu0 }
 0x27d   :  { %v2626_v20 = vadd.f32 %v2529_v25, %v2372_v23  ;;  %v1655_v49 = vpop.f32.mrf.mxu1  ;;  %v7174_v13 = vadd.f32 %v2822_v22, %v2624_v14  ;;  %v5194_v14 = vld [vmem:[%s8355_s1 + $0xa] sm:$0x3]  ;;  %v5084_v25 = vrot.slane %v5476_v18, 9  ;;  %v5268_v22 = vld [vmem:[%s8355_s1 + $0xe] sm:$0x3] }
 0x27e   :  { %v3529_v9 = vsel %vm1104_vm0, %v5268_v22, 0 }
 0x27f   :  { %8550 = vst [vmem:[#allocation37_spill] sm:$0xff] %v7174_v13  ;;  %5188 = vmatmul.msk.bf16.gmra.mxu0 %vm1007_vm4, %v8552_v60  ;;  %v1656_v13 = vadd.f32 %v1655_v49, %v8555_v38  ;;  %3538 = vmatpush.bf16.msra.mxu3 %v3529_v9  ;;  %v8557_v49 = vld [vmem:[#allocation46_spill] sm:$0xff] }
 0x280   :  { %v2277_v12 = vpop.f32.mrf.mxu2  ;;  %5051 = vmatmul.msk.bf16.gmra.mxu1 %vm1007_vm4, %v5384_v32  ;;  %v2977_v32 = vsel %vm1104_vm0, %v5194_v14, 0  ;;  %v1961_v14 = vrot.slane %v1959_v7, 4 }
 0x281   :  { %v2373_v26 = vadd.f32 %v2277_v12, %v1653_v29  ;;  %2986 = vmatpush.bf16.msra.mxu1 %v2977_v32  ;;  %v5385_v29 = vld [vmem:[%s8354_s0 + $0x18c] sm:$0xff] }
 0x284   :  { %v2531_v23 = vpop.f32.mrf.mxu3  ;;  %v2824_v41 = vpop.f32.mrf.mxu0 }
 0x285   :  { %5116 = vmatmul.msk.bf16.gmra.mxu2 %vm1007_vm4, %v7180_v45  ;;  %v2627_v28 = vadd.f32 %v2531_v23, %v2373_v26  ;;  %v1657_v12 = vpop.f32.mrf.mxu1  ;;  %v7207_v51 = vadd.f32 %v2824_v41, %v2625_v55  ;;  %v1960_v26 = vsel %vm6184_vm7, %v5084_v25, %v1959_v7  ;;  %v1963_v23 = vsel %vm6184_vm7, %v1961_v14, %v1962_v43  ;;  %v131_v43 = vld [vmem:[%s8354_s0 + $0x198] sm:$0xf] }
 0x286   :  { %v2028_v41 = vunpack.c.l.b16 %v1960_v26  ;;  %v1658_v9 = vadd.f32 %v1657_v12, %v8557_v49  ;;  %v2676_v12 = vshll.u32 %v131_v43, 16 }
 0x287   :  { %8554 = vst [vmem:[#allocation88_spill] sm:$0xff] %v7207_v51  ;;  %v2029_v51 = vunpack.c.l.b16 %v1963_v23 }
 0x288   :  { %v2280_v32 = vpop.f32.mrf.mxu2 }
 0x289   :  { %v2374_v18 = vadd.f32 %v2280_v32, %v1656_v13  ;;  %5157 = vmatmul.msk.bf16.gmra.mxu3 %vm1007_vm4, %v5385_v29  ;;  %v8558_v13 = vld [vmem:[#allocation20_spill] sm:$0xff]  ;;  %v7222_v25 = vpack.c.b16 %v2029_v51, %v2028_v41  ;;  %v5386_v51 = vld [vmem:[%s8354_s0 + $0x198] sm:$0xff] }
 0x28a   :  { %v8561_v41 = vld [vmem:[#allocation48_spill] sm:$0xff] }
 0x28b   :  { %8559 = vst [vmem:[#allocation46_spill] sm:$0xff] %v7222_v25 }
 0x28c   :  { %v2534_v45 = vpop.f32.mrf.mxu3  ;;  %v2827_v55 = vpop.f32.mrf.mxu0 }
 0x28d   :  { %v2628_v17 = vadd.f32 %v2534_v45, %v2374_v18  ;;  %v1660_v60 = vpop.f32.mrf.mxu1  ;;  %v7216_v22 = vadd.f32 %v2827_v55, %v2626_v20  ;;  %v132_v20 = vld [vmem:[%s8354_s0 + $0x19c] sm:$0xf]  ;;  %v2673_v45 = vshrl.u32 %v131_v43, 16 }
 0x28e   :  { %v2682_v32 = vshll.u32 %v132_v20, 16  ;;  %v2686_v18 = vshrl.u32 %v132_v20, 16  ;;  %v1661_v49 = vadd.f32 %v1660_v60, %v8561_v41  ;;  %v8564_v41 = vld [vmem:[#allocation24_spill] sm:$0xff] }
 0x28f   :  { %8556 = vst [vmem:[#allocation43_spill] sm:$0xff] %v7216_v22  ;;  %5189 = vmatmul.msk.bf16.gmra.mxu0 %vm1007_vm4, %v8558_v13  ;;  %v2678_v13 = vrot.slane %v2676_v12, 5  ;;  %v8563_v12 = vld [vmem:[#allocation51_spill] sm:$0xff] }
 0x290   :  { %v2282_v38 = vpop.f32.mrf.mxu2  ;;  %5052 = vmatmul.msk.bf16.gmra.mxu1 %vm1007_vm4, %v5385_v29  ;;  %v2684_v10 = vrot.slane %v2682_v32, 5 }
 0x291   :  { %v2375_v7 = vadd.f32 %v2282_v38, %v1658_v9  ;;  %v2675_v38 = vrot.slane %v2673_v45, 4  ;;  %v5303_v45 = vld [vmem:[%s8355_s1 + $0x10] sm:$0x3] }
 0x294   :  { %v2536_v14 = vpop.f32.mrf.mxu3  ;;  %v2829_v29 = vpop.f32.mrf.mxu0 }
 0x295   :  { %5117 = vmatmul.msk.bf16.gmra.mxu2 %vm1007_vm4, %v7222_v25  ;;  %v2629_v26 = vadd.f32 %v2536_v14, %v2375_v7  ;;  %v1662_v23 = vpop.f32.mrf.mxu1  ;;  %v7235_v55 = vadd.f32 %v2829_v29, %v2627_v28  ;;  %v2688_v25 = vrot.slane %v2686_v18, 4  ;;  %v133_v7 = vld [vmem:[%s8354_s0 + $0x1a0] sm:$0x1]  ;;  %v2679_v14 = vor.u32 %v2678_v13, %v2675_v38  ;;  %v5477_v38 = vld [vmem:[%s8354_s0 + $0x18] sm:$0xff] }
 0x296   :  { %v2692_v28 = vshll.u32 %v133_v7, 16  ;;  %v1663_v32 = vadd.f32 %v1662_v23, %v8563_v12  ;;  %v3795_v18 = vsel %vm1104_vm0, %v5303_v45, 0  ;;  %vm4599_vm0 = vcmask 130048  }
 0x297   :  { %8560 = vst [vmem:[#allocation89_spill] sm:$0xff] %v7235_v55  ;;  %v2689_v5 = vor.u32 %v2688_v25, %v2684_v10  ;;  %3804 = vmatpush.bf16.msra.mxu0 %v3795_v18 }
 0x298   :  { %v2285_v9 = vpop.f32.mrf.mxu2 }
 0x299   :  { %v2376_v22 = vadd.f32 %v2285_v9, %v1661_v49  ;;  %5158 = vmatmul.msk.bf16.gmra.mxu3 %vm1007_vm4, %v5386_v51  ;;  %v8565_v49 = vld [vmem:[#allocation29_spill] sm:$0xff]  ;;  %v2690_v25 = vrot.slane %v2689_v5, 4  ;;  %v8566_v5 = vld [vmem:[#allocation54_spill] sm:$0xff] }
 0x29c   :  { %v2539_v43 = vpop.f32.mrf.mxu3  ;;  %v2832_v20 = vpop.f32.mrf.mxu0 }
 0x29d   :  { %v2630_v29 = vadd.f32 %v2539_v43, %v2376_v22  ;;  %v1665_v55 = vpop.f32.mrf.mxu1  ;;  %v7242_v60 = vadd.f32 %v2832_v20, %v2628_v17  ;;  %v2680_v22 = vrot.slane %v2679_v14, 4  ;;  %v2694_v17 = vrot.slane %v2692_v28, 5 }
 0x29e   :  { %v1666_v28 = vadd.f32 %v1665_v55, %v8566_v5  ;;  %v8571_v55 = vld [vmem:[#allocation34_spill] sm:$0xff] }
 0x29f   :  { %8562 = vst [vmem:[#allocation48_spill] sm:$0xff] %v7242_v60  ;;  %5190 = vmatmul.msk.bf16.gmra.mxu0 %vm1007_vm4, %v8564_v41  ;;  %v2685_v7 = vsel %vm5613_vm3, %v2680_v22, %v2684_v10  ;;  %v2695_v43 = vsel %vm5613_vm3, %v2690_v25, %v2694_v17 }
 0x2a0   :  { %v2287_v51 = vpop.f32.mrf.mxu2  ;;  %5195 = vmatmul.msk.bf16.vlgmr.msra.gmra.mxu1 %vm1007_vm4, %v8565_v49  ;;  %v2701_v18 = vunpack.c.l.b16 %v2695_v43  ;;  %v8567_v49 = vld [vmem:[#allocation6_spill] sm:$0xff] }
 0x2a1   :  { %v2377_v13 = vadd.f32 %v2287_v51, %v1663_v32  ;;  %v2700_v32 = vunpack.c.l.b16 %v2685_v7  ;;  %v5478_v7 = vld [vmem:[%s8354_s0 + $0x24] sm:$0xff] }
 0x2a4   :  { %v2541_v9 = vpop.f32.mrf.mxu3  ;;  %v2834_v23 = vpop.f32.mrf.mxu0 }
 0x2a5   :  { %5236 = vmatmul.msk.bf16.vlgmr.msra.gmra.mxu2 %vm1007_vm4, %v5477_v38  ;;  %v2631_v20 = vadd.f32 %v2541_v9, %v2377_v13  ;;  %v1667_v45 = vpop.f32.mrf.mxu1  ;;  %v7261_v14 = vadd.f32 %v2834_v23, %v2629_v26  ;;  %v7266_v38 = vpack.c.b16 %v2701_v18, %v2700_v32  ;;  %v8570_v13 = vld [vmem:[#allocation56_spill] sm:$0xff] }
 0x2a6   :  { %v1668_v26 = vadd.f32 %v1667_v45, %v8570_v13  ;;  %v8573_v45 = vld [vmem:[#allocation60_spill] sm:$0xff] }
 0x2a7   :  { %8568 = vst [vmem:[#allocation51_spill] sm:$0xff] %v7266_v38  ;;  %v8574_v18 = vld [vmem:[#allocation8_spill] sm:$0xff] }
 0x2a8   :  { %v2290_v12 = vpop.f32.mrf.mxu2 }
 0x2a9   :  { %v2378_v51 = vadd.f32 %v2290_v12, %v1666_v28  ;;  %5269 = vmatmul.msk.bf16.vlgmr.msra.gmra.mxu3 %vm1007_vm4, %v8567_v49 }
 0x2ac   :  { %v2544_v60 = vpop.f32.mrf.mxu3  ;;  %v2837_v10 = vpop.f32.mrf.mxu0 }
 0x2ad   :  { %v2632_v22 = vadd.f32 %v2544_v60, %v2378_v51  ;;  %v1670_v41 = vpop.f32.mrf.mxu1  ;;  %v7268_v25 = vadd.f32 %v2837_v10, %v2630_v29 }
 0x2ae   :  { %v1671_v28 = vadd.f32 %v1670_v41, %v8573_v45 }
 0x2af   :  { %8569 = vst [vmem:[#allocation29_spill] sm:$0xff] %v7268_v25  ;;  %5191 = vmatmul.msk.bf16.gmra.mxu0 %vm1007_vm4, %v7266_v38 }
 0x2b0   :  { %v2292_v17 = vpop.f32.mrf.mxu2  ;;  %5196 = vmatmul.msk.bf16.gmra.mxu1 %vm1007_vm4, %v8571_v55 }
 0x2b1   :  { %v2379_v9 = vadd.f32 %v2292_v17, %v1668_v26  ;;  %v8576_v17 = vld [vmem:[#allocation62_spill] sm:$0xff] }
 0x2b4   :  { %v2546_v23 = vpop.f32.mrf.mxu3  ;;  %v2839_v60 = vpop.f32.mrf.mxu0 }
 0x2b5   :  { %5237 = vmatmul.msk.bf16.gmra.mxu2 %vm1007_vm4, %v5478_v7  ;;  %v2633_v29 = vadd.f32 %v2546_v23, %v2379_v9  ;;  %v1672_v43 = vpop.f32.mrf.mxu1  ;;  %v7279_v5 = vadd.f32 %v2839_v60, %v2631_v20  ;;  %v8577_v9 = vld [vmem:[#allocation39_spill] sm:$0xff]  ;;  %v5479_v23 = vld [vmem:[%s8354_s0 + $0x30] sm:$0xff] }
 0x2b6   :  { %v1673_v7 = vadd.f32 %v1672_v43, %v8576_v17  ;;  %v8579_v43 = vld [vmem:[#allocation31_spill] sm:$0xff] }
 0x2b7   :  { %8572 = vst [vmem:[#allocation54_spill] sm:$0xff] %v7279_v5 }
 0x2b8   :  { %v2295_v12 = vpop.f32.mrf.mxu2 }
 0x2b9   :  { %v2380_v32 = vadd.f32 %v2295_v12, %v1671_v28  ;;  %5270 = vmatmul.msk.bf16.gmra.mxu3 %vm1007_vm4, %v8574_v18 }
 0x2bc   :  { %v2549_v51 = vpop.f32.mrf.mxu3  ;;  %v2842_v49 = vpop.f32.mrf.mxu0 }
 0x2bd   :  { %v2634_v10 = vadd.f32 %v2549_v51, %v2380_v32  ;;  %v1675_v13 = vpop.f32.mrf.mxu1  ;;  %v7284_v26 = vadd.f32 %v2842_v49, %v2632_v22  ;;  %v8580_v51 = vld [vmem:[#allocation11_spill] sm:$0xff] }
 0x2be   :  { %v1676_v12 = vadd.f32 %v1675_v13, %v8579_v43 }
 0x2bf   :  { %8575 = vst [vmem:[#allocation6_spill] sm:$0xff] %v7284_v26  ;;  %5304 = vmatmul.msk.bf16.vlgmr.msra.gmra.mxu0 %vm1007_vm4, %v8571_v55  ;;  %v8582_v26 = vld [vmem:[#allocation35_spill] sm:$0xff] }
 0x2c0   :  { %v2297_v25 = vpop.f32.mrf.mxu2  ;;  %5197 = vmatmul.msk.bf16.gmra.mxu1 %vm1007_vm4, %v8577_v9 }
 0x2c1   :  { %v2381_v41 = vadd.f32 %v2297_v25, %v1673_v7 }
 0x2c4   :  { %v2551_v20 = vpop.f32.mrf.mxu3  ;;  %v2844_v60 = vpop.f32.mrf.mxu0 }
 0x2c5   :  { %5238 = vmatmul.msk.bf16.gmra.mxu2 %vm1007_vm4, %v5479_v23  ;;  %v2635_v22 = vadd.f32 %v2551_v20, %v2381_v41  ;;  %v1677_v45 = vpop.f32.mrf.mxu1  ;;  %v7295_v28 = vadd.f32 %v2844_v60, %v2633_v29  ;;  %v8583_v41 = vld [vmem:[#allocation44_spill] sm:$0xff]  ;;  %v5480_v20 = vld [vmem:[%s8354_s0 + $0x3c] sm:$0xff] }
 0x2c6   :  { %v1678_v23 = vadd.f32 %v1677_v45, %v8582_v26  ;;  %v8585_v26 = vld [vmem:[#allocation38_spill] sm:$0xff] }
 0x2c7   :  { %8578 = vst [vmem:[#allocation56_spill] sm:$0xff] %v7295_v28 }
 0x2c8   :  { %v2300_v32 = vpop.f32.mrf.mxu2 }
 0x2c9   :  { %v2382_v18 = vadd.f32 %v2300_v32, %v1676_v12  ;;  %5271 = vmatmul.msk.bf16.gmra.mxu3 %vm1007_vm4, %v8580_v51  ;;  %v8586_v51 = vld [vmem:[#allocation15_spill] sm:$0xff] }
 0x2cc   :  { %v2554_v25 = vpop.f32.mrf.mxu3  ;;  %v2847_v55 = vpop.f32.mrf.mxu0 }
 0x2cd   :  { %v2636_v49 = vadd.f32 %v2554_v25, %v2382_v18  ;;  %v1680_v17 = vpop.f32.mrf.mxu1  ;;  %v7300_v7 = vadd.f32 %v2847_v55, %v2634_v10 }
 0x2ce   :  { %v1681_v45 = vadd.f32 %v1680_v17, %v8585_v26 }
 0x2cf   :  { %8581 = vst [vmem:[#allocation34_spill] sm:$0xff] %v7300_v7  ;;  %5305 = vmatmul.msk.bf16.gmra.mxu0 %vm1007_vm4, %v8577_v9  ;;  %v8588_v7 = vld [vmem:[#allocation42_spill] sm:$0xff] }
 0x2d0   :  { %v2302_v5 = vpop.f32.mrf.mxu2  ;;  %5198 = vmatmul.msk.bf16.gmra.mxu1 %vm1007_vm4, %v8583_v41 }
 0x2d1   :  { %v2383_v29 = vadd.f32 %v2302_v5, %v1678_v23 }
 0x2d4   :  { %v2556_v13 = vpop.f32.mrf.mxu3  ;;  %v2849_v60 = vpop.f32.mrf.mxu0 }
 0x2d5   :  { %5239 = vmatmul.msk.bf16.gmra.mxu2 %vm1007_vm4, %v5480_v20  ;;  %v2637_v10 = vadd.f32 %v2556_v13, %v2383_v29  ;;  %v1682_v43 = vpop.f32.mrf.mxu1  ;;  %v7311_v12 = vadd.f32 %v2849_v60, %v2635_v22  ;;  %v8589_v29 = vld [vmem:[#allocation49_spill] sm:$0xff]  ;;  %v5481_v13 = vld [vmem:[%s8354_s0 + $0x48] sm:$0xff] }
 0x2d6   :  { %v1683_v20 = vadd.f32 %v1682_v43, %v8588_v7  ;;  %v8591_v7 = vld [vmem:[#allocation45_spill] sm:$0xff] }
 0x2d7   :  { %8584 = vst [vmem:[#allocation60_spill] sm:$0xff] %v7311_v12 }
 0x2d8   :  { %v2305_v32 = vpop.f32.mrf.mxu2 }
 0x2d9   :  { %v2384_v18 = vadd.f32 %v2305_v32, %v1681_v45  ;;  %5272 = vmatmul.msk.bf16.gmra.mxu3 %vm1007_vm4, %v8586_v51  ;;  %v8592_v51 = vld [vmem:[#allocation18_spill] sm:$0xff] }
 0x2dc   :  { %v2559_v5 = vpop.f32.mrf.mxu3  ;;  %v2852_v9 = vpop.f32.mrf.mxu0 }
 0x2dd   :  { %v2638_v25 = vadd.f32 %v2559_v5, %v2384_v18  ;;  %v1685_v55 = vpop.f32.mrf.mxu1  ;;  %v7316_v23 = vadd.f32 %v2852_v9, %v2636_v49 }
 0x2de   :  { %v1686_v43 = vadd.f32 %v1685_v55, %v8591_v7 }
 0x2df   :  { %8587 = vst [vmem:[#allocation8_spill] sm:$0xff] %v7316_v23  ;;  %5306 = vmatmul.msk.bf16.gmra.mxu0 %vm1007_vm4, %v8583_v41  ;;  %v8594_v23 = vld [vmem:[#allocation47_spill] sm:$0xff] }
 0x2e0   :  { %v2307_v28 = vpop.f32.mrf.mxu2  ;;  %5199 = vmatmul.msk.bf16.gmra.mxu1 %vm1007_vm4, %v8589_v29 }
 0x2e1   :  { %v2385_v22 = vadd.f32 %v2307_v28, %v1683_v20 }
 0x2e4   :  { %v2561_v17 = vpop.f32.mrf.mxu3  ;;  %v2854_v60 = vpop.f32.mrf.mxu0 }
 0x2e5   :  { %5240 = vmatmul.msk.bf16.gmra.mxu2 %vm1007_vm4, %v5481_v13  ;;  %v2639_v49 = vadd.f32 %v2561_v17, %v2385_v22  ;;  %v1687_v26 = vpop.f32.mrf.mxu1  ;;  %v7327_v45 = vadd.f32 %v2854_v60, %v2637_v10  ;;  %v8595_v22 = vld [vmem:[#allocation53_spill] sm:$0xff] }
 0x2e6   :  { %v1688_v13 = vadd.f32 %v1687_v26, %v8594_v23  ;;  %v5482_v17 = vld [vmem:[%s8354_s0 + $0x54] sm:$0xff]  ;;  %v8597_v23 = vld [vmem:[#allocation50_spill] sm:$0xff] }
 0x2e7   :  { %8590 = vst [vmem:[#allocation62_spill] sm:$0xff] %v7327_v45 }
 0x2e8   :  { %v2310_v32 = vpop.f32.mrf.mxu2 }
 0x2e9   :  { %v2386_v18 = vadd.f32 %v2310_v32, %v1686_v43  ;;  %5273 = vmatmul.msk.bf16.gmra.mxu3 %vm1007_vm4, %v8592_v51  ;;  %v8598_v51 = vld [vmem:[#allocation21_spill] sm:$0xff] }
 0x2ec   :  { %v2564_v28 = vpop.f32.mrf.mxu3  ;;  %v2857_v41 = vpop.f32.mrf.mxu0 }
 0x2ed   :  { %v2640_v5 = vadd.f32 %v2564_v28, %v2386_v18  ;;  %v1690_v9 = vpop.f32.mrf.mxu1  ;;  %v7332_v20 = vadd.f32 %v2857_v41, %v2638_v25 }
 0x2ee   :  { %v1691_v26 = vadd.f32 %v1690_v9, %v8597_v23 }
 0x2ef   :  { %8593 = vst [vmem:[#allocation39_spill] sm:$0xff] %v7332_v20  ;;  %5307 = vmatmul.msk.bf16.gmra.mxu0 %vm1007_vm4, %v8589_v29  ;;  %v8600_v20 = vld [vmem:[#allocation52_spill] sm:$0xff] }
 0x2f0   :  { %v2312_v12 = vpop.f32.mrf.mxu2  ;;  %5200 = vmatmul.msk.bf16.gmra.mxu1 %vm1007_vm4, %v8595_v22 }
 0x2f1   :  { %v2387_v10 = vadd.f32 %v2312_v12, %v1688_v13 }
 0x2f4   :  { %v2566_v55 = vpop.f32.mrf.mxu3  ;;  %v2859_v60 = vpop.f32.mrf.mxu0 }
 0x2f5   :  { %5241 = vmatmul.msk.bf16.gmra.mxu2 %vm1007_vm4, %v5482_v17  ;;  %v2641_v25 = vadd.f32 %v2566_v55, %v2387_v10  ;;  %v1692_v7 = vpop.f32.mrf.mxu1  ;;  %v7343_v43 = vadd.f32 %v2859_v60, %v2639_v49  ;;  %v8601_v10 = vld [vmem:[#allocation57_spill] sm:$0xff]  ;;  %v5483_v55 = vld [vmem:[%s8354_s0 + $0x60] sm:$0xff] }
 0x2f6   :  { %v1693_v17 = vadd.f32 %v1692_v7, %v8600_v20  ;;  %v8603_v20 = vld [vmem:[#allocation55_spill] sm:$0xff] }
 0x2f7   :  { %8596 = vst [vmem:[#allocation31_spill] sm:$0xff] %v7343_v43 }
 0x2f8   :  { %v2315_v32 = vpop.f32.mrf.mxu2 }
 0x2f9   :  { %v2388_v18 = vadd.f32 %v2315_v32, %v1691_v26  ;;  %5274 = vmatmul.msk.bf16.gmra.mxu3 %vm1007_vm4, %v8598_v51  ;;  %v8604_v51 = vld [vmem:[#allocation25_spill] sm:$0xff] }
 0x2fc   :  { %v2569_v12 = vpop.f32.mrf.mxu3  ;;  %v2862_v29 = vpop.f32.mrf.mxu0 }
 0x2fd   :  { %v2642_v28 = vadd.f32 %v2569_v12, %v2388_v18  ;;  %v1695_v41 = vpop.f32.mrf.mxu1  ;;  %v7348_v13 = vadd.f32 %v2862_v29, %v2640_v5 }
 0x2fe   :  { %v1696_v7 = vadd.f32 %v1695_v41, %v8603_v20 }
 0x2ff   :  { %8599 = vst [vmem:[#allocation11_spill] sm:$0xff] %v7348_v13  ;;  %5308 = vmatmul.msk.bf16.gmra.mxu0 %vm1007_vm4, %v8595_v22  ;;  %v8606_v13 = vld [vmem:[#allocation58_spill] sm:$0xff] }
 0x300   :  { %v2317_v45 = vpop.f32.mrf.mxu2  ;;  %5201 = vmatmul.msk.bf16.gmra.mxu1 %vm1007_vm4, %v8601_v10 }
 0x301   :  { %v2389_v49 = vadd.f32 %v2317_v45, %v1693_v17 }
 0x304   :  { %v2571_v9 = vpop.f32.mrf.mxu3  ;;  %v2864_v60 = vpop.f32.mrf.mxu0 }
 0x305   :  { %5242 = vmatmul.msk.bf16.gmra.mxu2 %vm1007_vm4, %v5483_v55  ;;  %v2643_v5 = vadd.f32 %v2571_v9, %v2389_v49  ;;  %v1697_v23 = vpop.f32.mrf.mxu1  ;;  %v7359_v26 = vadd.f32 %v2864_v60, %v2641_v25  ;;  %v8607_v49 = vld [vmem:[#allocation63_spill] sm:$0xff] }
 0x306   :  { %v1698_v55 = vadd.f32 %v1697_v23, %v8606_v13  ;;  %v5484_v9 = vld [vmem:[%s8354_s0 + $0x6c] sm:$0xff]  ;;  %v8609_v13 = vld [vmem:[#allocation61_spill] sm:$0xff] }
 0x307   :  { %8602 = vst [vmem:[#allocation35_spill] sm:$0xff] %v7359_v26 }
 0x308   :  { %v2320_v32 = vpop.f32.mrf.mxu2 }
 0x309   :  { %v2390_v18 = vadd.f32 %v2320_v32, %v1696_v7  ;;  %5275 = vmatmul.msk.bf16.gmra.mxu3 %vm1007_vm4, %v8604_v51 }
 0x30c   :  { %v2574_v45 = vpop.f32.mrf.mxu3  ;;  %v2867_v22 = vpop.f32.mrf.mxu0 }
 0x30d   :  { %v2644_v12 = vadd.f32 %v2574_v45, %v2390_v18  ;;  %v1700_v29 = vpop.f32.mrf.mxu1  ;;  %v7364_v17 = vadd.f32 %v2867_v22, %v2642_v28 }
 0x30e   :  { %v1701_v23 = vadd.f32 %v1700_v29, %v8609_v13 }
 0x30f   :  { %8605 = vst [vmem:[#allocation44_spill] sm:$0xff] %v7364_v17  ;;  %5309 = vmatmul.msk.bf16.gmra.mxu0 %vm1007_vm4, %v8601_v10 }
 0x310   :  { %v2322_v43 = vpop.f32.mrf.mxu2  ;;  %5202 = vmatmul.msk.bf16.gmra.mxu1 %vm1007_vm4, %v8607_v49 }
 0x311   :  { %v2391_v25 = vadd.f32 %v2322_v43, %v1698_v55  ;;  %v8611_v55 = vld [vmem:[#allocation64_spill] sm:$0xff] }
 0x314   :  { %v2576_v41 = vpop.f32.mrf.mxu3  ;;  %v2869_v60 = vpop.f32.mrf.mxu0 }
 0x315   :  { %5243 = vmatmul.msk.bf16.gmra.mxu2 %vm1007_vm4, %v5484_v9  ;;  %v2645_v28 = vadd.f32 %v2576_v41, %v2391_v25  ;;  %v1702_v20 = vpop.f32.mrf.mxu1  ;;  %v7375_v7 = vadd.f32 %v2869_v60, %v2643_v5  ;;  %v8612_v25 = vld [vmem:[#allocation65_spill] sm:$0xff] }
 0x316   :  { %v1703_v9 = vadd.f32 %v1702_v20, %v8611_v55 }
 0x317   :  { %8608 = vst [vmem:[#allocation38_spill] sm:$0xff] %v7375_v7 }
 0x318   :  { %v2325_v32 = vpop.f32.mrf.mxu2 }
 0x319   :  { %v2392_v18 = vadd.f32 %v2325_v32, %v1701_v23  ;;  %5276 = vmatmul.msk.bf16.gmra.mxu3 %vm1007_vm4, %v6266_v35  ;;  %v5485_v35 = vld [vmem:[%s8354_s0 + $0x78] sm:$0xff] }
 0x31c   :  { %v2579_v43 = vpop.f32.mrf.mxu3  ;;  %v2872_v10 = vpop.f32.mrf.mxu0 }
 0x31d   :  { %v2646_v51 = vadd.f32 %v2579_v43, %v2392_v18  ;;  %v7380_v45 = vadd.f32 %v2872_v10, %v2644_v12  ;;  %v2988_v22 = vpop.f32.mrf.mxu1 }
 0x31e   :  { %v3148_v10 = vadd.f32 %v2988_v22, %v6559_v61 }
 0x31f   :  { %8610 = vst [vmem:[#allocation15_spill] sm:$0xff] %v7380_v45  ;;  %5310 = vmatmul.msk.bf16.gmra.mxu0 %vm1007_vm4, %v8607_v49 }
 0x320   :  { %v2327_v17 = vpop.f32.mrf.mxu2  ;;  %5203 = vmatmul.msk.bf16.gmra.mxu1 %vm1007_vm4, %v8612_v25 }
 0x321   :  { %v2393_v5 = vadd.f32 %v2327_v17, %v1703_v9 }
 0x324   :  { %v2581_v29 = vpop.f32.mrf.mxu3  ;;  %v2874_v12 = vpop.f32.mrf.mxu0 }
 0x325   :  { %5244 = vmatmul.msk.bf16.gmra.mxu2 %vm1007_vm4, %v5485_v35  ;;  %v2647_v41 = vadd.f32 %v2581_v29, %v2393_v5  ;;  %v7391_v60 = vadd.f32 %v2874_v12, %v2645_v28  ;;  %v2990_v20 = vpop.f32.mrf.mxu1  ;;  %v5486_v28 = vld [vmem:[%s8354_s0 + $0x84] sm:$0xff] }
 0x327   :  { %8613 = vst [vmem:[#allocation42_spill] sm:$0xff] %v7391_v60 }
 0x328   :  { %v3242_v13 = vpop.f32.mrf.mxu2 }
 0x329   :  { %5277 = vmatmul.msk.bf16.gmra.mxu3 %vm1007_vm4, %v5644_v6  ;;  %v3402_v9 = vadd.f32 %v3242_v13, %v3148_v10  ;;  %v7424_v13 = vld [vmem:[%s8357_s3] ss:$0 sm:$0xff] }
 0x32c   :  { %v3540_v23 = vpop.f32.mrf.mxu3  ;;  %v2877_v32 = vpop.f32.mrf.mxu0 }
 0x32d   :  { %v7395_v49 = vadd.f32 %v2877_v32, %v2646_v51  ;;  %v2993_v17 = vpop.f32.mrf.mxu1  ;;  %v3700_v29 = vadd.f32 %v3540_v23, %v3402_v9  ;;  %v8616_v32 = vld [vmem:[#allocation66_spill] sm:$0xff] }
 0x32f   :  { %8614 = vst [vmem:[#allocation49_spill] sm:$0xff] %v7395_v49  ;;  %5311 = vmatmul.msk.bf16.gmra.mxu0 %vm1007_vm4, %v8612_v25  ;;  %v7413_v25 = vld [vmem:[%s8356_s2] ss:$0 sm:$0xff] }
 0x330   :  { %v3244_v18 = vpop.f32.mrf.mxu2  ;;  %5204 = vmatmul.msk.bf16.gmra.mxu1 %vm1007_vm4, %v6565_v8 }
 0x334   :  { %v3542_v43 = vpop.f32.mrf.mxu3  ;;  %v2879_v6 = vpop.f32.mrf.mxu0 }
 0x335   :  { %5245 = vmatmul.msk.bf16.gmra.mxu2 %vm1007_vm4, %v5486_v28  ;;  %v7406_v51 = vadd.f32 %v2879_v6, %v2647_v41  ;;  %v2995_v55 = vpop.f32.mrf.mxu1  ;;  %v3149_v28 = vadd.f32 %v2990_v20, %v8616_v32 }
 0x337   :  { %8615 = vst [vmem:[#allocation45_spill] sm:$0xff] %v7406_v51  ;;  %v3403_v22 = vadd.f32 %v3244_v18, %v3149_v28  ;;  %v5487_v18 = vld [vmem:[%s8354_s0 + $0x90] sm:$0xff] }
 0x338   :  { %v3247_v5 = vpop.f32.mrf.mxu2 }
 0x339   :  { %5278 = vmatmul.msk.bf16.gmra.mxu3 %vm1007_vm4, %v5695_v11  ;;  %v3701_v6 = vadd.f32 %v3542_v43, %v3403_v22 }
 0x33c   :  { %v3545_v35 = vpop.f32.mrf.mxu3  ;;  %v3806_v12 = vpop.f32.mrf.mxu0 }
 0x33d   :  { %v2998_v49 = vpop.f32.mrf.mxu1  ;;  %v3966_v61 = vadd.f32 %v3806_v12, %v3700_v29 }
 0x33f   :  { %5312 = vmatmul.msk.bf16.gmra.mxu0 %vm1007_vm4, %v6565_v8  ;;  %v4034_v11 = vadd.f32 %v7413_v25, %v3966_v61  ;;  %v3150_v8 = vadd.f32 %v2993_v17, %v6589_v15 }
 0x340   :  { %v3249_v41 = vpop.f32.mrf.mxu2  ;;  %5205 = vmatmul.msk.bf16.gmra.mxu1 %vm1007_vm4, %v6595_v59 }
 0x341   :  { %v4098_v23 = vmax.f32 %v4034_v11, 0.0  ;;  %v3404_v32 = vadd.f32 %v3247_v5, %v3150_v8 }
 0x343   :  { %v4166_v20 = vmul.f32 %v7424_v13, %v4098_v23  ;;  %v3702_v22 = vadd.f32 %v3545_v35, %v3404_v32 }
 0x344   :  { %v3547_v10 = vpop.f32.mrf.mxu3  ;;  %v3808_v9 = vpop.f32.mrf.mxu0 }
 0x345   :  { %5246 = vmatmul.msk.bf16.gmra.mxu2 %vm1007_vm4, %v5487_v18  ;;  %v3000_v29 = vpop.f32.mrf.mxu1  ;;  %v3967_v12 = vadd.f32 %v3808_v9, %v3701_v6  ;;  %4230 = vadd.xlane.f32.xlu0 %v4166_v20  ;;  %v8617_v18 = vld [vmem:[#allocation67_spill] sm:$0xff] }
 0x346   :  { %v3151_v60 = vadd.f32 %v2995_v55, %v8617_v18  ;;  %v3152_v55 = vadd.f32 %v2998_v49, %v6619_v27  ;;  %v8618_v18 = vld [vmem:[#allocation68_spill] sm:$0xff] }
 0x347   :  { %v4035_v61 = vadd.f32 %v7413_v25, %v3967_v12 }
 0x348   :  { %v3252_v28 = vpop.f32.mrf.mxu2  ;;  %v3405_v17 = vadd.f32 %v3249_v41, %v3151_v60 }
 0x349   :  { %5279 = vmatmul.msk.bf16.gmra.mxu3 %vm1007_vm4, %v5744_v19  ;;  %v4099_v43 = vmax.f32 %v4035_v61, 0.0 }
 0x34a   :  { %v3703_v35 = vadd.f32 %v3547_v10, %v3405_v17 }
 0x34b   :  { %v4167_v11 = vmul.f32 %v7424_v13, %v4099_v43 }
 0x34c   :  { %v3550_v23 = vpop.f32.mrf.mxu3  ;;  %v3811_v51 = vpop.f32.mrf.mxu0 }
 0x34d   :  { %v3003_v45 = vpop.f32.mrf.mxu1  ;;  %v3968_v15 = vadd.f32 %v3811_v51, %v3702_v22  ;;  %4232 = vadd.xlane.f32.xlu1 %v4167_v11  ;;  %v5488_v51 = vld [vmem:[%s8354_s0 + $0x9c] sm:$0xff] }
 0x34f   :  { %5313 = vmatmul.msk.bf16.gmra.mxu0 %vm1007_vm4, %v6595_v59  ;;  %v4036_v19 = vadd.f32 %v7413_v25, %v3968_v15  ;;  %v3406_v59 = vadd.f32 %v3252_v28, %v3152_v55  ;;  %v3153_v15 = vadd.f32 %v3000_v29, %v8618_v18  ;;  %v5489_v29 = vld [vmem:[%s8354_s0 + $0xa8] sm:$0xff] }
 0x350   :  { %v3254_v6 = vpop.f32.mrf.mxu2  ;;  %5206 = vmatmul.msk.bf16.gmra.mxu1 %vm1007_vm4, %v6625_v52 }
 0x351   :  { %v4100_v5 = vmax.f32 %v4036_v19, 0.0  ;;  %v3704_v61 = vadd.f32 %v3550_v23, %v3406_v59  ;;  %v3407_v49 = vadd.f32 %v3254_v6, %v3153_v15 }
 0x353   :  { %v4168_v20 = vmul.f32 %v7424_v13, %v4100_v5 }
 0x354   :  { %v3552_v9 = vpop.f32.mrf.mxu3  ;;  %v3813_v60 = vpop.f32.mrf.mxu0 }
 0x355   :  { %5247 = vmatmul.msk.bf16.gmra.mxu2 %vm1007_vm4, %v5488_v51  ;;  %v3005_v41 = vpop.f32.mrf.mxu1  ;;  %v3969_v8 = vadd.f32 %v3813_v60, %v3703_v35  ;;  %4234 = vadd.xlane.f32.xlu2 %v4168_v20  ;;  %v3705_v23 = vadd.f32 %v3552_v9, %v3407_v49  ;;  %v3154_v20 = vadd.f32 %v3003_v45, %v6649_v1  ;;  %v8619_v9 = vld [vmem:[#allocation12_spill] sm:$0xff]  ;;  %v8621_v49 = vld [vmem:[#allocation71_spill] sm:$0xff] }
 0x357   :  { %v4037_v32 = vadd.f32 %v7413_v25, %v3969_v8 }
 0x358   :  { %v3257_v12 = vpop.f32.mrf.mxu2 }
 0x359   :  { %5280 = vmatmul.msk.bf16.gmra.mxu3 %vm1007_vm4, %v5814_v57  ;;  %v4101_v10 = vmax.f32 %v4037_v32, 0.0  ;;  %v3408_v55 = vadd.f32 %v3257_v12, %v3154_v20 }
 0x35b   :  { %v4169_v43 = vmul.f32 %v7424_v13, %v4101_v10 }
 0x35c   :  { %v3555_v22 = vpop.f32.mrf.mxu3  ;;  %v3816_v11 = vpop.f32.mrf.mxu0 }
 0x35d   :  { %v3008_v17 = vpop.f32.mrf.mxu1  ;;  %v3970_v27 = vadd.f32 %v3816_v11, %v3704_v61  ;;  %4236 = vadd.xlane.f32.xlu0 %v4169_v43  ;;  %v3706_v32 = vadd.f32 %v3555_v22, %v3408_v55  ;;  %v8620_v11 = vld [vmem:[#allocation69_spill] sm:$0xff] }
 0x35e   :  { %v3155_v18 = vadd.f32 %v3005_v41, %v8620_v11  ;;  %v5490_v41 = vld [vmem:[%s8354_s0 + $0xb4] sm:$0xff] }
 0x35f   :  { %v4038_v28 = vadd.f32 %v7413_v25, %v3970_v27  ;;  %5314 = vmatmul.msk.bf16.gmra.mxu0 %vm1007_vm4, %v6625_v52 }
 0x360   :  { %v3259_v19 = vpop.f32.mrf.mxu2  ;;  %5207 = vmatmul.msk.bf16.gmra.mxu1 %vm1007_vm4, %v6655_v30 }
 0x361   :  { %v4102_v57 = vmax.f32 %v4038_v28, 0.0  ;;  %v3409_v45 = vadd.f32 %v3259_v19, %v3155_v18 }
 0x363   :  { %v4170_v5 = vmul.f32 %v7424_v13, %v4102_v57 }
 0x364   :  { %v3557_v35 = vpop.f32.mrf.mxu3  ;;  %v3818_v6 = vpop.f32.mrf.mxu0 }
 0x365   :  { %5248 = vmatmul.msk.bf16.gmra.mxu2 %vm1007_vm4, %v5489_v29  ;;  %v3010_v51 = vpop.f32.mrf.mxu1  ;;  %v3971_v60 = vadd.f32 %v3818_v6, %v3705_v23  ;;  %4238 = vadd.xlane.f32.xlu0 %v4170_v5  ;;  %v3707_v28 = vadd.f32 %v3557_v35, %v3409_v45  ;;  %v8622_v5 = vld [vmem:[#allocation70_spill] sm:$0xff] }
 0x366   :  { %v3156_v29 = vadd.f32 %v3008_v17, %v8622_v5  ;;  %v7496_v17 = vld [vmem:[%s8354_s0 + $0xd0] sm:$0xf] }
 0x367   :  { %v4039_v52 = vadd.f32 %v7413_v25, %v3971_v60 }
 0x368   :  { %v3262_v8 = vpop.f32.mrf.mxu2 }
 0x369   :  { %5281 = vmatmul.msk.bf16.gmra.mxu3 %vm1007_vm4, %v8619_v9  ;;  %v4103_v59 = vmax.f32 %v4039_v52, 0.0  ;;  %v3410_v60 = vadd.f32 %v3262_v8, %v3156_v29 }
 0x36b   :  { %v4171_v10 = vmul.f32 %v7424_v13, %v4103_v59  ;;  %v7491_v59 = vld [vmem:[%s8354_s0 + $0xcc] sm:$0xf] }
 0x36c   :  { %v3560_v61 = vpop.f32.mrf.mxu3  ;;  %v3821_v43 = vpop.f32.mrf.mxu0  ;;  %v3470_v45 = vshll.u32 %v7491_v59, 16 }
 0x36d   :  { %v7469_v15 = vpop.f32.mrf.mxu1  ;;  %v3972_v1 = vadd.f32 %v3821_v43, %v3706_v32  ;;  %4240 = vadd.xlane.f32.xlu1 %v4171_v10  ;;  %v3708_v52 = vadd.f32 %v3560_v61, %v3410_v60  ;;  %v8623_v61 = vld [vmem:[#allocation72_spill] sm:$0xff] }
 0x36e   :  { %v3157_v43 = vadd.f32 %v3010_v51, %v8623_v61  ;;  %v5492_v51 = vld [vmem:[%s8354_s0 + $0xc0] sm:$0xf] }
 0x36f   :  { %v4040_v27 = vadd.f32 %v7413_v25, %v3972_v1  ;;  %5315 = vmatmul.msk.bf16.gmra.mxu0 %vm1007_vm4, %v6655_v30  ;;  %v3467_v1 = vshrl.u32 %v7491_v59, 16  ;;  %v5192_v5 = vrot.slane %v5492_v51, 9 }
 0x370   :  { %v3264_v12 = vpop.f32.mrf.mxu2  ;;  %5208 = vmatmul.msk.bf16.gmra.mxu1 %vm1007_vm4, %v8621_v49 }
 0x371   :  { %v4104_v22 = vmax.f32 %v4040_v27, 0.0  ;;  %v3476_v27 = vshll.u32 %v7496_v17, 16 }
 0x373   :  { %v4172_v57 = vmul.f32 %v7424_v13, %v4104_v22  ;;  %v3480_v22 = vshrl.u32 %v7496_v17, 16 }
 0x374   :  { %v3562_v23 = vpop.f32.mrf.mxu3  ;;  %v3823_v19 = vpop.f32.mrf.mxu0 }
 0x375   :  { %5249 = vmatmul.msk.bf16.gmra.mxu2 %vm1007_vm4, %v5490_v41  ;;  %v7482_v6 = vpop.f32.mrf.mxu1  ;;  %v3973_v20 = vadd.f32 %v3823_v19, %v3707_v28  ;;  %4242 = vadd.xlane.f32.xlu1 %v4172_v57  ;;  %v3411_v28 = vadd.f32 %v3264_v12, %v3157_v43  ;;  %v8624_v19 = vld [vmem:[#allocation74_spill] sm:$0xff] }
 0x376   :  { %v5494_v43 = vld [vmem:[%s8354_s0 + $0xc0] sm:$0xff] }
 0x377   :  { %v4041_v35 = vadd.f32 %v7413_v25, %v3973_v20  ;;  %v5493_v20 = vld [vmem:[%s8354_s0 + $0xc8] sm:$0x1] }
 0x378   :  { %v3267_v30 = vpop.f32.mrf.mxu2  ;;  %v2953_v12 = vrot.slane %v5493_v20, 5 }
 0x379   :  { %5282 = vmatmul.msk.bf16.gmra.mxu3 %vm1007_vm4, %v5963_v34  ;;  %v4105_v55 = vmax.f32 %v4041_v35, 0.0  ;;  %v5491_v34 = vld [vmem:[%s8354_s0 + $0xc4] sm:$0xf]  ;;  %v3469_v35 = vrot.slane %v3467_v1, 4 }
 0x37a   :  { %v2950_v10 = vrot.slane %v5491_v34, 5 }
 0x37b   :  { %v4173_v9 = vmul.f32 %v7424_v13, %v4105_v55  ;;  %v3472_v55 = vrot.slane %v3470_v45, 5  ;;  %v8625_v45 = vld [vmem:[#allocation73_spill] sm:$0xff] }
 0x37c   :  { %v3565_v8 = vpop.f32.mrf.mxu3  ;;  %v3826_v32 = vpop.f32.mrf.mxu0  ;;  %v2952_v29 = vrot.slane %v2950_v10, 4  ;;  %v2951_v1 = vsel %vm6184_vm7, %v5192_v5, %v2950_v10 }
 0x37d   :  { %v7502_v11 = vpop.f32.mrf.mxu1  ;;  %v3974_v18 = vadd.f32 %v3826_v32, %v3708_v52  ;;  %4244 = vadd.xlane.f32.xlu2 %v4173_v9  ;;  %v3478_v52 = vrot.slane %v3476_v27, 5  ;;  %v3482_v9 = vrot.slane %v3480_v22, 4  ;;  %v3709_v32 = vadd.f32 %v3562_v23, %v3411_v28 }
 0x37e   :  { %v2954_v23 = vsel %vm6184_vm7, %v2952_v29, %v2953_v12  ;;  %v3158_v27 = vadd.f32 %v7469_v15, %v8625_v45  ;;  %v2964_v26 = vunpack.c.l.b16 %v2951_v1 }
 0x37f   :  { %v4042_v41 = vadd.f32 %v7413_v25, %v3974_v18  ;;  %5316 = vmatmul.msk.bf16.gmra.mxu0 %vm1007_vm4, %v8621_v49  ;;  %v7523_v49 = vld [vmem:[%s8354_s0 + $0xd4] sm:$0x1]  ;;  %v3483_v51 = vor.u32 %v3482_v9, %v3478_v52  ;;  %v2965_v38 = vunpack.c.l.b16 %v2954_v23 }
 0x380   :  { %v3269_v57 = vpop.f32.mrf.mxu2  ;;  %5209 = vmatmul.msk.bf16.gmra.mxu1 %vm1007_vm4, %v8624_v19  ;;  %v3486_v20 = vshll.u32 %v7523_v49, 16 }
 0x381   :  { %v4106_v60 = vmax.f32 %v4042_v41, 0.0  ;;  %v3473_v41 = vor.u32 %v3472_v55, %v3469_v35  ;;  %v3484_v29 = vrot.slane %v3483_v51, 4  ;;  %v2968_v35 = vpack.c.b16 %v2965_v38, %v2964_v26  ;;  %v5369_v38 = vld [vmem:[%s8354_s0 + $0xcc] sm:$0xff] }
 0x382   :  { %v3488_v15 = vrot.slane %v3486_v20, 5  ;;  %v3160_v20 = vadd.f32 %v7502_v11, %v6751_v21 }
 0x383   :  { %v4174_v34 = vmul.f32 %v7424_v13, %v4106_v60  ;;  %v3412_v60 = vadd.f32 %v3267_v30, %v3158_v27  ;;  %v3474_v5 = vrot.slane %v3473_v41, 4 }
 0x384   :  { %v3567_v61 = vpop.f32.mrf.mxu3  ;;  %v3828_v18 = vpop.f32.mrf.mxu0 }
 0x385   :  { %5250 = vmatmul.msk.bf16.gmra.mxu2 %vm1007_vm4, %v5494_v43  ;;  %v3020_v22 = vpop.f32.mrf.mxu1  ;;  %v3975_v28 = vadd.f32 %v3828_v18, %v3709_v32  ;;  %4246 = vadd.xlane.f32.xlu2 %v4174_v34  ;;  %v3710_v12 = vadd.f32 %v3565_v8, %v3412_v60  ;;  %v8626_v34 = vld [vmem:[#allocation75_spill] sm:$0xff]  ;;  %v3479_v1 = vsel %vm5613_vm3, %v3474_v5, %v3478_v52 }
 0x386   :  { %v3159_v30 = vadd.f32 %v7482_v6, %v8626_v34  ;;  %v3516_v6 = vunpack.c.l.b16 %v3479_v1  ;;  %v3768_v34 = vrot.slane %v7496_v17, 5  ;;  %v3161_v21 = vadd.f32 %v3020_v22, %v6771_v42 }
 0x387   :  { %v4043_v43 = vadd.f32 %v7413_v25, %v3975_v28 }
 0x388   :  { %v3272_v7 = vpop.f32.mrf.mxu2  ;;  %v3413_v23 = vadd.f32 %v3269_v57, %v3159_v30 }
 0x389   :  { %5283 = vmatmul.msk.bf16.gmra.mxu3 %vm1007_vm4, %v6782_v16  ;;  %v4107_v10 = vmax.f32 %v4043_v43, 0.0  ;;  %v3489_v16 = vsel %vm5613_vm3, %v3484_v29, %v3488_v15 }
 0x38a   :  { %v3517_v28 = vunpack.c.l.b16 %v3489_v16  ;;  %v3711_v52 = vadd.f32 %v3567_v61, %v3413_v23  ;;  %v3770_v16 = vrot.slane %v3768_v34, 4  ;;  %v3771_v23 = vrot.slane %v7523_v49, 5 }
 0x38b   :  { %v4175_v32 = vmul.f32 %v7424_v13, %v4107_v10  ;;  %v3414_v10 = vadd.f32 %v3272_v7, %v3160_v20 }
 0x38c   :  { %v3570_v55 = vpop.f32.mrf.mxu3  ;;  %v3831_v9 = vpop.f32.mrf.mxu0  ;;  %v3520_v60 = vpack.c.b16 %v3517_v28, %v3516_v6 }
 0x38d   :  { %v3023_v18 = vpop.f32.mrf.mxu1  ;;  %v3976_v45 = vadd.f32 %v3831_v9, %v3710_v12  ;;  %4248 = vadd.xlane.f32.xlu0 %v4175_v32  ;;  %v3712_v15 = vadd.f32 %v3570_v55, %v3414_v10  ;;  %v5301_v55 = vrot.slane %v7491_v59, 9  ;;  %v3772_v59 = vsel %vm6184_vm7, %v3770_v16, %v3771_v23 }
 0x38e   :  { %v3162_v49 = vadd.f32 %v3023_v18, %v6784_v33  ;;  %v7599_v23 = vstv %s8358_s4 }
 0x38f   :  { %v4044_v8 = vadd.f32 %v7413_v25, %v3976_v45  ;;  %5317 = vmatmul.msk.bf16.gmra.mxu0 %vm1007_vm4, %v8624_v19 }
 0x390   :  { %v3274_v27 = vpop.f32.mrf.mxu2  ;;  %5210 = vmatmul.msk.bf16.gmra.mxu1 %vm1007_vm4, %v2968_v35 }
 0x391   :  { %v4108_v26 = vmax.f32 %v4044_v8, 0.0  ;;  %v3415_v45 = vadd.f32 %v3274_v27, %v3161_v21  ;;  %v5495_v27 = vld [vmem:[%s8354_s0 + $0xf0] sm:$0xff] }
 0x393   :  { %v4176_v41 = vmul.f32 %v7424_v13, %v4108_v26 }
 0x394   :  { %v3572_v51 = vpop.f32.mrf.mxu3  ;;  %v3833_v57 = vpop.f32.mrf.mxu0 }
 0x395   :  { %5251 = vmatmul.msk.bf16.gmra.mxu2 %vm1007_vm4, %v5369_v38  ;;  %v3025_v43 = vpop.f32.mrf.mxu1  ;;  %v3977_v19 = vadd.f32 %v3833_v57, %v3711_v52  ;;  %4250 = vadd.xlane.f32.xlu0 %v4176_v41  ;;  %v3713_v8 = vadd.f32 %v3572_v51, %v3415_v45  ;;  %v3783_v51 = vunpack.c.l.b16 %v3772_v59 }
 0x396   :  { %v3163_v33 = vadd.f32 %v3025_v43, %v6803_v56  ;;  %v5496_v56 = vld [vmem:[%s8354_s0 + $0xfc] sm:$0xff] }
 0x397   :  { %v4045_v29 = vadd.f32 %v7413_v25, %v3977_v19 }
 0x398   :  { %v3277_v5 = vpop.f32.mrf.mxu2 }
 0x399   :  { %5284 = vmatmul.msk.bf16.gmra.mxu3 %vm1007_vm4, %v3520_v60  ;;  %v4109_v61 = vmax.f32 %v4045_v29, 0.0  ;;  %v3416_v6 = vadd.f32 %v3277_v5, %v3162_v49 }
 0x39b   :  { %v4177_v12 = vmul.f32 %v7424_v13, %v4109_v61 }
 0x39c   :  { %v3575_v32 = vpop.f32.mrf.mxu3  ;;  %v3836_v9 = vpop.f32.mrf.mxu0 }
 0x39d   :  { %v3028_v11 = vpop.f32.mrf.mxu1  ;;  %v3978_v30 = vadd.f32 %v3836_v9, %v3712_v15  ;;  %4252 = vadd.xlane.f32.xlu1 %v4177_v12  ;;  %v3714_v20 = vadd.f32 %v3575_v32, %v3416_v6 }
 0x39e   :  { %v3164_v21 = vadd.f32 %v3028_v11, %v6814_v40 }
 0x39f   :  { %v4046_v1 = vadd.f32 %v7413_v25, %v3978_v30  ;;  %5318 = vmatmul.msk.bf16.gmra.mxu0 %vm1007_vm4, %v2968_v35 }
 0x3a0   :  { %v3279_v7 = vpop.f32.mrf.mxu2  ;;  %5211 = vmatmul.msk.bf16.gmra.mxu1 %vm1007_vm4, %v6790_v0  ;;  %v3769_v0 = vsel %vm6184_vm7, %v5301_v55, %v3768_v34 }
 0x3a1   :  { %v4110_v17 = vmax.f32 %v4046_v1, 0.0  ;;  %v3782_v41 = vunpack.c.l.b16 %v3769_v0  ;;  %v3417_v5 = vadd.f32 %v3279_v7, %v3163_v33 }
 0x3a3   :  { %v4178_v42 = vmul.f32 %v7424_v13, %v4110_v17  ;;  %v3786_v19 = vpack.c.b16 %v3783_v51, %v3782_v41 }
 0x3a4   :  { %v3577_v22 = vpop.f32.mrf.mxu3  ;;  %v3838_v38 = vpop.f32.mrf.mxu0 }
 0x3a5   :  { %5252 = vmatmul.msk.bf16.gmra.mxu2 %vm1007_vm4, %v5495_v27  ;;  %v3030_v35 = vpop.f32.mrf.mxu1  ;;  %v3979_v26 = vadd.f32 %v3838_v38, %v3713_v8  ;;  %4254 = vadd.xlane.f32.xlu1 %v4178_v42  ;;  %v3715_v32 = vadd.f32 %v3577_v22, %v3417_v5  ;;  %v4524_v42 = vlaneseq }
 0x3a6   :  { %v3165_v27 = vadd.f32 %v3030_v35, %v6833_v39 }
 0x3a7   :  { %v4047_v52 = vadd.f32 %v7413_v25, %v3979_v26  ;;  %v7604_v49 = vand.u32 127, %v4524_v42 }
 0x3a8   :  { %v3282_v28 = vpop.f32.mrf.mxu2 }
 0x3a9   :  { %5285 = vmatmul.msk.bf16.gmra.mxu3 %vm1007_vm4, %v5664_v31  ;;  %v4111_v57 = vmax.f32 %v4047_v52, 0.0  ;;  %v3418_v7 = vadd.f32 %v3282_v28, %v3164_v21  ;;  %v7612_v35 = vadd.s32 4294967288, %v7604_v49 }
 0x3ab   :  { %v4179_v60 = vmul.f32 %v7424_v13, %v4111_v57 }
 0x3ac   :  { %v3580_v10 = vpop.f32.mrf.mxu3  ;;  %v3841_v29 = vpop.f32.mrf.mxu0 }
 0x3ad   :  { %v3033_v18 = vpop.f32.mrf.mxu1  ;;  %v3980_v61 = vadd.f32 %v3841_v29, %v3714_v20  ;;  %4256 = vadd.xlane.f32.xlu2 %v4179_v60  ;;  %v3716_v8 = vadd.f32 %v3580_v10, %v3418_v7 }
 0x3ae   :  { %v3166_v10 = vadd.f32 %v3033_v18, %v6844_v47 }
 0x3af   :  { %v4048_v12 = vadd.f32 %v7413_v25, %v3980_v61  ;;  %5319 = vmatmul.msk.bf16.gmra.mxu0 %vm1007_vm4, %v3786_v19  ;;  %v5497_v19 = vld [vmem:[%s8354_s0 + $0x108] sm:$0xff] }
 0x3b0   :  { %v3284_v15 = vpop.f32.mrf.mxu2  ;;  %5212 = vmatmul.msk.bf16.gmra.mxu1 %vm1007_vm4, %v6820_v2 }
 0x3b1   :  { %v4112_v31 = vmax.f32 %v4048_v12, 0.0 }
 0x3b3   :  { %v4180_v9 = vmul.f32 %v7424_v13, %v4112_v31 }
 0x3b4   :  { %v3582_v34 = vpop.f32.mrf.mxu3  ;;  %v3843_v43 = vpop.f32.mrf.mxu0 }
 0x3b5   :  { %5253 = vmatmul.msk.bf16.gmra.mxu2 %vm1007_vm4, %v5496_v56  ;;  %v3035_v30 = vpop.f32.mrf.mxu1  ;;  %v3981_v45 = vadd.f32 %v3843_v43, %v3715_v32  ;;  %4258 = vadd.xlane.f32.xlu0 %v4180_v9 }
 0x3b6   :  { %v3167_v21 = vadd.f32 %v3035_v30, %v6863_v58 }
 0x3b7   :  { %v4049_v55 = vadd.f32 %v7413_v25, %v3981_v45 }
 0x3b8   :  { %v3287_v1 = vpop.f32.mrf.mxu2  ;;  %v4231_v17 = vpop.xlane.xlu0 %4230 }
 0x3b9   :  { %5286 = vmatmul.msk.bf16.gmra.mxu3 %vm1007_vm4, %v5712_v36  ;;  %v4113_v16 = vmax.f32 %v4049_v55, 0.0  ;;  %v4360_v38 = vadd.f32 %v7599_v23, %v4231_v17  ;;  %v3419_v36 = vadd.f32 %v3284_v15, %v3165_v27  ;;  %v3420_v15 = vadd.f32 %v3287_v1, %v3166_v10  ;;  %v5498_v27 = vld [vmem:[%s8354_s0 + $0x114] sm:$0xff] }
 0x3bb   :  { %v4181_v40 = vmul.f32 %v7424_v13, %v4113_v16  ;;  %v4424_v52 = vmax.f32 %v4360_v38, 0.0  ;;  %v3717_v51 = vadd.f32 %v3582_v34, %v3419_v36 }
 0x3bc   :  { %v3585_v11 = vpop.f32.mrf.mxu3  ;;  %v3846_v22 = vpop.f32.mrf.mxu0 }
 0x3bd   :  { %v3038_v0 = vpop.f32.mrf.mxu1  ;;  %v3982_v59 = vadd.f32 %v3846_v22, %v3716_v8  ;;  %4260 = vadd.xlane.f32.xlu1 %v4181_v40  ;;  %v4526_v29 = vperm.slane %v4424_v52, %v7604_v49  ;;  %v3718_v56 = vadd.f32 %v3585_v11, %v3420_v15 }
 0x3bf   :  { %v4050_v6 = vadd.f32 %v7413_v25, %v3982_v59  ;;  %5320 = vmatmul.msk.bf16.gmra.mxu0 %vm1007_vm4, %v6820_v2 }
 0x3c0   :  { %v3289_v26 = vpop.f32.mrf.mxu2  ;;  %5213 = vmatmul.msk.bf16.gmra.mxu1 %vm1007_vm4, %v6850_v48  ;;  %v4233_v28 = vpop.xlane.xlu1 %4232 }
 0x3c1   :  { %v4114_v39 = vmax.f32 %v4050_v6, 0.0  ;;  %v4361_v41 = vadd.f32 %v7599_v23, %v4233_v28  ;;  %v3421_v55 = vadd.f32 %v3289_v26, %v3167_v21 }
 0x3c3   :  { %v4425_v57 = vmax.f32 %v4361_v41, 0.0  ;;  %v4182_v20 = vmul.f32 %v7424_v13, %v4114_v39 }
 0x3c4   :  { %v3587_v60 = vpop.f32.mrf.mxu3  ;;  %v3848_v2 = vpop.f32.mrf.mxu0 }
 0x3c5   :  { %5254 = vmatmul.msk.bf16.gmra.mxu2 %vm1007_vm4, %v5497_v19  ;;  %v4528_v33 = vperm.slane %v4425_v57, %v7612_v35  ;;  %v3040_v61 = vpop.f32.mrf.mxu1  ;;  %v3983_v5 = vadd.f32 %v3848_v2, %v3717_v51  ;;  %4262 = vadd.xlane.f32.xlu0 %v4182_v20  ;;  %v3719_v30 = vadd.f32 %v3587_v60, %v3421_v55 }
 0x3c6   :  { %v3169_v2 = vadd.f32 %v3040_v61, %v6893_v63 }
 0x3c7   :  { %v4530_v12 = vsel %vm4529_vm8, %v4528_v33, %v4526_v29  ;;  %v4051_v32 = vadd.f32 %v7413_v25, %v3983_v5 }
 0x3c8   :  { %v3292_v31 = vpop.f32.mrf.mxu2  ;;  %v4235_v34 = vpop.xlane.xlu2 %4234 }
 0x3c9   :  { %5287 = vmatmul.msk.bf16.gmra.mxu3 %vm1007_vm4, %v5763_v44  ;;  %v4115_v9 = vmax.f32 %v4051_v32, 0.0  ;;  %v4362_v45 = vadd.f32 %v7599_v23, %v4235_v34 }
 0x3cb   :  { %v4183_v47 = vmul.f32 %v7424_v13, %v4115_v9  ;;  %v4426_v8 = vmax.f32 %v4362_v45, 0.0 }
 0x3cc   :  { %v3590_v18 = vpop.f32.mrf.mxu3  ;;  %v3851_v43 = vpop.f32.mrf.mxu0 }
 0x3cd   :  { %v3043_v7 = vpop.f32.mrf.mxu1  ;;  %v3984_v1 = vadd.f32 %v3851_v43, %v3718_v56  ;;  %4264 = vadd.xlane.f32.xlu0 %v4183_v47  ;;  %v4531_v59 = vperm.slane %v4426_v8, %v7604_v49  ;;  %v5499_v47 = vld [vmem:[%s8354_s0 + $0x120] sm:$0xff]  ;;  %v8627_v43 = vld [vmem:[#allocation76_spill] sm:$0xff] }
 0x3cf   :  { %v4052_v17 = vadd.f32 %v7413_v25, %v3984_v1  ;;  %5321 = vmatmul.msk.bf16.gmra.mxu0 %vm1007_vm4, %v6850_v48  ;;  %v3168_v48 = vadd.f32 %v3038_v0, %v6874_v53 }
 0x3d0   :  { %v3294_v16 = vpop.f32.mrf.mxu2  ;;  %5214 = vmatmul.msk.bf16.gmra.mxu1 %vm1007_vm4, %v6880_v50  ;;  %v4237_v44 = vpop.xlane.xlu0 %4236 }
 0x3d1   :  { %v4116_v42 = vmax.f32 %v4052_v17, 0.0  ;;  %v4363_v58 = vadd.f32 %v7599_v23, %v4237_v44  ;;  %v3422_v28 = vadd.f32 %v3292_v31, %v3168_v48  ;;  %v3423_v5 = vadd.f32 %v3294_v16, %v3169_v2 }
 0x3d3   :  { %v4427_v40 = vmax.f32 %v4363_v58, 0.0  ;;  %v4184_v11 = vmul.f32 %v7424_v13, %v4116_v42  ;;  %v3720_v0 = vadd.f32 %v3590_v18, %v3422_v28  ;;  %v8629_v28 = vld [vmem:[#allocation36_spill] sm:$0xff] }
 0x3d4   :  { %v3592_v22 = vpop.f32.mrf.mxu3  ;;  %v3853_v38 = vpop.f32.mrf.mxu0 }
 0x3d5   :  { %5255 = vmatmul.msk.bf16.gmra.mxu2 %vm1007_vm4, %v5498_v27  ;;  %v4532_v36 = vperm.slane %v4427_v40, %v7612_v35  ;;  %v3045_v26 = vpop.f32.mrf.mxu1  ;;  %v3985_v6 = vadd.f32 %v3853_v38, %v3719_v30  ;;  %4266 = vadd.xlane.f32.xlu1 %v4184_v11  ;;  %v3721_v61 = vadd.f32 %v3592_v22, %v3423_v5  ;;  %v8628_v22 = vld [vmem:[#allocation77_spill] sm:$0xff] }
 0x3d6   :  { %v3171_v27 = vadd.f32 %v3045_v26, %v8628_v22  ;;  %v5500_v26 = vld [vmem:[%s8354_s0 + $0x12c] sm:$0xff] }
 0x3d7   :  { %v4533_v52 = vsel %vm4529_vm8, %v4532_v36, %v4531_v59  ;;  %v4053_v41 = vadd.f32 %v7413_v25, %v3985_v6 }
 0x3d8   :  { %v3297_v39 = vpop.f32.mrf.mxu2  ;;  %v4577_v51 = vsel %vm4576_vm9, %v4533_v52, %v4530_v12  ;;  %v4239_v53 = vpop.xlane.xlu0 %4238 }
 0x3d9   :  { %5288 = vmatmul.msk.bf16.gmra.mxu3 %vm1007_vm4, %v8511_v4  ;;  %v4117_v57 = vmax.f32 %v4053_v41, 0.0  ;;  %v4364_v10 = vadd.f32 %v7599_v23, %v4239_v53 }
 0x3db   :  { %v4185_v20 = vmul.f32 %v7424_v13, %v4117_v57  ;;  %v4428_v31 = vmax.f32 %v4364_v10, 0.0  ;;  %v8630_v57 = vld [vmem:[#allocation32_spill] sm:$0xff] }
 0x3dc   :  { %v3595_v60 = vpop.f32.mrf.mxu3  ;;  %v3856_v19 = vpop.f32.mrf.mxu0 }
 0x3dd   :  { %v3048_v29 = vpop.f32.mrf.mxu1  ;;  %v3986_v33 = vadd.f32 %v3856_v19, %v3720_v0  ;;  %4268 = vadd.xlane.f32.xlu1 %v4185_v20  ;;  %v4534_v21 = vperm.slane %v4428_v31, %v7604_v49 }
 0x3de   :  { %v3172_v53 = vadd.f32 %v3048_v29, %v8630_v57 }
 0x3df   :  { %v4054_v12 = vadd.f32 %v7413_v25, %v3986_v33  ;;  %5322 = vmatmul.msk.bf16.gmra.mxu0 %vm1007_vm4, %v6880_v50  ;;  %v3170_v50 = vadd.f32 %v3043_v7, %v8627_v43  ;;  %v8632_v43 = vld [vmem:[#allocation40_spill] sm:$0xff] }
 0x3e0   :  { %v3299_v15 = vpop.f32.mrf.mxu2  ;;  %5215 = vmatmul.msk.bf16.gmra.mxu1 %vm1007_vm4, %v6910_v54  ;;  %v4241_v4 = vpop.xlane.xlu1 %4240 }
 0x3e1   :  { %v4118_v32 = vmax.f32 %v4054_v12, 0.0  ;;  %v4365_v63 = vadd.f32 %v7599_v23, %v4241_v4  ;;  %v3424_v16 = vadd.f32 %v3297_v39, %v3170_v50  ;;  %v3425_v59 = vadd.f32 %v3299_v15, %v3171_v27  ;;  %v8631_v12 = vld [vmem:[#allocation9_spill] sm:$0xff] }
 0x3e3   :  { %v4429_v9 = vmax.f32 %v4365_v63, 0.0  ;;  %v4186_v34 = vmul.f32 %v7424_v13, %v4118_v32  ;;  %v3722_v58 = vadd.f32 %v3595_v60, %v3424_v16 }
 0x3e4   :  { %v3597_v56 = vpop.f32.mrf.mxu3  ;;  %v3858_v18 = vpop.f32.mrf.mxu0 }
 0x3e5   :  { %5256 = vmatmul.msk.bf16.gmra.mxu2 %vm1007_vm4, %v5499_v47  ;;  %v4535_v45 = vperm.slane %v4429_v9, %v7612_v35  ;;  %v3050_v1 = vpop.f32.mrf.mxu1  ;;  %v3987_v55 = vadd.f32 %v3858_v18, %v3721_v61  ;;  %4270 = vadd.xlane.f32.xlu2 %v4186_v34  ;;  %v3723_v52 = vadd.f32 %v3597_v56, %v3425_v59  ;;  %v5501_v47 = vld [vmem:[%s8354_s0 + $0x138] sm:$0xff] }
 0x3e6   :  { %v3173_v4 = vadd.f32 %v3050_v1, %v8631_v12 }
 0x3e7   :  { %v4536_v17 = vsel %vm4529_vm8, %v4535_v45, %v4534_v21  ;;  %v4055_v8 = vadd.f32 %v7413_v25, %v3987_v55 }
 0x3e8   :  { %v3302_v44 = vpop.f32.mrf.mxu2  ;;  %v7669_v42 = vsel %vm4578_vm10, %v4536_v17, %v4577_v51  ;;  %v8633_v17 = vld [vmem:[#allocation19_spill] sm:$0xff] }
 0x3e9   :  { %5289 = vmatmul.msk.bf16.gmra.mxu3 %vm1007_vm4, %v8516_v62  ;;  %v4119_v7 = vmax.f32 %v4055_v8, 0.0  ;;  %v3426_v60 = vadd.f32 %v3302_v44, %v3172_v53 }
 0x3eb   :  { %v4187_v30 = vmul.f32 %v7424_v13, %v4119_v7 }
 0x3ec   :  { %v3600_v40 = vpop.f32.mrf.mxu3  ;;  %v3861_v11 = vpop.f32.mrf.mxu0 }
 0x3ed   :  { %v3053_v38 = vpop.f32.mrf.mxu1  ;;  %v3988_v48 = vadd.f32 %v3861_v11, %v3722_v58  ;;  %4272 = vadd.xlane.f32.xlu2 %v4187_v30  ;;  %v3724_v10 = vadd.f32 %v3600_v40, %v3426_v60  ;;  %v8634_v40 = vld [vmem:[#allocation13_spill] sm:$0xff]  ;;  %v8637_v60 = vld [vmem:[#allocation22_spill] sm:$0xff] }
 0x3ee   :  { %v3174_v50 = vadd.f32 %v3053_v38, %v8632_v43 }
 0x3ef   :  { %v4056_v6 = vadd.f32 %v7413_v25, %v3988_v48  ;;  %5323 = vmatmul.msk.bf16.gmra.mxu0 %vm1007_vm4, %v6910_v54 }
 0x3f0   :  { %v3304_v36 = vpop.f32.mrf.mxu2  ;;  %5216 = vmatmul.msk.bf16.gmra.mxu1 %vm1007_vm4, %v8629_v28 }
 0x3f1   :  { %v4120_v62 = vmax.f32 %v4056_v6, 0.0  ;;  %v3427_v32 = vadd.f32 %v3304_v36, %v3173_v4  ;;  %v8635_v36 = vld [vmem:[#allocation16_spill] sm:$0xff] }
 0x3f3   :  { %v4188_v39 = vmul.f32 %v7424_v13, %v4120_v62 }
 0x3f4   :  { %v3602_v41 = vpop.f32.mrf.mxu3  ;;  %v3863_v51 = vpop.f32.mrf.mxu0 }
 0x3f5   :  { %5257 = vmatmul.msk.bf16.gmra.mxu2 %vm1007_vm4, %v5500_v26  ;;  %v3055_v0 = vpop.f32.mrf.mxu1  ;;  %v3989_v20 = vadd.f32 %v3863_v51, %v3723_v52  ;;  %4274 = vadd.xlane.f32.xlu1 %v4188_v39  ;;  %v3725_v9 = vadd.f32 %v3602_v41, %v3427_v32  ;;  %v5502_v39 = vld [vmem:[%s8354_s0 + $0x144] sm:$0xff] }
 0x3f6   :  { %v3175_v11 = vadd.f32 %v3055_v0, %v8634_v40  ;;  %v8636_v26 = vld [vmem:[#allocation78_spill] sm:$0xff] }
 0x3f7   :  { %v4057_v54 = vadd.f32 %v7413_v25, %v3989_v20 }
 0x3f8   :  { %v3307_v19 = vpop.f32.mrf.mxu2 }
 0x3f9   :  { %5290 = vmatmul.msk.bf16.gmra.mxu3 %vm1007_vm4, %v8519_v3  ;;  %v4121_v2 = vmax.f32 %v4057_v54, 0.0  ;;  %v3428_v1 = vadd.f32 %v3307_v19, %v3174_v50 }
 0x3fb   :  { %v4189_v33 = vmul.f32 %v7424_v13, %v4121_v2 }
 0x3fc   :  { %v3605_v5 = vpop.f32.mrf.mxu3  ;;  %v3866_v15 = vpop.f32.mrf.mxu0 }
 0x3fd   :  { %v3058_v31 = vpop.f32.mrf.mxu1  ;;  %v3990_v29 = vadd.f32 %v3866_v15, %v3724_v10  ;;  %4276 = vadd.xlane.f32.xlu2 %v4189_v33  ;;  %v3726_v8 = vadd.f32 %v3605_v5, %v3428_v1  ;;  %v8638_v5 = vld [vmem:[#allocation79_spill] sm:$0xff] }
 0x3fe   :  { %v3176_v51 = vadd.f32 %v3058_v31, %v8636_v26 }
 0x3ff   :  { %v4058_v61 = vadd.f32 %v7413_v25, %v3990_v29  ;;  %5324 = vmatmul.msk.bf16.gmra.mxu0 %vm1007_vm4, %v8629_v28 }
 0x400   :  { %v3309_v63 = vpop.f32.mrf.mxu2  ;;  %5217 = vmatmul.msk.bf16.gmra.mxu1 %vm1007_vm4, %v6970_v37 }
 0x401   :  { %v4122_v3 = vmax.f32 %v4058_v61, 0.0  ;;  %v3429_v38 = vadd.f32 %v3309_v63, %v3175_v11  ;;  %v8639_v63 = vld [vmem:[#allocation81_spill] sm:$0xff] }
 0x403   :  { %v4190_v34 = vmul.f32 %v7424_v13, %v4122_v3 }
 0x404   :  { %v3607_v56 = vpop.f32.mrf.mxu3  ;;  %v3868_v18 = vpop.f32.mrf.mxu0 }
 0x405   :  { %5258 = vmatmul.msk.bf16.gmra.mxu2 %vm1007_vm4, %v5501_v47  ;;  %v3060_v21 = vpop.f32.mrf.mxu1  ;;  %v3991_v45 = vadd.f32 %v3868_v18, %v3725_v9  ;;  %4278 = vadd.xlane.f32.xlu2 %v4190_v34  ;;  %v3727_v28 = vadd.f32 %v3607_v56, %v3429_v38  ;;  %v5503_v56 = vld [vmem:[%s8354_s0 + $0x150] sm:$0xff] }
 0x406   :  { %v3177_v15 = vadd.f32 %v3060_v21, %v8638_v5  ;;  %v8640_v18 = vld [vmem:[#allocation80_spill] sm:$0xff] }
 0x407   :  { %v4059_v16 = vadd.f32 %v7413_v25, %v3991_v45 }
 0x408   :  { %v3312_v55 = vpop.f32.mrf.mxu2 }
 0x409   :  { %5291 = vmatmul.msk.bf16.gmra.mxu3 %vm1007_vm4, %v8633_v17  ;;  %v4123_v44 = vmax.f32 %v4059_v16, 0.0  ;;  %v3430_v0 = vadd.f32 %v3312_v55, %v3176_v51  ;;  %v8641_v16 = vld [vmem:[#allocation7_spill] sm:$0xff] }
 0x40b   :  { %v4191_v7 = vmul.f32 %v7424_v13, %v4123_v44 }
 0x40c   :  { %v3610_v58 = vpop.f32.mrf.mxu3  ;;  %v3871_v30 = vpop.f32.mrf.mxu0 }
 0x40d   :  { %v3063_v22 = vpop.f32.mrf.mxu1  ;;  %v3992_v27 = vadd.f32 %v3871_v30, %v3726_v8  ;;  %4280 = vadd.xlane.f32.xlu0 %v4191_v7  ;;  %v3728_v54 = vadd.f32 %v3610_v58, %v3430_v0  ;;  %v8642_v30 = vld [vmem:[#allocation82_spill] sm:$0xff] }
 0x40e   :  { %v3178_v43 = vadd.f32 %v3063_v22, %v8640_v18  ;;  %v7753_v0 = vld [vmem:[%s8356_s2] ss:$0 sm:$0xff] }
 0x40f   :  { %v4060_v59 = vadd.f32 %v7413_v25, %v3992_v27  ;;  %5325 = vmatmul.msk.bf16.gmra.mxu0 %vm1007_vm4, %v6970_v37 }
 0x410   :  { %v3314_v48 = vpop.f32.mrf.mxu2  ;;  %5218 = vmatmul.msk.bf16.gmra.mxu1 %vm1007_vm4, %v8635_v36 }
 0x411   :  { %v4124_v6 = vmax.f32 %v4060_v59, 0.0  ;;  %v3431_v31 = vadd.f32 %v3314_v48, %v3177_v15  ;;  %v8643_v59 = vld [vmem:[#allocation59_spill] sm:$0xff] }
 0x413   :  { %v4192_v62 = vmul.f32 %v7424_v13, %v4124_v6 }
 0x414   :  { %v3612_v52 = vpop.f32.mrf.mxu3  ;;  %v3873_v41 = vpop.f32.mrf.mxu0 }
 0x415   :  { %5259 = vmatmul.msk.bf16.gmra.mxu2 %vm1007_vm4, %v5502_v39  ;;  %v3065_v57 = vpop.f32.mrf.mxu1  ;;  %v3993_v53 = vadd.f32 %v3873_v41, %v3727_v28  ;;  %4282 = vadd.xlane.f32.xlu0 %v4192_v62  ;;  %v3729_v3 = vadd.f32 %v3612_v52, %v3431_v31  ;;  %v5504_v52 = vld [vmem:[%s8354_s0 + $0x15c] sm:$0xff]  ;;  %v8644_v41 = vld [vmem:[#allocation83_spill] sm:$0xff] }
 0x416   :  { %v3179_v40 = vadd.f32 %v3065_v57, %v8642_v30 }
 0x417   :  { %v4061_v37 = vadd.f32 %v7413_v25, %v3993_v53 }
 0x418   :  { %v3317_v20 = vpop.f32.mrf.mxu2 }
 0x419   :  { %5292 = vmatmul.msk.bf16.gmra.mxu3 %vm1007_vm4, %v8637_v60  ;;  %v4125_v19 = vmax.f32 %v4061_v37, 0.0  ;;  %v3432_v45 = vadd.f32 %v3317_v20, %v3178_v43  ;;  %v8645_v20 = vld [vmem:[#allocation10_spill] sm:$0xff] }
 0x41b   :  { %v4193_v2 = vmul.f32 %v7424_v13, %v4125_v19  ;;  %v7761_v19 = vld [vmem:[%s8357_s3] ss:$0 sm:$0xff] }
 0x41c   :  { %v3615_v10 = vpop.f32.mrf.mxu3  ;;  %v3876_v33 = vpop.f32.mrf.mxu0 }
 0x41d   :  { %v3068_v12 = vpop.f32.mrf.mxu1  ;;  %v3994_v4 = vadd.f32 %v3876_v33, %v3728_v54  ;;  %4284 = vadd.xlane.f32.xlu1 %v4193_v2  ;;  %v3730_v44 = vadd.f32 %v3615_v10, %v3432_v45  ;;  %v8646_v33 = vld [vmem:[#allocation84_spill] sm:$0xff] }
 0x41f   :  { %v4062_v32 = vadd.f32 %v7413_v25, %v3994_v4  ;;  %5326 = vmatmul.msk.bf16.gmra.mxu0 %vm1007_vm4, %v8635_v36 }
 0x420   :  { %v3319_v29 = vpop.f32.mrf.mxu2  ;;  %5219 = vmatmul.msk.bf16.gmra.mxu1 %vm1007_vm4, %v8639_v63 }
 0x421   :  { %v4126_v61 = vmax.f32 %v4062_v32, 0.0  ;;  %v3433_v27 = vadd.f32 %v3319_v29, %v3179_v40  ;;  %v8647_v32 = vld [vmem:[#allocation26_spill] sm:$0xff] }
 0x423   :  { %v4194_v9 = vmul.f32 %v7424_v13, %v4126_v61 }
 0x424   :  { %v3617_v34 = vpop.f32.mrf.mxu3  ;;  %v3878_v47 = vpop.f32.mrf.mxu0 }
 0x425   :  { %5260 = vmatmul.msk.bf16.gmra.mxu2 %vm1007_vm4, %v5503_v56  ;;  %v3070_v50 = vpop.f32.mrf.mxu1  ;;  %v3995_v21 = vadd.f32 %v3878_v47, %v3729_v3  ;;  %4286 = vadd.xlane.f32.xlu1 %v4194_v9  ;;  %v3731_v6 = vadd.f32 %v3617_v34, %v3433_v27  ;;  %v5507_v34 = vld [vmem:[%s8354_s0 + $0x168] sm:$0xff] }
 0x426   :  { %v3181_v5 = vadd.f32 %v3070_v50, %v8646_v33  ;;  %v8648_v47 = vld [vmem:[#allocation23_spill] sm:$0xff] }
 0x427   :  { %v4063_v55 = vadd.f32 %v7413_v25, %v3995_v21 }
 0x428   :  { %v3322_v1 = vpop.f32.mrf.mxu2 }
 0x429   :  { %5293 = vmatmul.msk.bf16.gmra.mxu3 %vm1007_vm4, %v8641_v16  ;;  %v4127_v17 = vmax.f32 %v4063_v55, 0.0  ;;  %v8649_v55 = vld [vmem:[#allocation14_spill] sm:$0xff] }
 0x42b   :  { %v4195_v8 = vmul.f32 %v7424_v13, %v4127_v17 }
 0x42c   :  { %v3620_v7 = vpop.f32.mrf.mxu3  ;;  %v3881_v58 = vpop.f32.mrf.mxu0 }
 0x42d   :  { %v3073_v11 = vpop.f32.mrf.mxu1  ;;  %v3996_v22 = vadd.f32 %v3881_v58, %v3730_v44  ;;  %4288 = vadd.xlane.f32.xlu2 %v4195_v8  ;;  %v8650_v58 = vld [vmem:[#allocation85_spill] sm:$0xff] }
 0x42e   :  { %v3182_v18 = vadd.f32 %v3073_v11, %v8648_v47 }
 0x42f   :  { %v4064_v48 = vadd.f32 %v7413_v25, %v3996_v22  ;;  %5327 = vmatmul.msk.bf16.gmra.mxu0 %vm1007_vm4, %v8639_v63  ;;  %v3180_v25 = vadd.f32 %v3068_v12, %v8644_v41 }
 0x430   :  { %v3324_v38 = vpop.f32.mrf.mxu2  ;;  %5220 = vmatmul.msk.bf16.gmra.mxu1 %vm1007_vm4, %v8643_v59 }
 0x431   :  { %v4128_v36 = vmax.f32 %v4064_v48, 0.0  ;;  %v3434_v57 = vadd.f32 %v3322_v1, %v3180_v25  ;;  %v3435_v4 = vadd.f32 %v3324_v38, %v3181_v5  ;;  %v8651_v48 = vld [vmem:[#allocation28_spill] sm:$0xff] }
 0x433   :  { %v4196_v28 = vmul.f32 %v7424_v13, %v4128_v36  ;;  %v3732_v60 = vadd.f32 %v3620_v7, %v3434_v57 }
 0x434   :  { %v3622_v62 = vpop.f32.mrf.mxu3  ;;  %v3883_v39 = vpop.f32.mrf.mxu0 }
 0x435   :  { %5261 = vmatmul.msk.bf16.gmra.mxu2 %vm1007_vm4, %v5504_v52  ;;  %v3075_v26 = vpop.f32.mrf.mxu1  ;;  %v3997_v51 = vadd.f32 %v3883_v39, %v3731_v6  ;;  %4290 = vadd.xlane.f32.xlu2 %v4196_v28  ;;  %v3733_v61 = vadd.f32 %v3622_v62, %v3435_v4  ;;  %v5508_v62 = vld [vmem:[%s8354_s0 + $0x174] sm:$0xff]  ;;  %v8652_v39 = vld [vmem:[#allocation27_spill] sm:$0xff] }
 0x436   :  { %v3183_v30 = vadd.f32 %v3075_v26, %v8650_v58 }
 0x437   :  { %v4065_v13 = vadd.f32 %v7753_v0, %v3997_v51 }
 0x438   :  { %v3327_v53 = vpop.f32.mrf.mxu2 }
 0x439   :  { %5294 = vmatmul.msk.bf16.gmra.mxu3 %vm1007_vm4, %v8645_v20  ;;  %v4129_v37 = vmax.f32 %v4065_v13, 0.0  ;;  %v3436_v21 = vadd.f32 %v3327_v53, %v3182_v18  ;;  %v8653_v13 = vld [vmem:[#allocation17_spill] sm:$0xff]  ;;  %v8656_v18 = vld [vmem:[#allocation30_spill] sm:$0xff] }
 0x43b   :  { %v4197_v54 = vmul.f32 %v7761_v19, %v4129_v37 }
 0x43c   :  { %v3625_v2 = vpop.f32.mrf.mxu3  ;;  %v3886_v10 = vpop.f32.mrf.mxu0 }
 0x43d   :  { %v3078_v15 = vpop.f32.mrf.mxu1  ;;  %v3998_v12 = vadd.f32 %v3886_v10, %v3732_v60  ;;  %4292 = vadd.xlane.f32.xlu0 %v4197_v54  ;;  %v3734_v17 = vadd.f32 %v3625_v2, %v3436_v21  ;;  %v8654_v10 = vld [vmem:[#allocation86_spill] sm:$0xff] }
 0x43e   :  { %v3184_v41 = vadd.f32 %v3078_v15, %v8652_v39 }
 0x43f   :  { %v4066_v29 = vadd.f32 %v7753_v0, %v3998_v12  ;;  %5328 = vmatmul.msk.bf16.gmra.mxu0 %vm1007_vm4, %v8643_v59 }
 0x440   :  { %v3329_v31 = vpop.f32.mrf.mxu2  ;;  %5221 = vmatmul.msk.bf16.gmra.mxu1 %vm1007_vm4, %v8647_v32 }
 0x441   :  { %v4130_v63 = vmax.f32 %v4066_v29, 0.0  ;;  %v3437_v22 = vadd.f32 %v3329_v31, %v3183_v30  ;;  %v8655_v29 = vld [vmem:[#allocation33_spill] sm:$0xff] }
 0x443   :  { %v4198_v3 = vmul.f32 %v7761_v19, %v4130_v63  ;;  %v7804_v63 = vpop.xlane.xlu2 %4244 }
 0x444   :  { %v3627_v9 = vpop.f32.mrf.mxu3  ;;  %v3888_v56 = vpop.f32.mrf.mxu0 }
 0x445   :  { %5262 = vmatmul.msk.bf16.gmra.mxu2 %vm1007_vm4, %v5507_v34  ;;  %v3080_v43 = vpop.f32.mrf.mxu1  ;;  %v3999_v50 = vadd.f32 %v3888_v56, %v3733_v61  ;;  %4294 = vadd.xlane.f32.xlu2 %v4198_v3  ;;  %v3735_v36 = vadd.f32 %v3627_v9, %v3437_v22  ;;  %v5509_v56 = vld [vmem:[%s8354_s0 + $0x180] sm:$0xff] }
 0x446   :  { %v3185_v33 = vadd.f32 %v3080_v43, %v8654_v10 }
 0x447   :  { %v4067_v1 = vadd.f32 %v7753_v0, %v3999_v50 }
 0x448   :  { %v3332_v45 = vpop.f32.mrf.mxu2 }
 0x449   :  { %5295 = vmatmul.msk.bf16.gmra.mxu3 %vm1007_vm4, %v8649_v55  ;;  %v4131_v16 = vmax.f32 %v4067_v1, 0.0  ;;  %v3438_v51 = vadd.f32 %v3332_v45, %v3184_v41 }
 0x44b   :  { %v4199_v44 = vmul.f32 %v7761_v19, %v4131_v16 }
 0x44c   :  { %v3630_v8 = vpop.f32.mrf.mxu3  ;;  %v3891_v7 = vpop.f32.mrf.mxu0 }
 0x44d   :  { %v3083_v40 = vpop.f32.mrf.mxu1  ;;  %v4000_v11 = vadd.f32 %v3891_v7, %v3734_v17  ;;  %4296 = vadd.xlane.f32.xlu0 %v4199_v44  ;;  %v3736_v37 = vadd.f32 %v3630_v8, %v3438_v51  ;;  %v8657_v17 = vld [vmem:[#allocation20_spill] sm:$0xff]  ;;  %v7817_v8 = vpop.xlane.xlu2 %4246 }
 0x44e   :  { %v3186_v43 = vadd.f32 %v3083_v40, %v8656_v18  ;;  %v5510_v51 = vld [vmem:[%s8354_s0 + $0x18c] sm:$0xff] }
 0x44f   :  { %v4068_v38 = vadd.f32 %v7753_v0, %v4000_v11  ;;  %5329 = vmatmul.msk.bf16.gmra.mxu0 %vm1007_vm4, %v8647_v32  ;;  %v7802_v32 = vpop.xlane.xlu1 %4242  ;;  %v8658_v11 = vld [vmem:[#allocation87_spill] sm:$0xff] }
 0x450   :  { %v3334_v27 = vpop.f32.mrf.mxu2  ;;  %5222 = vmatmul.msk.bf16.gmra.mxu1 %vm1007_vm4, %v8651_v48 }
 0x451   :  { %v4132_v59 = vmax.f32 %v4068_v38, 0.0  ;;  %v3439_v12 = vadd.f32 %v3334_v27, %v3185_v33  ;;  %v8661_v33 = vld [vmem:[#allocation24_spill] sm:$0xff] }
 0x453   :  { %v4200_v6 = vmul.f32 %v7761_v19, %v4132_v59 }
 0x454   :  { %v3632_v28 = vpop.f32.mrf.mxu3  ;;  %v3893_v52 = vpop.f32.mrf.mxu0 }
 0x455   :  { %5263 = vmatmul.msk.bf16.gmra.mxu2 %vm1007_vm4, %v5508_v62  ;;  %v3085_v25 = vpop.f32.mrf.mxu1  ;;  %v4001_v26 = vadd.f32 %v3893_v52, %v3735_v36  ;;  %4298 = vadd.xlane.f32.xlu1 %v4200_v6  ;;  %v3737_v3 = vadd.f32 %v3632_v28, %v3439_v12  ;;  %v8659_v28 = vld [vmem:[#allocation41_spill] sm:$0xff]  ;;  %v7832_v39 = vpop.xlane.xlu2 %4256 }
 0x456   :  { %v3187_v22 = vadd.f32 %v3085_v25, %v8658_v11 }
 0x457   :  { %v4069_v53 = vadd.f32 %v7753_v0, %v4001_v26  ;;  %v7813_v16 = vpop.xlane.xlu1 %4252 }
 0x458   :  { %v3337_v57 = vpop.f32.mrf.mxu2 }
 0x459   :  { %5296 = vmatmul.msk.bf16.gmra.mxu3 %vm1007_vm4, %v8653_v13  ;;  %v4133_v20 = vmax.f32 %v4069_v53, 0.0  ;;  %v3440_v45 = vadd.f32 %v3337_v57, %v3186_v43  ;;  %v8660_v53 = vld [vmem:[#allocation37_spill] sm:$0xff] }
 0x45b   :  { %v4201_v60 = vmul.f32 %v7761_v19, %v4133_v20 }
 0x45c   :  { %v3635_v54 = vpop.f32.mrf.mxu3  ;;  %v3896_v2 = vpop.f32.mrf.mxu0 }
 0x45d   :  { %v3088_v5 = vpop.f32.mrf.mxu1  ;;  %v4002_v15 = vadd.f32 %v3896_v2, %v3736_v37  ;;  %4300 = vadd.xlane.f32.xlu2 %v4201_v60  ;;  %v3738_v7 = vadd.f32 %v3635_v54, %v3440_v45 }
 0x45e   :  { %v3188_v13 = vadd.f32 %v3088_v5, %v8660_v53  ;;  %v7891_v53 = vld [vmem:[%s8354_s0 + $0x1ac] sm:$0x1] }
 0x45f   :  { %v4070_v31 = vadd.f32 %v7753_v0, %v4002_v15  ;;  %5330 = vmatmul.msk.bf16.gmra.mxu0 %vm1007_vm4, %v8651_v48  ;;  %v7823_v48 = vpop.xlane.xlu0 %4248  ;;  %v7830_v52 = vpop.xlane.xlu1 %4254 }
 0x460   :  { %v3339_v4 = vpop.f32.mrf.mxu2  ;;  %5223 = vmatmul.msk.bf16.gmra.mxu1 %vm1007_vm4, %v8655_v29  ;;  %v4369_v24 = vadd.f32 %v7599_v23, %v7823_v48 }
 0x461   :  { %v4134_v61 = vmax.f32 %v4070_v31, 0.0  ;;  %v3441_v59 = vadd.f32 %v3339_v4, %v3187_v22  ;;  %v7849_v4 = vpop.xlane.xlu2 %4270  ;;  %v5513_v22 = vld [vmem:[%s8354_s0 + $0x1a0] sm:$0x1] }
 0x463   :  { %v4202_v9 = vmul.f32 %v7761_v19, %v4134_v61  ;;  %v7860_v61 = vld [vmem:[%s8354_s0 + $0x1a8] sm:$0xf] }
 0x464   :  { %v3637_v34 = vpop.f32.mrf.mxu3  ;;  %v3898_v47 = vpop.f32.mrf.mxu0 }
 0x465   :  { %5264 = vmatmul.msk.bf16.gmra.mxu2 %vm1007_vm4, %v5509_v56  ;;  %v3090_v50 = vpop.f32.mrf.mxu1  ;;  %v4003_v21 = vadd.f32 %v3898_v47, %v3737_v3  ;;  %4302 = vadd.xlane.f32.xlu2 %v4202_v9  ;;  %v3739_v41 = vadd.f32 %v3637_v34, %v3441_v59  ;;  %v5511_v34 = vld [vmem:[%s8354_s0 + $0x19c] sm:$0xf]  ;;  %v8662_v47 = vld [vmem:[#allocation88_spill] sm:$0xff] }
 0x466   :  { %v2957_v56 = vrot.slane %v5511_v34, 5  ;;  %v3189_v18 = vadd.f32 %v3090_v50, %v8662_v47  ;;  %v5512_v50 = vld [vmem:[%s8354_s0 + $0x198] sm:$0xf] }
 0x467   :  { %v4071_v55 = vadd.f32 %v7753_v0, %v4003_v21  ;;  %v7843_v10 = vpop.xlane.xlu0 %4250  ;;  %v7847_v12 = vpop.xlane.xlu1 %4260 }
 0x468   :  { %v3342_v1 = vpop.f32.mrf.mxu2  ;;  %v2959_v11 = vrot.slane %v2957_v56, 4 }
 0x469   :  { %5297 = vmatmul.msk.bf16.gmra.mxu3 %vm1007_vm4, %v8657_v17  ;;  %v4135_v44 = vmax.f32 %v4071_v55, 0.0  ;;  %v3442_v60 = vadd.f32 %v3342_v1, %v3188_v13  ;;  %v3500_v55 = vshll.u32 %v7860_v61, 16  ;;  %v3504_v17 = vshrl.u32 %v7860_v61, 16 }
 0x46b   :  { %v4203_v58 = vmul.f32 %v7761_v19, %v4135_v44 }
 0x46c   :  { %v3640_v30 = vpop.f32.mrf.mxu3  ;;  %v3901_v40 = vpop.f32.mrf.mxu0 }
 0x46d   :  { %v7821_v27 = vpop.f32.mrf.mxu1  ;;  %v4004_v38 = vadd.f32 %v3901_v40, %v3738_v7  ;;  %4304 = vadd.xlane.f32.xlu0 %v4203_v58  ;;  %v3740_v31 = vadd.f32 %v3640_v30, %v3442_v60  ;;  %v8663_v30 = vld [vmem:[#allocation46_spill] sm:$0xff]  ;;  %v5193_v40 = vrot.slane %v5512_v50, 9 }
 0x46f   :  { %v4072_v6 = vadd.f32 %v7753_v0, %v4004_v38  ;;  %5331 = vmatmul.msk.bf16.gmra.mxu0 %vm1007_vm4, %v8655_v29  ;;  %v7855_v29 = vld [vmem:[%s8354_s0 + $0x1a4] sm:$0xf]  ;;  %v2960_v38 = vrot.slane %v5513_v22, 5  ;;  %v7883_v59 = vpop.xlane.xlu0 %4258 }
 0x470   :  { %v3344_v36 = vpop.f32.mrf.mxu2  ;;  %5224 = vmatmul.msk.bf16.gmra.mxu1 %vm1007_vm4, %v8659_v28  ;;  %v3491_v45 = vshrl.u32 %v7855_v29, 16  ;;  %v3494_v1 = vshll.u32 %v7855_v29, 16 }
 0x471   :  { %v4136_v62 = vmax.f32 %v4072_v6, 0.0  ;;  %v3443_v44 = vadd.f32 %v3344_v36, %v3189_v18 }
 0x472   :  { %v3493_v6 = vrot.slane %v3491_v45, 4 }
 0x473   :  { %v4204_v25 = vmul.f32 %v7761_v19, %v4136_v62  ;;  %v3496_v62 = vrot.slane %v3494_v1, 5 }
 0x474   :  { %v3642_v26 = vpop.f32.mrf.mxu3  ;;  %v3903_v57 = vpop.f32.mrf.mxu0 }
 0x475   :  { %5265 = vmatmul.msk.bf16.gmra.mxu2 %vm1007_vm4, %v5510_v51  ;;  %v7840_v20 = vpop.f32.mrf.mxu1  ;;  %v4005_v37 = vadd.f32 %v3903_v57, %v3739_v41  ;;  %4306 = vadd.xlane.f32.xlu0 %v4204_v25  ;;  %v3502_v41 = vrot.slane %v3500_v55, 5  ;;  %v3506_v25 = vrot.slane %v3504_v17, 4  ;;  %v7885_v51 = vpop.xlane.xlu1 %4266  ;;  %v3497_v47 = vor.u32 %v3496_v62, %v3493_v6  ;;  %v8666_v62 = vld [vmem:[#allocation89_spill] sm:$0xff] }
 0x477   :  { %v4073_v2 = vadd.f32 %v7753_v0, %v4005_v37  ;;  %v5514_v37 = vld [vmem:[%s8354_s0 + $0x198] sm:$0xff]  ;;  %v3507_v18 = vor.u32 %v3506_v25, %v3502_v41  ;;  %v3498_v50 = vrot.slane %v3497_v47, 4  ;;  %v3191_v25 = vadd.f32 %v7840_v20, %v8666_v62 }
 0x478   :  { %v3347_v54 = vpop.f32.mrf.mxu2 }
 0x479   :  { %5298 = vmatmul.msk.bf16.gmra.mxu3 %vm1007_vm4, %v8661_v33  ;;  %v4137_v15 = vmax.f32 %v4073_v2, 0.0  ;;  %v2958_v2 = vsel %vm6184_vm7, %v5193_v40, %v2957_v56  ;;  %v8664_v33 = vld [vmem:[#allocation43_spill] sm:$0xff]  ;;  %v3508_v40 = vrot.slane %v3507_v18, 4 }
 0x47a   :  { %v2966_v55 = vunpack.c.l.b16 %v2958_v2 }
 0x47b   :  { %v4205_v5 = vmul.f32 %v7761_v19, %v4137_v15  ;;  %v3190_v15 = vadd.f32 %v7821_v27, %v8664_v33  ;;  %v8665_v27 = vld [vmem:[#allocation51_spill] sm:$0xff]  ;;  %v4367_v33 = vadd.f32 %v7599_v23, %v7804_v63 }
 0x47c   :  { %v3645_v3 = vpop.f32.mrf.mxu3  ;;  %v3906_v9 = vpop.f32.mrf.mxu0  ;;  %v5387_v63 = vld [vmem:[%s8354_s0 + $0x1a4] sm:$0xff] }
 0x47d   :  { %v7866_v43 = vpop.f32.mrf.mxu1  ;;  %v4006_v21 = vadd.f32 %v3906_v9, %v3740_v31  ;;  %4308 = vadd.xlane.f32.xlu1 %v4205_v5  ;;  %v7903_v9 = vpop.xlane.xlu2 %4272  ;;  %v3444_v45 = vadd.f32 %v3347_v54, %v3190_v15 }
 0x47e   :  { %v7915_v6 = vpop.xlane.xlu1 %4268 }
 0x47f   :  { %v4074_v58 = vadd.f32 %v7753_v0, %v4006_v21  ;;  %5332 = vmatmul.msk.bf16.gmra.mxu0 %vm1007_vm4, %v8659_v28  ;;  %v3741_v28 = vadd.f32 %v3642_v26, %v3443_v44  ;;  %v2961_v26 = vsel %vm6184_vm7, %v2959_v11, %v2960_v38  ;;  %v3510_v21 = vshll.u32 %v7891_v53, 16  ;;  %v7908_v44 = vpop.xlane.xlu0 %4262 }
 0x480   :  { %v3349_v7 = vpop.f32.mrf.mxu2  ;;  %5225 = vmatmul.msk.bf16.gmra.mxu1 %vm1007_vm4, %v8663_v30  ;;  %v2967_v17 = vunpack.c.l.b16 %v2961_v26 }
 0x481   :  { %v4138_v36 = vmax.f32 %v4074_v58, 0.0  ;;  %v3512_v11 = vrot.slane %v3510_v21, 5  ;;  %v3445_v15 = vadd.f32 %v3349_v7, %v3191_v25  ;;  %v4368_v21 = vadd.f32 %v7599_v23, %v7817_v8 }
 0x482   :  { %v7913_v38 = vpack.c.b16 %v2967_v17, %v2966_v55  ;;  %v4433_v17 = vmax.f32 %v4369_v24, 0.0  ;;  %v4370_v25 = vadd.f32 %v7599_v23, %v7843_v10 }
 0x483   :  { %v4206_v57 = vmul.f32 %v7761_v19, %v4138_v36  ;;  %v3513_v26 = vsel %vm5613_vm3, %v3508_v40, %v3512_v11 }
 0x484   :  { %v3647_v13 = vpop.f32.mrf.mxu3  ;;  %v3908_v60 = vpop.f32.mrf.mxu0  ;;  %v3519_v18 = vunpack.c.l.b16 %v3513_v26 }
 0x485   :  { %5266 = vmatmul.msk.bf16.gmra.mxu2 %vm1007_vm4, %v5514_v37  ;;  %v3100_v31 = vpop.f32.mrf.mxu1  ;;  %v4007_v5 = vadd.f32 %v3908_v60, %v3741_v28  ;;  %4310 = vadd.xlane.f32.xlu1 %v4206_v57  ;;  %v7919_v37 = vpop.xlane.xlu2 %4276  ;;  %v8667_v60 = vld [vmem:[#allocation29_spill] sm:$0xff] }
 0x486   :  { %v3193_v34 = vadd.f32 %v3100_v31, %v7261_v14  ;;  %v3742_v14 = vadd.f32 %v3645_v3, %v3444_v45  ;;  %v3503_v3 = vsel %vm5613_vm3, %v3498_v50, %v3502_v41  ;;  %v4431_v45 = vmax.f32 %v4367_v33, 0.0  ;;  %v8668_v50 = vld [vmem:[#allocation48_spill] sm:$0xff] }
 0x487   :  { %v4075_v56 = vadd.f32 %v7753_v0, %v4007_v5  ;;  %v4366_v5 = vadd.f32 %v7599_v23, %v7802_v32  ;;  %v3518_v47 = vunpack.c.l.b16 %v3503_v3  ;;  %v3192_v8 = vadd.f32 %v7866_v43, %v8668_v50 }
 0x488   :  { %v3352_v1 = vpop.f32.mrf.mxu2  ;;  %v4538_v62 = vperm.slane %v4431_v45, %v7612_v35 }
 0x489   :  { %5299 = vmatmul.msk.bf16.gmra.mxu3 %vm1007_vm4, %v8665_v27  ;;  %v4139_v58 = vmax.f32 %v4075_v56, 0.0  ;;  %v3743_v56 = vadd.f32 %v3647_v13, %v3445_v15  ;;  %v4430_v55 = vmax.f32 %v4366_v5, 0.0  ;;  %v4371_v27 = vadd.f32 %v7599_v23, %v7813_v16 }
 0x48a   :  { %v3521_v40 = vpack.c.b16 %v3519_v18, %v3518_v47  ;;  %v3775_v47 = vrot.slane %v7860_v61, 5 }
 0x48b   :  { %v4207_v22 = vmul.f32 %v7761_v19, %v4139_v58  ;;  %v7950_v58 = vpop.xlane.xlu1 %4274  ;;  %v4537_v26 = vperm.slane %v4430_v55, %v7604_v49  ;;  %v4435_v33 = vmax.f32 %v4371_v27, 0.0 }
 0x48c   :  { %v3650_v54 = vpop.f32.mrf.mxu3  ;;  %v3911_v36 = vpop.f32.mrf.mxu0 }
 0x48d   :  { %v3103_v28 = vpop.f32.mrf.mxu1  ;;  %v4008_v57 = vadd.f32 %v3911_v36, %v3742_v14  ;;  %4312 = vadd.xlane.f32.xlu2 %v4207_v22  ;;  %v4432_v14 = vmax.f32 %v4368_v21, 0.0  ;;  %v8669_v22 = vld [vmem:[#allocation54_spill] sm:$0xff]  ;;  %v7960_v3 = vpop.xlane.xlu2 %4278  ;;  %v4539_v10 = vsel %vm4529_vm8, %v4538_v62, %v4537_v26  ;;  %v4544_v18 = vperm.slane %v4435_v33, %v7612_v35 }
 0x48e   :  { %v3194_v2 = vadd.f32 %v3103_v28, %v8667_v60  ;;  %v3446_v28 = vadd.f32 %v3352_v1, %v3192_v8  ;;  %v4541_v60 = vperm.slane %v4433_v17, %v7612_v35  ;;  %v4434_v1 = vmax.f32 %v4370_v25, 0.0 }
 0x48f   :  { %v4076_v20 = vadd.f32 %v7753_v0, %v4008_v57  ;;  %5333 = vmatmul.msk.bf16.gmra.mxu0 %vm1007_vm4, %v8663_v30  ;;  %v4265_v30 = vpop.xlane.xlu0 %4264  ;;  %v4379_v17 = vadd.f32 %v7599_v23, %v7915_v6  ;;  %v3777_v8 = vrot.slane %v3775_v47, 4  ;;  %v4376_v6 = vadd.f32 %v7599_v23, %v7908_v44 }
 0x490   :  { %v3354_v31 = vpop.f32.mrf.mxu2  ;;  %5226 = vmatmul.msk.bf16.gmra.mxu1 %vm1007_vm4, %v7913_v38  ;;  %v3744_v5 = vadd.f32 %v3650_v54, %v3446_v28  ;;  %v4581_v54 = vsel %vm4580_vm11, %v4539_v10, %v7669_v42  ;;  %v4543_v55 = vperm.slane %v4434_v1, %v7604_v49  ;;  %v4383_v25 = vadd.f32 %v7599_v23, %v7919_v37 }
 0x491   :  { %v7937_v41 = vadd.f32 %v3354_v31, %v3193_v34  ;;  %v4140_v7 = vmax.f32 %v4076_v20, 0.0  ;;  %v4540_v31 = vperm.slane %v4432_v14, %v7604_v49  ;;  %v4443_v44 = vmax.f32 %v4379_v17, 0.0 }
 0x492   :  { %v4382_v33 = vadd.f32 %v7599_v23, %v7950_v58  ;;  %v4384_v46 = vadd.f32 %v7599_v23, %v7960_v3 }
 0x493   :  { %v4208_v32 = vmul.f32 %v7761_v19, %v4140_v7  ;;  %v4285_v21 = vpop.xlane.xlu1 %4284 }
 0x494   :  { %v7945_v48 = vpop.f32.mrf.mxu3  ;;  %v3913_v34 = vpop.f32.mrf.mxu0 }
 0x495   :  { %5267 = vmatmul.msk.bf16.gmra.mxu2 %vm1007_vm4, %v5387_v63  ;;  %v3105_v11 = vpop.f32.mrf.mxu1  ;;  %v4009_v13 = vadd.f32 %v3913_v34, %v3743_v56  ;;  %4314 = vadd.xlane.f32.xlu2 %v4208_v32  ;;  %v4542_v63 = vsel %vm4529_vm8, %v4541_v60, %v4540_v31  ;;  %v7980_v32 = vadd.f32 %v7599_v23, %v7830_v52  ;;  %v5302_v52 = vrot.slane %v7855_v29, 9 }
 0x496   :  { %v3195_v36 = vadd.f32 %v3105_v11, %v8669_v22  ;;  %v7989_v27 = vsel %vm4582_vm12, %v4542_v63, %v4581_v54  ;;  %v7996_v11 = vsel %vm4529_vm8, %v4544_v18, %v4543_v55  ;;  %v8004_v22 = vadd.f32 %v7599_v23, %v7832_v39 }
 0x497   :  { %v4077_v16 = vadd.f32 %v7753_v0, %v4009_v13  ;;  %v4281_v20 = vpop.xlane.xlu0 %4280  ;;  %v4377_v13 = vadd.f32 %v7599_v23, %v4265_v30  ;;  %v4436_v14 = vmax.f32 %v7980_v32, 0.0  ;;  %v4378_v29 = vadd.f32 %v7599_v23, %v7885_v51 }
 0x498   :  { %v3357_v57 = vpop.f32.mrf.mxu2  ;;  %v3745_v30 = vadd.f32 %v7945_v48, %v7937_v41  ;;  %v4380_v39 = vadd.f32 %v7599_v23, %v7849_v4  ;;  %v4385_v41 = vadd.f32 %v7599_v23, %v4281_v20  ;;  %v4375_v4 = vadd.f32 %v7599_v23, %v7847_v12 }
 0x499   :  { %v7962_v43 = vadd.f32 %v3357_v57, %v3194_v2  ;;  %5300 = vmatmul.msk.bf16.gmra.mxu3 %vm1007_vm4, %v3521_v40  ;;  %v4141_v15 = vmax.f32 %v4077_v16, 0.0  ;;  %v3778_v40 = vrot.slane %v7891_v53, 5  ;;  %v4381_v53 = vadd.f32 %v7599_v23, %v7903_v9 }
 0x49a   :  { %v3776_v9 = vsel %vm6184_vm7, %v5302_v52, %v3775_v47  ;;  %v4440_v57 = vmax.f32 %v4376_v6, 0.0  ;;  %v4441_v16 = vmax.f32 %v4377_v13, 0.0  ;;  %v4442_v37 = vmax.f32 %v4378_v29, 0.0 }
 0x49b   :  { %v4209_v24 = vmul.f32 %v7761_v19, %v4141_v15  ;;  %v4445_v26 = vmax.f32 %v4381_v53, 0.0  ;;  %v4387_v31 = vadd.f32 %v7599_v23, %v4285_v21  ;;  %v4287_v10 = vpop.xlane.xlu1 %4286  ;;  %v3784_v20 = vunpack.c.l.b16 %v3776_v9 }
 0x49c   :  { %v7970_v2 = vpop.f32.mrf.mxu3  ;;  %v3916_v7 = vpop.f32.mrf.mxu0  ;;  %v4444_v63 = vmax.f32 %v4380_v39, 0.0  ;;  %v4447_v12 = vmax.f32 %v4383_v25, 0.0  ;;  %v4552_v47 = vperm.slane %v4440_v57, %v7604_v49  ;;  %v4553_v58 = vperm.slane %v4441_v16, %v7612_v35 }
 0x49d   :  { %v7974_v45 = vpop.f32.mrf.mxu1  ;;  %v4010_v56 = vadd.f32 %v3916_v7, %v3744_v5  ;;  %4316 = vadd.xlane.f32.xlu0 %v4209_v24  ;;  %v4556_v24 = vperm.slane %v4443_v44, %v7612_v35  ;;  %v4449_v18 = vmax.f32 %v4385_v41, 0.0  ;;  %v4555_v21 = vperm.slane %v4442_v37, %v7604_v49 }
 0x49e   :  { %v4446_v54 = vmax.f32 %v4382_v33, 0.0  ;;  %v4388_v55 = vadd.f32 %v7599_v23, %v4287_v10  ;;  %v4562_v6 = vperm.slane %v4447_v12, %v7612_v35  ;;  %v4554_v9 = vsel %vm4529_vm8, %v4553_v58, %v4552_v47 }
 0x49f   :  { %v4078_v34 = vadd.f32 %v7753_v0, %v4010_v56  ;;  %5334 = vmatmul.msk.bf16.gmra.mxu0 %vm1007_vm4, %v7913_v38  ;;  %v4283_v15 = vpop.xlane.xlu0 %4282  ;;  %v4559_v56 = vperm.slane %v4445_v26, %v7612_v35  ;;  %v4565_v53 = vperm.slane %v4449_v18, %v7612_v35  ;;  %v4546_v58 = vperm.slane %v4436_v14, %v7604_v49 }
 0x4a0   :  { %v3359_v61 = vpop.f32.mrf.mxu2  ;;  %v4289_v42 = vpop.xlane.xlu2 %4288  ;;  %v4386_v3 = vadd.f32 %v7599_v23, %v4283_v15  ;;  %v4561_v25 = vperm.slane %v4446_v54, %v7604_v49 }
 0x4a1   :  { %v7991_v50 = vadd.f32 %v3359_v61, %v3195_v36  ;;  %v4142_v38 = vmax.f32 %v4078_v34, 0.0  ;;  %v8012_v36 = vadd.f32 %v7599_v23, %v7883_v59  ;;  %v3779_v59 = vsel %vm6184_vm7, %v3777_v8, %v3778_v40 }
 0x4a2   :  { %v3785_v5 = vunpack.c.l.b16 %v3779_v59  ;;  %v4389_v7 = vadd.f32 %v7599_v23, %v4289_v42  ;;  %v4448_v61 = vmax.f32 %v4384_v46, 0.0  ;;  %v4451_v34 = vmax.f32 %v4387_v31, 0.0 }
 0x4a3   :  { %v4210_v62 = vmul.f32 %v7761_v19, %v4142_v38  ;;  %v3746_v42 = vadd.f32 %v7970_v2, %v7962_v43  ;;  %v4557_v8 = vsel %vm4529_vm8, %v4556_v24, %v4555_v21  ;;  %v4558_v40 = vperm.slane %v4444_v63, %v7604_v49 }
 0x4a4   :  { %v8021_v51 = vpop.f32.mrf.mxu3  ;;  %v3918_v28 = vpop.f32.mrf.mxu0  ;;  %v3787_v52 = vpack.c.b16 %v3785_v5, %v3784_v20  ;;  %v4453_v13 = vmax.f32 %v4389_v7, 0.0  ;;  %v4450_v44 = vmax.f32 %v4386_v3, 0.0  ;;  %v4437_v43 = vmax.f32 %v8004_v22, 0.0 }
 0x4a5   :  { %v8028_v48 = vpop.f32.mrf.mxu1  ;;  %v8030_v60 = vadd.f32 %v3918_v28, %v3745_v30  ;;  %4318 = vadd.xlane.f32.xlu0 %v4210_v62  ;;  %v4439_v2 = vmax.f32 %v4375_v4, 0.0  ;;  %v4452_v28 = vmax.f32 %v4388_v55, 0.0  ;;  %v4560_v59 = vsel %vm4529_vm8, %v4559_v56, %v4558_v40  ;;  %v8670_v55 = vld [vmem:[#allocation6_spill] sm:$0xff] }
 0x4a6   :  { %v4564_v57 = vperm.slane %v4448_v61, %v7604_v49  ;;  %v4568_v16 = vperm.slane %v4451_v34, %v7612_v35  ;;  %v4438_v37 = vmax.f32 %v8012_v36, 0.0  ;;  %v4590_v26 = vsel %vm4576_vm9, %v4557_v8, %v4554_v9 }
 0x4a7   :  { %v4563_v22 = vsel %vm4529_vm8, %v4562_v6, %v4561_v25  ;;  %v4571_v4 = vperm.slane %v4453_v13, %v7612_v35  ;;  %v4567_v46 = vperm.slane %v4450_v44, %v7604_v49  ;;  %v4547_v20 = vperm.slane %v4437_v43, %v7612_v35 }
 0x4a8   :  { %v8039_v1 = vpop.f32.mrf.mxu2  ;;  %v4291_v17 = vpop.xlane.xlu2 %4290  ;;  %v4566_v15 = vsel %vm4529_vm8, %v4565_v53, %v4564_v57  ;;  %v4550_v5 = vperm.slane %v4439_v2, %v7612_v35  ;;  %v4591_v36 = vsel %vm4578_vm10, %v4560_v59, %v4590_v26  ;;  %v4570_v24 = vperm.slane %v4452_v28, %v7604_v49  ;;  %v8671_v2 = vld [vmem:[#allocation56_spill] sm:$0xff] }
 0x4a9   :  { %v4390_v30 = vadd.f32 %v7599_v23, %v4291_v17  ;;  %v4592_v63 = vsel %vm4580_vm11, %v4563_v22, %v4591_v36  ;;  %v4569_v12 = vsel %vm4529_vm8, %v4568_v16, %v4567_v46  ;;  %v3747_v7 = vadd.f32 %v8021_v51, %v7991_v50 }
 0x4aa   :  { %v4549_v18 = vperm.slane %v4438_v37, %v7604_v49  ;;  %v4593_v3 = vsel %vm4582_vm12, %v4566_v15, %v4592_v63  ;;  %v4572_v21 = vsel %vm4529_vm8, %v4571_v4, %v4570_v24  ;;  %v3196_v17 = vadd.f32 %v7974_v45, %v8670_v55 }
 0x4ab   :  { %v4454_v31 = vmax.f32 %v4390_v30, 0.0  ;;  %v4594_v32 = vsel %vm4584_vm13, %v4569_v12, %v4593_v3  ;;  %v4548_v14 = vsel %vm4529_vm8, %v4547_v20, %v4546_v58  ;;  %v4585_v13 = vsel %vm4584_vm13, %v7996_v11, %v7989_v27 }
 0x4ac   :  { %v3660_v38 = vpop.f32.mrf.mxu3  ;;  %v3921_v29 = vpop.f32.mrf.mxu0  ;;  %v4595_v45 = vsel %vm4586_vm14, %v4572_v21, %v4594_v32  ;;  %v4551_v40 = vsel %vm4529_vm8, %v4550_v5, %v4549_v18  ;;  %v3197_v25 = vadd.f32 %v8028_v48, %v8671_v2  ;;  %v8672_v48 = vld [vmem:[#allocation34_spill] sm:$0xff]  ;;  %v8673_v21 = vld [vmem:[#allocation60_spill] sm:$0xff] }
 0x4ad   :  { %v8056_v62 = vpop.f32.mrf.mxu1  ;;  %v8058_v39 = vadd.f32 %v3921_v29, %v3746_v42  ;;  %v4573_v61 = vperm.slane %v4454_v31, %v7604_v49  ;;  %v3450_v42 = vadd.f32 %v8039_v1, %v3196_v17  ;;  %v4587_v29 = vsel %vm4586_vm14, %v4548_v14, %v4585_v13 }
 0x4ae   :  { %v4589_v44 = vsel %vm4588_vm15, %v4551_v40, %v4587_v29  ;;  %v3198_v31 = vadd.f32 %v8056_v62, %v8672_v48  ;;  %v8674_v29 = vld [vmem:[#allocation8_spill] sm:$0xff] }
 0x4af   :  { %5335 = vmatmul.msk.bf16.gmra.mxu0 %vm1007_vm4, %v3787_v52  ;;  %v3748_v1 = vadd.f32 %v3660_v38, %v3450_v42 }
 0x4b0   :  { %v3364_v41 = vpop.f32.mrf.mxu2  ;;  %v4293_v33 = vpop.xlane.xlu0 %4292 }
 0x4b1   :  { %v4391_v10 = vadd.f32 %v7599_v23, %v4293_v33  ;;  %v3451_v57 = vadd.f32 %v3364_v41, %v3197_v25 }
 0x4b3   :  { %v4455_v47 = vmax.f32 %v4391_v10, 0.0 }
 0x4b4   :  { %v3662_v56 = vpop.f32.mrf.mxu3  ;;  %v3923_v54 = vpop.f32.mrf.mxu0 }
 0x4b5   :  { %v4574_v50 = vperm.slane %v4455_v47, %v7612_v35  ;;  %v3115_v51 = vpop.f32.mrf.mxu1  ;;  %v8092_v34 = vadd.f32 %v3923_v54, %v3747_v7  ;;  %v3749_v38 = vadd.f32 %v3662_v56, %v3451_v57 }
 0x4b6   :  { %v3199_v56 = vadd.f32 %v3115_v51, %v8673_v21 }
 0x4b7   :  { %v4575_v8 = vsel %vm4529_vm8, %v4574_v50, %v4573_v61 }
 0x4b8   :  { %v3367_v52 = vpop.f32.mrf.mxu2  ;;  %v4596_v6 = vsel %vm4588_vm15, %v4575_v8, %v4595_v45  ;;  %v4295_v53 = vpop.xlane.xlu2 %4294 }
 0x4b9   :  { %4626 = vmatpush.msrb.mxu1 %v4596_v6  ;;  %v4392_v28 = vadd.f32 %v7599_v23, %v4295_v53  ;;  %v3452_v36 = vadd.f32 %v3367_v52, %v3198_v31 }
 0x4bb   :  { %4627 = vmatpush.msrb.mxu1 %v4589_v44  ;;  %v4456_v37 = vmax.f32 %v4392_v28, 0.0 }
 0x4bc   :  { %v3665_v30 = vpop.f32.mrf.mxu3  ;;  %v3926_v43 = vpop.f32.mrf.mxu0 }
 0x4bd   :  { %v3118_v9 = vpop.f32.mrf.mxu1  ;;  %v4014_v59 = vadd.f32 %v3926_v43, %v3748_v1  ;;  %v4673_v10 = vperm.slane %v4456_v37, %v7604_v49  ;;  %v3750_v58 = vadd.f32 %v3665_v30, %v3452_v36 }
 0x4be   :  { %v3200_v53 = vadd.f32 %v3118_v9, %v8674_v29 }
 0x4bf   :  { %v4082_v27 = vadd.f32 %v7753_v0, %v4014_v59 }
 0x4c0   :  { %v3369_v16 = vpop.f32.mrf.mxu2  ;;  %v4297_v11 = vpop.xlane.xlu0 %4296 }
 0x4c1   :  { %v4146_v26 = vmax.f32 %v4082_v27, 0.0  ;;  %v4393_v22 = vadd.f32 %v7599_v23, %v4297_v11  ;;  %v3453_v17 = vadd.f32 %v3369_v16, %v3199_v56 }
 0x4c3   :  { %v4457_v4 = vmax.f32 %v4393_v22, 0.0  ;;  %v4214_v33 = vmul.f32 %v7761_v19, %v4146_v26  ;;  %v8675_v22 = vld [vmem:[#allocation62_spill] sm:$0xff] }
 0x4c4   :  { %v3667_v15 = vpop.f32.mrf.mxu3  ;;  %v3928_v46 = vpop.f32.mrf.mxu0 }
 0x4c5   :  { %v4674_v41 = vperm.slane %v4457_v4, %v7612_v35  ;;  %v3120_v20 = vpop.f32.mrf.mxu1  ;;  %v4015_v5 = vadd.f32 %v3928_v46, %v3749_v38  ;;  %4326 = vadd.xlane.f32.xlu2 %v4214_v33  ;;  %v3751_v45 = vadd.f32 %v3667_v15, %v3453_v17 }
 0x4c6   :  { %v3201_v38 = vadd.f32 %v3120_v20, %v8675_v22 }
 0x4c7   :  { %v4675_v24 = vsel %vm4529_vm8, %v4674_v41, %v4673_v10  ;;  %v4083_v12 = vadd.f32 %v7753_v0, %v4015_v5 }
 0x4c8   :  { %v3372_v63 = vpop.f32.mrf.mxu2  ;;  %v4299_v47 = vpop.xlane.xlu1 %4298 }
 0x4c9   :  { %v4147_v7 = vmax.f32 %v4083_v12, 0.0  ;;  %v4394_v54 = vadd.f32 %v7599_v23, %v4299_v47  ;;  %v3454_v43 = vadd.f32 %v3372_v63, %v3200_v53  ;;  %v8676_v47 = vld [vmem:[#allocation39_spill] sm:$0xff] }
 0x4cb   :  { %v4215_v18 = vmul.f32 %v7761_v19, %v4147_v7  ;;  %v4458_v42 = vmax.f32 %v4394_v54, 0.0 }
 0x4cc   :  { %v3670_v3 = vpop.f32.mrf.mxu3  ;;  %v3931_v62 = vpop.f32.mrf.mxu0 }
 0x4cd   :  { %v4016_v55 = vadd.f32 %v3931_v62, %v3750_v58  ;;  %4328 = vadd.xlane.f32.xlu0 %v4215_v18  ;;  %v3123_v50 = vpop.f32.mrf.mxu1  ;;  %v4676_v44 = vperm.slane %v4458_v42, %v7604_v49  ;;  %v3752_v11 = vadd.f32 %v3670_v3, %v3454_v43  ;;  %v8678_v43 = vld [vmem:[#allocation11_spill] sm:$0xff] }
 0x4ce   :  { %v3202_v58 = vadd.f32 %v3123_v50, %v8676_v47 }
 0x4cf   :  { %v4084_v32 = vadd.f32 %v7753_v0, %v4016_v55 }
 0x4d0   :  { %v3374_v61 = vpop.f32.mrf.mxu2  ;;  %v4301_v14 = vpop.xlane.xlu2 %4300 }
 0x4d1   :  { %v4148_v52 = vmax.f32 %v4084_v32, 0.0  ;;  %v4395_v8 = vadd.f32 %v7599_v23, %v4301_v14  ;;  %v3455_v15 = vadd.f32 %v3374_v61, %v3201_v38 }
 0x4d3   :  { %v4459_v40 = vmax.f32 %v4395_v8, 0.0  ;;  %v4216_v6 = vmul.f32 %v7761_v19, %v4148_v52  ;;  %v8677_v52 = vld [vmem:[#allocation31_spill] sm:$0xff] }
 0x4d4   :  { %v3672_v13 = vpop.f32.mrf.mxu3  ;;  %v3933_v51 = vpop.f32.mrf.mxu0 }
 0x4d5   :  { %v4677_v1 = vperm.slane %v4459_v40, %v7612_v35  ;;  %v4017_v30 = vadd.f32 %v3933_v51, %v3751_v45  ;;  %4330 = vadd.xlane.f32.xlu1 %v4216_v6  ;;  %v3125_v57 = vpop.f32.mrf.mxu1  ;;  %v3753_v36 = vadd.f32 %v3672_v13, %v3455_v15  ;;  %v8155_v15 = vld [vmem:[%s8356_s2] ss:$0 sm:$0xff] }
 0x4d6   :  { %v3203_v8 = vadd.f32 %v3125_v57, %v8677_v52 }
 0x4d7   :  { %v4678_v2 = vsel %vm4529_vm8, %v4677_v1, %v4676_v44  ;;  %v4085_v28 = vadd.f32 %v7753_v0, %v4017_v30 }
 0x4d8   :  { %v3377_v25 = vpop.f32.mrf.mxu2  ;;  %v4721_v59 = vsel %vm4576_vm9, %v4678_v2, %v4675_v24  ;;  %v4303_v27 = vpop.xlane.xlu2 %4302 }
 0x4d9   :  { %v4149_v16 = vmax.f32 %v4085_v28, 0.0  ;;  %v4396_v4 = vadd.f32 %v7599_v23, %v4303_v27  ;;  %v3456_v21 = vadd.f32 %v3377_v25, %v3202_v58 }
 0x4db   :  { %v4217_v9 = vmul.f32 %v7761_v19, %v4149_v16  ;;  %v4460_v10 = vmax.f32 %v4396_v4, 0.0 }
 0x4dc   :  { %v3675_v37 = vpop.f32.mrf.mxu3  ;;  %v3936_v26 = vpop.f32.mrf.mxu0 }
 0x4dd   :  { %v4018_v33 = vadd.f32 %v3936_v26, %v3752_v11  ;;  %4332 = vadd.xlane.f32.xlu2 %v4217_v9  ;;  %v3128_v24 = vpop.f32.mrf.mxu1  ;;  %v4679_v18 = vperm.slane %v4460_v10, %v7604_v49  ;;  %v3754_v32 = vadd.f32 %v3675_v37, %v3456_v21  ;;  %v8679_v26 = vld [vmem:[#allocation35_spill] sm:$0xff]  ;;  %v8681_v21 = vld [vmem:[#allocation38_spill] sm:$0xff] }
 0x4de   :  { %v3204_v2 = vadd.f32 %v3128_v24, %v8678_v43 }
 0x4df   :  { %v4086_v48 = vadd.f32 %v7753_v0, %v4018_v33 }
 0x4e0   :  { %v3379_v46 = vpop.f32.mrf.mxu2  ;;  %v4305_v31 = vpop.xlane.xlu0 %4304 }
 0x4e1   :  { %v4150_v41 = vmax.f32 %v4086_v48, 0.0  ;;  %v4397_v5 = vadd.f32 %v7599_v23, %v4305_v31  ;;  %v3457_v6 = vadd.f32 %v3379_v46, %v3203_v8 }
 0x4e3   :  { %v4461_v63 = vmax.f32 %v4397_v5, 0.0  ;;  %v4218_v12 = vmul.f32 %v7761_v19, %v4150_v41 }
 0x4e4   :  { %v3677_v7 = vpop.f32.mrf.mxu3  ;;  %v3938_v20 = vpop.f32.mrf.mxu0 }
 0x4e5   :  { %v4680_v3 = vperm.slane %v4461_v63, %v7612_v35  ;;  %v4019_v62 = vadd.f32 %v3938_v20, %v3753_v36  ;;  %4334 = vadd.xlane.f32.xlu0 %v4218_v12  ;;  %v3130_v40 = vpop.f32.mrf.mxu1  ;;  %v3755_v53 = vadd.f32 %v3677_v7, %v3457_v6  ;;  %v8680_v36 = vld [vmem:[#allocation44_spill] sm:$0xff] }
 0x4e6   :  { %v3205_v22 = vadd.f32 %v3130_v40, %v8679_v26 }
 0x4e7   :  { %v4681_v56 = vsel %vm4529_vm8, %v4680_v3, %v4679_v18  ;;  %v4087_v55 = vadd.f32 %v7753_v0, %v4019_v62 }
 0x4e8   :  { %v3382_v54 = vpop.f32.mrf.mxu2  ;;  %v8142_v17 = vsel %vm4578_vm10, %v4681_v56, %v4721_v59 }
 0x4e9   :  { %v4151_v61 = vmax.f32 %v4087_v55, 0.0  ;;  %v3458_v28 = vadd.f32 %v3382_v54, %v3204_v2 }
 0x4eb   :  { %v4219_v14 = vmul.f32 %v7761_v19, %v4151_v61 }
 0x4ec   :  { %v3680_v50 = vpop.f32.mrf.mxu3  ;;  %v3941_v42 = vpop.f32.mrf.mxu0 }
 0x4ed   :  { %v4020_v45 = vadd.f32 %v3941_v42, %v3754_v32  ;;  %4336 = vadd.xlane.f32.xlu1 %v4219_v14  ;;  %v3133_v57 = vpop.f32.mrf.mxu1  ;;  %v3756_v11 = vadd.f32 %v3680_v50, %v3458_v28 }
 0x4ee   :  { %v3206_v24 = vadd.f32 %v3133_v57, %v8680_v36 }
 0x4ef   :  { %v4088_v13 = vadd.f32 %v7753_v0, %v4020_v45  ;;  %v8682_v45 = vld [vmem:[#allocation15_spill] sm:$0xff] }
 0x4f0   :  { %v3384_v51 = vpop.f32.mrf.mxu2 }
 0x4f1   :  { %v4152_v29 = vmax.f32 %v4088_v13, 0.0  ;;  %v3459_v33 = vadd.f32 %v3384_v51, %v3205_v22 }
 0x4f3   :  { %v4220_v44 = vmul.f32 %v7761_v19, %v4152_v29 }
 0x4f4   :  { %v3682_v1 = vpop.f32.mrf.mxu3  ;;  %v3943_v30 = vpop.f32.mrf.mxu0 }
 0x4f5   :  { %v4021_v25 = vadd.f32 %v3943_v30, %v3755_v53  ;;  %4338 = vadd.xlane.f32.xlu0 %v4220_v44  ;;  %v3135_v48 = vpop.f32.mrf.mxu1  ;;  %v3757_v31 = vadd.f32 %v3682_v1, %v3459_v33 }
 0x4f6   :  { %v3207_v56 = vadd.f32 %v3135_v48, %v8681_v21  ;;  %v4079_v21 = vadd.f32 %v8155_v15, %v8030_v60 }
 0x4f7   :  { %v4089_v59 = vadd.f32 %v7753_v0, %v4021_v25  ;;  %v8683_v25 = vld [vmem:[#allocation42_spill] sm:$0xff] }
 0x4f8   :  { %v3387_v27 = vpop.f32.mrf.mxu2 }
 0x4f9   :  { %v4153_v16 = vmax.f32 %v4089_v59, 0.0  ;;  %v3460_v12 = vadd.f32 %v3387_v27, %v3206_v24 }
 0x4fb   :  { %v4221_v9 = vmul.f32 %v7761_v19, %v4153_v16  ;;  %v8161_v19 = vld [vmem:[%s8357_s3] ss:$0 sm:$0xff] }
 0x4fc   :  { %v3946_v37 = vpop.f32.mrf.mxu0  ;;  %v3685_v4 = vpop.f32.mrf.mxu3 }
 0x4fd   :  { %v4022_v38 = vadd.f32 %v3946_v37, %v3756_v11  ;;  %4340 = vadd.xlane.f32.xlu1 %v4221_v9  ;;  %v3758_v58 = vadd.f32 %v3685_v4, %v3460_v12  ;;  %v3138_v3 = vpop.f32.mrf.mxu1  ;;  %v4081_v37 = vadd.f32 %v8155_v15, %v8092_v34  ;;  %v8684_v4 = vld [vmem:[#allocation49_spill] sm:$0xff] }
 0x4fe   :  { %v3208_v40 = vadd.f32 %v3138_v3, %v8682_v45 }
 0x4ff   :  { %v4090_v0 = vadd.f32 %v8155_v15, %v4022_v38  ;;  %v4145_v48 = vmax.f32 %v4081_v37, 0.0 }
 0x500   :  { %v3389_v41 = vpop.f32.mrf.mxu2 }
 0x501   :  { %v4154_v46 = vmax.f32 %v4090_v0, 0.0  ;;  %v3461_v61 = vadd.f32 %v3389_v41, %v3207_v56  ;;  %v4213_v24 = vmul.f32 %v8161_v19, %v4145_v48 }
 0x503   :  { %v4222_v10 = vmul.f32 %v8161_v19, %v4154_v46 }
 0x504   :  { %v3948_v5 = vpop.f32.mrf.mxu0  ;;  %v3687_v20 = vpop.f32.mrf.mxu3 }
 0x505   :  { %v4023_v63 = vadd.f32 %v3948_v5, %v3757_v31  ;;  %4342 = vadd.xlane.f32.xlu1 %v4222_v10  ;;  %v3759_v42 = vadd.f32 %v3687_v20, %v3461_v61  ;;  %v3140_v13 = vpop.f32.mrf.mxu1 }
 0x506   :  { %v3209_v28 = vadd.f32 %v3140_v13, %v8683_v25 }
 0x507   :  { %v4091_v7 = vadd.f32 %v8155_v15, %v4023_v63 }
 0x508   :  { %v3392_v55 = vpop.f32.mrf.mxu2 }
 0x509   :  { %v4155_v47 = vmax.f32 %v4091_v7, 0.0  ;;  %v3462_v51 = vadd.f32 %v3392_v55, %v3208_v40  ;;  %v8685_v7 = vld [vmem:[#allocation45_spill] sm:$0xff]  ;;  %v4307_v40 = vpop.xlane.xlu0 %4306 }
 0x50b   :  { %v4223_v18 = vmul.f32 %v8161_v19, %v4155_v47 }
 0x50c   :  { %v3951_v62 = vpop.f32.mrf.mxu0  ;;  %v3690_v50 = vpop.f32.mrf.mxu3 }
 0x50d   :  { %v4024_v54 = vadd.f32 %v3951_v62, %v3758_v58  ;;  %4344 = vadd.xlane.f32.xlu2 %v4223_v18  ;;  %v3760_v1 = vadd.f32 %v3690_v50, %v3462_v51  ;;  %v3143_v27 = vpop.f32.mrf.mxu1 }
 0x50e   :  { %v3210_v33 = vadd.f32 %v3143_v27, %v8684_v4 }
 0x50f   :  { %v4092_v32 = vadd.f32 %v8155_v15, %v4024_v54 }
 0x510   :  { %v3394_v53 = vpop.f32.mrf.mxu2 }
 0x511   :  { %v4156_v14 = vmax.f32 %v4092_v32, 0.0  ;;  %v3463_v57 = vadd.f32 %v3394_v53, %v3209_v28  ;;  %v4143_v32 = vmax.f32 %v4079_v21, 0.0  ;;  %v8193_v13 = vpop.xlane.xlu0 %4316 }
 0x513   :  { %v4224_v52 = vmul.f32 %v8161_v19, %v4156_v14 }
 0x514   :  { %v3953_v8 = vpop.f32.mrf.mxu0  ;;  %v3692_v43 = vpop.f32.mrf.mxu3 }
 0x515   :  { %v4025_v6 = vadd.f32 %v3953_v8, %v3759_v42  ;;  %4346 = vadd.xlane.f32.xlu2 %v4224_v52  ;;  %v3761_v26 = vadd.f32 %v3692_v43, %v3463_v57  ;;  %v3145_v5 = vpop.f32.mrf.mxu1  ;;  %v4080_v42 = vadd.f32 %v8155_v15, %v8058_v39  ;;  %v4211_v8 = vmul.f32 %v8161_v19, %v4143_v32 }
 0x516   :  { %v3211_v20 = vadd.f32 %v3145_v5, %v8685_v7 }
 0x517   :  { %v4093_v29 = vadd.f32 %v8155_v15, %v4025_v6  ;;  %v4144_v60 = vmax.f32 %v4080_v42, 0.0  ;;  %v4309_v6 = vpop.xlane.xlu1 %4308 }
 0x518   :  { %v3397_v9 = vpop.f32.mrf.mxu2 }
 0x519   :  { %v4157_v44 = vmax.f32 %v4093_v29, 0.0  ;;  %v3464_v31 = vadd.f32 %v3397_v9, %v3210_v33  ;;  %v4212_v45 = vmul.f32 %v8161_v19, %v4144_v60  ;;  %v4313_v29 = vpop.xlane.xlu2 %4312  ;;  %v8195_v53 = vpop.xlane.xlu0 %4318  ;;  %v8215_v9 = vld [vmem:[%s8359_s5 + $0x10] sm:$0xff] }
 0x51b   :  { %v4225_v30 = vmul.f32 %v8161_v19, %v4157_v44 }
 0x51c   :  { %v3956_v2 = vpop.f32.mrf.mxu0  ;;  %v3695_v46 = vpop.f32.mrf.mxu3 }
 0x51d   :  { %v4026_v59 = vadd.f32 %v3956_v2, %v3760_v1  ;;  %4348 = vadd.xlane.f32.xlu0 %v4225_v30  ;;  %v3762_v36 = vadd.f32 %v3695_v46, %v3464_v31 }
 0x51f   :  { %v4094_v16 = vadd.f32 %v8155_v15, %v4026_v59  ;;  %v4311_v51 = vpop.xlane.xlu1 %4310  ;;  %v8207_v59 = vld [vmem:[%s8359_s5 + $0x8] sm:$0xff] }
 0x520   :  { %v3399_v63 = vpop.f32.mrf.mxu2  ;;  %v8229_v33 = vadd.f32 %v7599_v23, %v4311_v51 }
 0x521   :  { %v4158_v11 = vmax.f32 %v4094_v16, 0.0  ;;  %v3465_v58 = vadd.f32 %v3399_v63, %v3211_v20  ;;  %v4315_v39 = vpop.xlane.xlu2 %4314 }
 0x523   :  { %v4226_v22 = vmul.f32 %v8161_v19, %v4158_v11  ;;  %v4399_v11 = vadd.f32 %v7599_v23, %v4309_v6 }
 0x524   :  { %v3958_v38 = vpop.f32.mrf.mxu0  ;;  %v3697_v3 = vpop.f32.mrf.mxu3 }
 0x525   :  { %v4027_v0 = vadd.f32 %v3958_v38, %v3761_v26  ;;  %4350 = vadd.xlane.f32.xlu0 %v4226_v22  ;;  %v3763_v56 = vadd.f32 %v3697_v3, %v3465_v58  ;;  %v8220_v26 = vadd.f32 %v7599_v23, %v4307_v40  ;;  %v4767_v22 = vld [vmem:[%s8360_s6 + $0x8] sm:$0xff]  ;;  %v4766_v38 = vld [vmem:[%s8360_s6] sm:$0xff]  ;;  %v4463_v4 = vmax.f32 %v4399_v11, 0.0 }
 0x526   :  { %4806 = vmatpush.msrb.mxu3 %v4767_v22  ;;  %v4402_v40 = vadd.f32 %v7599_v23, %v4315_v39  ;;  %v4403_v11 = vadd.f32 %v7599_v23, %v8193_v13 }
 0x527   :  { %v4095_v10 = vadd.f32 %v8155_v15, %v4027_v0 }
 0x528   :  { %4807 = vmatpush.msrb.mxu3 %v4766_v38 }
 0x529   :  { %v4159_v41 = vmax.f32 %v4095_v10, 0.0  ;;  %v4462_v10 = vmax.f32 %v8220_v26, 0.0 }
 0x52b   :  { %v4227_v34 = vmul.f32 %v8161_v19, %v4159_v41  ;;  %v8237_v41 = vadd.f32 %v7599_v23, %v4313_v29 }
 0x52c   :  { %v3961_v12 = vpop.f32.mrf.mxu0 }
 0x52d   :  { %v4028_v47 = vadd.f32 %v3961_v12, %v3762_v36  ;;  %4324 = vadd.xlane.f32.xlu0 %v4213_v24  ;;  %4352 = vadd.xlane.f32.xlu1 %v4227_v34  ;;  %v8244_v24 = vld [vmem:[%s8359_s5 + $0x18] sm:$0xff]  ;;  %v8247_v34 = vperm.slane %v4463_v4, %v7612_v35  ;;  %v4465_v32 = vmax.f32 %v8237_v41, 0.0 }
 0x52f   :  { %v4096_v18 = vadd.f32 %v8155_v15, %v4028_v47  ;;  %v4464_v47 = vmax.f32 %v8229_v33, 0.0 }
 0x531   :  { %v4160_v62 = vmax.f32 %v4096_v18, 0.0 }
 0x533   :  { %v4228_v54 = vmul.f32 %v8161_v19, %v4160_v62 }
 0x534   :  { %v3963_v55 = vpop.f32.mrf.mxu0 }
 0x535   :  { %v4029_v61 = vadd.f32 %v3963_v55, %v3763_v56  ;;  %4354 = vadd.xlane.f32.xlu1 %v4228_v54 }
 0x537   :  { %v4097_v14 = vadd.f32 %v8155_v15, %v4029_v61 }
 0x538   :  { %v4327_v30 = vpop.xlane.xlu2 %4326 }
 0x539   :  { %v4161_v50 = vmax.f32 %v4097_v14, 0.0  ;;  %v4408_v5 = vadd.f32 %v7599_v23, %v4327_v30 }
 0x53b   :  { %v4229_v52 = vmul.f32 %v8161_v19, %v4161_v50  ;;  %v8200_v19 = vld [vmem:[%s8359_s5] sm:$0xff]  ;;  %v4472_v14 = vmax.f32 %v4408_v5, 0.0  ;;  %s5543_s5 = smov [#allocation3]  }
 0x53c   :  { %5336 = vmatmul.msk.f32.vlgmr.msrb.gmra.mxu1 %vm4599_vm0, %v8200_v19  ;;  %s4846_s26 = sshll.u32 %s5543_s5, 4  ;;  %s4847_s26 = int_to_ptr.vmem [resolvable:$true] %s4846_s26 }
 0x53d   :  { %4356 = vadd.xlane.f32.xlu2 %v4229_v52  ;;  %4320 = vadd.xlane.f32.xlu1 %v4211_v8 }
 0x540   :  { %v4329_v15 = vpop.xlane.xlu0 %4328 }
 0x541   :  { %v4409_v0 = vadd.f32 %v7599_v23, %v4329_v15 }
 0x543   :  { %v4473_v58 = vmax.f32 %v4409_v0, 0.0 }
 0x544   :  { %5337 = vmatmul.msk.f32.gmra.mxu1 %vm4599_vm0, %v8207_v59 }
 0x545   :  { %4322 = vadd.xlane.f32.xlu2 %v4212_v45  ;;  %v4698_v6 = vperm.slane %v4473_v58, %v7612_v35 }
 0x548   :  { %v4331_v44 = vpop.xlane.xlu1 %4330 }
 0x549   :  { %v4410_v36 = vadd.f32 %v7599_v23, %v4331_v44 }
 0x54b   :  { %v4474_v50 = vmax.f32 %v4410_v36, 0.0 }
 0x54c   :  { %5338 = vmatmul.msk.f32.gmra.mxu1 %vm4599_vm0, %v8215_v9 }
 0x550   :  { %v4333_v25 = vpop.xlane.xlu2 %4332 }
 0x551   :  { %v4411_v46 = vadd.f32 %v7599_v23, %v4333_v25 }
 0x553   :  { %v4475_v18 = vmax.f32 %v4411_v46, 0.0 }
 0x554   :  { %5339 = vmatmul.msk.f32.gmra.mxu1 %vm4599_vm0, %v8244_v24 }
 0x555   :  { %v4701_v51 = vperm.slane %v4475_v18, %v7612_v35 }
 0x558   :  { %v4335_v43 = vpop.xlane.xlu0 %4334 }
 0x559   :  { %v4412_v63 = vadd.f32 %v7599_v23, %v4335_v43  ;;  %v4697_v43 = vperm.slane %v4472_v14, %v7604_v49 }
 0x55b   :  { %v4476_v52 = vmax.f32 %v4412_v63, 0.0 }
 0x55d   :  { %v4703_v39 = vperm.slane %v4476_v52, %v7604_v49 }
 0x560   :  { %v4337_v1 = vpop.xlane.xlu1 %4336 }
 0x561   :  { %v4413_v48 = vadd.f32 %v7599_v23, %v4337_v1 }
 0x563   :  { %v4477_v21 = vmax.f32 %v4413_v48, 0.0 }
 0x565   :  { %v4704_v44 = vperm.slane %v4477_v21, %v7612_v35 }
 0x567   :  { %v4705_v4 = vsel %vm4529_vm8, %v4704_v44, %v4703_v39  ;;  %v4685_v44 = vperm.slane %v4464_v47, %v7604_v49 }
 0x568   :  { %v4339_v28 = vpop.xlane.xlu0 %4338 }
 0x569   :  { %v4414_v12 = vadd.f32 %v7599_v23, %v4339_v28 }
 0x56b   :  { %v4478_v8 = vmax.f32 %v4414_v12, 0.0  ;;  %v4404_v12 = vadd.f32 %v7599_v23, %v8195_v53 }
 0x570   :  { %v4341_v2 = vpop.xlane.xlu1 %4340 }
 0x571   :  { %v4415_v31 = vadd.f32 %v7599_v23, %v4341_v2  ;;  %v4700_v2 = vperm.slane %v4474_v50, %v7604_v49 }
 0x573   :  { %v4479_v56 = vmax.f32 %v4415_v31, 0.0  ;;  %v4702_v22 = vsel %vm4529_vm8, %v4701_v51, %v4700_v2 }
 0x575   :  { %v4707_v15 = vperm.slane %v4479_v56, %v7612_v35 }
 0x578   :  { %v4343_v57 = vpop.xlane.xlu1 %4342 }
 0x579   :  { %v4416_v54 = vadd.f32 %v7599_v23, %v4343_v57  ;;  %v4706_v57 = vperm.slane %v4478_v8, %v7604_v49  ;;  %v4686_v8 = vperm.slane %v4465_v32, %v7612_v35 }
 0x57b   :  { %v4480_v1 = vmax.f32 %v4416_v54, 0.0  ;;  %v4708_v0 = vsel %vm4529_vm8, %v4707_v15, %v4706_v57  ;;  %v4466_v54 = vmax.f32 %v4402_v40, 0.0  ;;  %v4682_v40 = vperm.slane %v4462_v10, %v7604_v49 }
 0x57c   :  { %v4687_v2 = vsel %vm4529_vm8, %v4686_v8, %v4685_v44 }
 0x57d   :  { %v4709_v46 = vperm.slane %v4480_v1, %v7604_v49  ;;  %v4688_v26 = vperm.slane %v4466_v54, %v7604_v49 }
 0x580   :  { %v4345_v16 = vpop.xlane.xlu2 %4344 }
 0x581   :  { %v4417_v7 = vadd.f32 %v7599_v23, %v4345_v16 }
 0x583   :  { %v4481_v60 = vmax.f32 %v4417_v7, 0.0 }
 0x585   :  { %v4710_v16 = vperm.slane %v4481_v60, %v7612_v35  ;;  %v4468_v60 = vmax.f32 %v4404_v12, 0.0 }
 0x588   :  { %v4347_v20 = vpop.xlane.xlu2 %4346 }
 0x589   :  { %v4418_v42 = vadd.f32 %v7599_v23, %v4347_v20  ;;  %v4711_v20 = vsel %vm4529_vm8, %v4710_v16, %v4709_v46 }
 0x58b   :  { %v4482_v25 = vmax.f32 %v4418_v42, 0.0 }
 0x58d   :  { %v4712_v5 = vperm.slane %v4482_v25, %v7604_v49  ;;  %v4691_v25 = vperm.slane %v4468_v60, %v7604_v49 }
 0x590   :  { %v4349_v27 = vpop.xlane.xlu0 %4348 }
 0x591   :  { %v4419_v3 = vadd.f32 %v7599_v23, %v4349_v27 }
 0x593   :  { %v4483_v29 = vmax.f32 %v4419_v3, 0.0  ;;  %v4467_v3 = vmax.f32 %v4403_v11, 0.0 }
 0x595   :  { %v4713_v38 = vperm.slane %v4483_v29, %v7612_v35 }
 0x597   :  { %v4714_v21 = vsel %vm4529_vm8, %v4713_v38, %v4712_v5 }
 0x598   :  { %v4351_v62 = vpop.xlane.xlu0 %4350 }
 0x599   :  { %v4420_v45 = vadd.f32 %v7599_v23, %v4351_v62 }
 0x59b   :  { %v4484_v27 = vmax.f32 %v4420_v45, 0.0 }
 0x59d   :  { %v4715_v58 = vperm.slane %v4484_v27, %v7604_v49 }
 0x5a0   :  { %v4353_v37 = vpop.xlane.xlu1 %4352  ;;  %v4325_v18 = vpop.xlane.xlu0 %4324 }
 0x5a1   :  { %v4421_v55 = vadd.f32 %v7599_v23, %v4353_v37  ;;  %v4699_v37 = vsel %vm4529_vm8, %v4698_v6, %v4697_v43  ;;  %v4407_v50 = vadd.f32 %v7599_v23, %v4325_v18  ;;  %v4689_v6 = vperm.slane %v4467_v3, %v7612_v35 }
 0x5a2   :  { %v4728_v7 = vsel %vm4576_vm9, %v4702_v22, %v4699_v37 }
 0x5a3   :  { %v4485_v30 = vmax.f32 %v4421_v55, 0.0  ;;  %v4729_v62 = vsel %vm4578_vm10, %v4705_v4, %v4728_v7  ;;  %v4471_v10 = vmax.f32 %v4407_v50, 0.0  ;;  %v4690_v33 = vsel %vm4529_vm8, %v4689_v6, %v4688_v26 }
 0x5a4   :  { %v4730_v55 = vsel %vm4580_vm11, %v4708_v0, %v4729_v62 }
 0x5a5   :  { %v4716_v48 = vperm.slane %v4485_v30, %v7612_v35  ;;  %v4731_v53 = vsel %vm4582_vm12, %v4711_v20, %v4730_v55  ;;  %v4684_v30 = vsel %vm4529_vm8, %v8247_v34, %v4682_v40  ;;  %v4695_v34 = vperm.slane %v4471_v10, %v7612_v35 }
 0x5a6   :  { %v4732_v45 = vsel %vm4584_vm13, %v4714_v21, %v4731_v53 }
 0x5a8   :  { %v4355_v61 = vpop.xlane.xlu1 %4354 }
 0x5a9   :  { %v4422_v28 = vadd.f32 %v7599_v23, %v4355_v61  ;;  %v4717_v61 = vsel %vm4529_vm8, %v4716_v48, %v4715_v58 }
 0x5aa   :  { %v4733_v29 = vsel %vm4586_vm14, %v4717_v61, %v4732_v45 }
 0x5ab   :  { %v4486_v36 = vmax.f32 %v4422_v28, 0.0  ;;  %v4723_v28 = vsel %vm4580_vm11, %v4684_v30, %v8142_v17 }
 0x5ac   :  { %v4724_v16 = vsel %vm4582_vm12, %v4687_v2, %v4723_v28 }
 0x5ad   :  { %v4718_v42 = vperm.slane %v4486_v36, %v7604_v49 }
 0x5b0   :  { %v4357_v31 = vpop.xlane.xlu2 %4356  ;;  %v4321_v41 = vpop.xlane.xlu1 %4320 }
 0x5b1   :  { %v4423_v13 = vadd.f32 %v7599_v23, %v4357_v31  ;;  %v4405_v63 = vadd.f32 %v7599_v23, %v4321_v41 }
 0x5b3   :  { %v4487_v56 = vmax.f32 %v4423_v13, 0.0  ;;  %v4469_v14 = vmax.f32 %v4405_v63, 0.0 }
 0x5b5   :  { %v4719_v52 = vperm.slane %v4487_v56, %v7612_v35  ;;  %v4692_v15 = vperm.slane %v4469_v14, %v7612_v35 }
 0x5b7   :  { %v4720_v51 = vsel %vm4529_vm8, %v4719_v52, %v4718_v42  ;;  %v4693_v39 = vsel %vm4529_vm8, %v4692_v15, %v4691_v25 }
 0x5b8   :  { %v4323_v32 = vpop.xlane.xlu2 %4322  ;;  %v4734_v1 = vsel %vm4588_vm15, %v4720_v51, %v4733_v29 }
 0x5b9   :  { %v4406_v43 = vadd.f32 %v7599_v23, %v4323_v32  ;;  %4751 = vmatpush.msrb.mxu2 %v4734_v1  ;;  %v4725_v23 = vsel %vm4584_vm13, %v4690_v33, %v4724_v16 }
 0x5ba   :  { %v4726_v11 = vsel %vm4586_vm14, %v4693_v39, %v4725_v23 }
 0x5bb   :  { %v4470_v47 = vmax.f32 %v4406_v43, 0.0 }
 0x5bd   :  { %v4694_v57 = vperm.slane %v4470_v47, %v7604_v49  ;;  %v4629_v49 = vpop.f32.mrf.mxu1 }
 0x5be   :  { %5344 = vmatmul.msk.f32.vlgmr.msrb.gmra.mxu3 %vm4599_vm0, %v4629_v49 }
 0x5bf   :  { %v4696_v27 = vsel %vm4529_vm8, %v4695_v34, %v4694_v57 }
 0x5c0   :  { %v4727_v37 = vsel %vm4588_vm15, %v4696_v27, %v4726_v11 }
 0x5c1   :  { %4752 = vmatpush.msrb.mxu2 %v4727_v37 }
 0x5c2   :  { %5340 = vmatmul.msk.f32.vlgmr.msrb.gmra.mxu2 %vm4599_vm0, %v8200_v19 }
 0x5c5   :  { %v4632_v35 = vpop.f32.mrf.mxu1 }
 0x5c6   :  { %5345 = vmatmul.msk.f32.gmra.mxu3 %vm4599_vm0, %v4632_v35 }
 0x5ca   :  { %5341 = vmatmul.msk.f32.gmra.mxu2 %vm4599_vm0, %v8207_v59 }
 0x5cd   :  { %v4635_v17 = vpop.f32.mrf.mxu1 }
 0x5ce   :  { %5346 = vmatmul.msk.f32.gmra.mxu3 %vm4599_vm0, %v4635_v17 }
 0x5d2   :  { %5342 = vmatmul.msk.f32.gmra.mxu2 %vm4599_vm0, %v8215_v9 }
 0x5d5   :  { %v4638_v22 = vpop.f32.mrf.mxu1 }
 0x5d6   :  { %5347 = vmatmul.msk.f32.gmra.mxu3 %vm4599_vm0, %v4638_v22 }
 0x5da   :  { %5343 = vmatmul.msk.f32.gmra.mxu2 %vm4599_vm0, %v8244_v24 }
 0x641   :  { %v4809_v38 = vpop.f32.mrf.mxu3 }
 0x642   :  { %4834 = vst.msk [vmem:[#allocation3] sm:$0xff] %vm4833_vm1, %v4809_v38 }
 0x645   :  { %v4754_v19 = vpop.f32.mrf.mxu2 }
 0x646   :  { %5348 = vmatmul.msk.f32.gmra.mxu3 %vm4599_vm0, %v4754_v19 }
 0x649   :  { %v4812_v4 = vpop.f32.mrf.mxu3 }
 0x64a   :  { %4835 = vst.msk [vmem:[#allocation3 + $0x8] sm:$0xff] %vm4833_vm1, %v4812_v4 }
 0x64d   :  { %v4757_v59 = vpop.f32.mrf.mxu2 }
 0x64e   :  { %5349 = vmatmul.msk.f32.gmra.mxu3 %vm4599_vm0, %v4757_v59 }
 0x651   :  { %v4815_v0 = vpop.f32.mrf.mxu3 }
 0x652   :  { %4836 = vst.msk [vmem:[#allocation3 + $0x10] sm:$0xff] %vm4833_vm1, %v4815_v0 }
 0x655   :  { %v4760_v9 = vpop.f32.mrf.mxu2 }
 0x656   :  { %5350 = vmatmul.msk.f32.gmra.mxu3 %vm4599_vm0, %v4760_v9 }
 0x659   :  { %v4818_v46 = vpop.f32.mrf.mxu3 }
 0x65a   :  { %4837 = vst.msk [vmem:[#allocation3 + $0x18] sm:$0xff] %vm4833_vm1, %v4818_v46 }
 0x65d   :  { %v4763_v24 = vpop.f32.mrf.mxu2 }
 0x65e   :  { %5351 = vmatmul.msk.f32.gmra.mxu3 %vm4599_vm0, %v4763_v24 }
 0x6c9   :  { %v4821_v48 = vpop.f32.mrf.mxu3 }
 0x6ca   :  { %4838 = vst.msk [vmem:[#allocation3 + $0x20] sm:$0xff] %vm4833_vm1, %v4821_v48 }
 0x6d1   :  { %v4824_v31 = vpop.f32.mrf.mxu3 }
 0x6d2   :  { %4839 = vst.msk [vmem:[#allocation3 + $0x28] sm:$0xff] %vm4833_vm1, %v4824_v31 }
 0x6d9   :  { %v4827_v41 = vpop.f32.mrf.mxu3 }
 0x6da   :  { %4840 = vst.msk [vmem:[#allocation3 + $0x30] sm:$0xff] %vm4833_vm1, %v4827_v41 }
 0x6e1   :  { %v4830_v5 = vpop.f32.mrf.mxu3 }
 0x6e2   :  { %4841 = vst.msk [vmem:[#allocation3 + $0x38] sm:$0xff] %vm4833_vm1, %v4830_v5 }
 0x6e3   :  { %4854 = dma.vmem_to_hbm [thread:$0]  %s4847_s26, 1024, %s4849_s29, [#allocation4], %s5544_s30, %s5544_s30, %s5545_s8  }
 0x6e4   :  { %5541 = dma.done.wait [#allocation4], 1024  }
 0x6e5   :  { %5542 = vsyncadd [#allocation4], 4294966272 }
 0x6e6   :  { %4859 = vsyncpa [#allocation4], 1 }

</bundles_post_ra>
